<compile_context>
chip_gen: v7x
topology: tpu7x:2x2x1
jax: 0.10.0
libtpu: 0.0.40
codegen_flags: <defaults>
</compile_context>

<pallas_src>
import math
import functools

import jax
import jax.numpy as jnp
from jax import lax
from jax.experimental import pallas as pl
from jax.experimental.pallas import tpu as pltpu


# --------------------------------------------------------------------------
# generation-aware budgets
# --------------------------------------------------------------------------

def _tpu_vmem_bytes():
    try:
        info = pltpu.get_tpu_info()
    except Exception:
        return 64 * 1024 * 1024          # conservative (v7x per-TC physical)
    for attr in ("vmem_capacity_bytes", "vmem_bytes", "vmem_size_bytes"):
        v = getattr(info, attr, None)
        if isinstance(v, int) and v > 0:
            return v
    return 64 * 1024 * 1024


_PHYS_VMEM = _tpu_vmem_bytes()
_VMEM_LIMIT = int(min(_PHYS_VMEM * 3 // 4, 100 * 1024 * 1024))   # leave headroom
_TILE_P_CAP = 1024 if _PHYS_VMEM >= 100 * 1024 * 1024 else 512   # v5e/v6e vs v7x


def _pick_tile(n, cap, quanta):
    """Largest divisor of n <= cap that is a multiple of one of `quanta`
    (tried in order). Falls back to the full extent (always legal)."""
    if n <= cap:
        return n
    for q in quanta:
        start = cap - cap % q
        for d in range(start, 0, -q):
            if n % d == 0:
                return d
    # TODO(synk): pad awkward (e.g. prime) extents instead of falling back to the
    # full array, which may exceed the VMEM budget for very large inputs.
    return n


def _pick_tn(cin, cout):
    # Prefer the full weight panel (x streamed exactly once) whenever the bf16
    # (Cin, Cout) panel is small; otherwise tile with 256 (MXU-N) / 128 quanta.
    if cin * cout * 2 <= 8 * 1024 * 1024:
        return cout
    return _pick_tile(cout, 512, (256, 128))


def _pick_bb(B, block_b=16):
    """Batch-row block for the attention core; guarantees >= 2 (ideally >= 4)
    grid steps so megacore sharding / double buffering have work to split."""
    cap = max(1, min(block_b, B // 4 if B >= 4 else 1))
    for bb in range(cap, 0, -1):
        if B % bb == 0:
            return bb
    return 1


# --------------------------------------------------------------------------
# Pallas kernels
# --------------------------------------------------------------------------

def _pointwise_kernel(x_ref, w_ref, s_ref, b_ref, o_ref, *, relu_out):
    """1x1 conv (channel matmul, bf16 operands / f32 accumulate) + folded BN
    affine + optional ReLU. Stores bf16 (or o_ref dtype)."""
    x = x_ref[...]
    if x.dtype != jnp.bfloat16:          # only the very first (f32) layer casts
        x = x.astype(jnp.bfloat16)
    y = jnp.dot(x, w_ref[...], preferred_element_type=jnp.float32)
    y = y * s_ref[...] + b_ref[...]
    if relu_out:
        y = jnp.maximum(y, 0.0)
    o_ref[...] = y.astype(o_ref.dtype)


def _pointwise_res_kernel(x_ref, w_ref, s_ref, b_ref, r_ref, o_ref):
    """ReLU -> 1x1 conv_up (bf16 MXU) -> BN2 -> +identity (f32) -> ReLU (fused)."""
    x = jnp.maximum(x_ref[...], 0).astype(jnp.bfloat16)
    y = jnp.dot(x, w_ref[...], preferred_element_type=jnp.float32)
    y = y * s_ref[...] + b_ref[...] + r_ref[...]
    o_ref[...] = jnp.maximum(y, 0.0).astype(o_ref.dtype)


def _axial_attn_kernel(qkv_ref, qe_ref, ke_ref, ve_ref, sp_ref, op_ref, o_ref,
                       *, groups, gp):
    """Axial attention core for a block of BB batch rows, all groups fused.

    qkv_ref: (BB, L, 2*G*gp) bf16, per-group channel order [q(cq), k(cq), v(gp)]
    qe_ref : (cq, L, L) f32, [c,i,j] = q_emb[c,i,j]
    ke_ref : (cq, L, L) f32, [c,i,j] = k_emb[c,j,i]
    ve_ref : (gp, L, L) f32, [c,i,j] = v_emb[c,i,j]
    sp_ref (SMEM): (4, G) folded bn_similarity [s_qk, s_qr, s_kr, bias_sum]
    op_ref : (3, G*gp) folded bn_output [scale_sv, scale_sve, bias_sum]
    o_ref  : (BB, L, G*gp) bf16, lane-dense output block
    """
    cq = gp // 2
    qe = qe_ref[...]
    ke = ke_ref[...]
    ve = ve_ref[...]
    op = op_ref[...]

    for g in range(groups):                      # static unroll over groups
        base = g * 2 * gp
        q = qkv_ref[:, :, base:base + cq]                  # (BB, L, cq)  bf16
        k = qkv_ref[:, :, base + cq:base + 2 * cq]         # (BB, L, cq)  bf16
        v = qkv_ref[:, :, base + 2 * cq:base + 2 * gp]     # (BB, L, gp)  bf16

        # qk[b,i,j] = sum_c q[b,i,c]*k[b,j,c]  -> batched MXU matmul
        qk = lax.dot_general(q, k, (((2,), (2,)), ((0,), (0,))),
                             preferred_element_type=jnp.float32)   # (BB,L,L)

        # qr[b,i,j] = sum_c q[b,i,c]*q_emb[c,i,j]
        # kr[b,i,j] = sum_c k[b,j,c]*k_emb[c,j,i]
        # tiny cq -> unrolled VPU accumulation into (BB,L,L); no 4-D temporaries.
        qr = q[:, :, 0:1] * qe[0][None]
        kr = k[:, :, 0][:, None, :] * ke[0][None]
        for c in range(1, cq):
            qr = qr + q[:, :, c:c + 1] * qe[c][None]
            kr = kr + k[:, :, c][:, None, :] * ke[c][None]

        sim = (qk * sp_ref[0, g] + qr * sp_ref[1, g]
               + kr * sp_ref[2, g] + sp_ref[3, g])

        # softmax numerator; normalize AFTER the value contractions (same math)
        p = jnp.exp(sim - jnp.max(sim, axis=-1, keepdims=True))    # (BB,L,L)
        inv_den = pl.reciprocal(jnp.sum(p, axis=-1, keepdims=True),
                                approx=True)                       # (BB,L,1)

        # sv[b,i,c] = sum_j p[b,i,j]*v[b,j,c]  -> batched MXU matmul
        sv = lax.dot_general(p.astype(jnp.bfloat16), v,
                             (((2,), (1,)), ((0,), (0,))),
                             preferred_element_type=jnp.float32)   # (BB,L,gp)

        # sve[b,i,c] = sum_j p[b,i,j]*v_emb[c,i,j]  (tiny gp -> unrolled lane reduce)
        sve = jnp.concatenate(
            [jnp.sum(p * ve[c][None], axis=-1, keepdims=True) for c in range(gp)],
            axis=-1)                                               # (BB,L,gp)

        sl = slice(g * gp, (g + 1) * gp)
        out = (sv * op[0, sl] + sve * op[1, sl]) * inv_den + op[2, sl]
        o_ref[:, :, sl] = out.astype(o_ref.dtype)    # per-group lane-slice store


# --------------------------------------------------------------------------
# Pallas wrappers
# --------------------------------------------------------------------------

def pointwise_conv_bn(x, w, scale, bias, relu_out=False, out_dtype=jnp.bfloat16):
    P, Cin = x.shape
    Cout = w.shape[1]
    tp = _pick_tile(P, _TILE_P_CAP, (16, 8))
    tn = _pick_tn(Cin, Cout)
    grid = (P // tp, Cout // tn)
    return pl.pallas_call(
        functools.partial(_pointwise_kernel, relu_out=relu_out),
        out_shape=jax.ShapeDtypeStruct((P, Cout), out_dtype),
        grid=grid,
        in_specs=[pl.BlockSpec((tp, Cin), lambda i, j: (i, 0)),
                  pl.BlockSpec((Cin, tn), lambda i, j: (0, j)),
                  pl.BlockSpec((1, tn), lambda i, j: (0, j)),
                  pl.BlockSpec((1, tn), lambda i, j: (0, j))],
        out_specs=pl.BlockSpec((tp, tn), lambda i, j: (i, j)),
        compiler_params=pltpu.CompilerParams(
            dimension_semantics=("parallel", "parallel"),
            vmem_limit_bytes=_VMEM_LIMIT),
    )(x, w.astype(jnp.bfloat16), scale.reshape(1, Cout), bias.reshape(1, Cout))


def pointwise_conv_bn_res(x, w, scale, bias, res):
    P, Cin = x.shape
    Cout = w.shape[1]
    assert res.shape == (P, Cout)
    tp = _pick_tile(P, _TILE_P_CAP, (16, 8))
    tn = _pick_tn(Cin, Cout)
    grid = (P // tp, Cout // tn)
    return pl.pallas_call(
        _pointwise_res_kernel,
        out_shape=jax.ShapeDtypeStruct((P, Cout), jnp.float32),
        grid=grid,
        in_specs=[pl.BlockSpec((tp, Cin), lambda i, j: (i, 0)),
                  pl.BlockSpec((Cin, tn), lambda i, j: (0, j)),
                  pl.BlockSpec((1, tn), lambda i, j: (0, j)),
                  pl.BlockSpec((1, tn), lambda i, j: (0, j)),
                  pl.BlockSpec((tp, tn), lambda i, j: (i, j))],
        out_specs=pl.BlockSpec((tp, tn), lambda i, j: (i, j)),
        compiler_params=pltpu.CompilerParams(
            dimension_semantics=("parallel", "parallel"),
            vmem_limit_bytes=_VMEM_LIMIT),
    )(x, w.astype(jnp.bfloat16), scale.reshape(1, Cout), bias.reshape(1, Cout), res)


def axial_attn_core(t, qe, ke, ve, sp, op, *, groups, gp, block_b=16):
    """t: (B, L, 2*G*gp) bf16 fused qkv (channel-last). Returns (B, L, G*gp) bf16."""
    B, L, C2 = t.shape
    C = groups * gp
    cq = gp // 2
    assert C2 == 2 * C
    BB = _pick_bb(B, block_b)
    grid = (B // BB,)
    # TODO(synk): qe/ke/ve/op are grid-invariant; pipeline_mode=pl.Buffered(1)
    # would save VMEM but is skipped here for lowering-compatibility safety.
    return pl.pallas_call(
        functools.partial(_axial_attn_kernel, groups=groups, gp=gp),
        out_shape=jax.ShapeDtypeStruct((B, L, C), jnp.bfloat16),
        grid=grid,
        in_specs=[
            pl.BlockSpec((BB, L, C2), lambda i: (i, 0, 0)),
            pl.BlockSpec((cq, L, L), lambda i: (0, 0, 0)),
            pl.BlockSpec((cq, L, L), lambda i: (0, 0, 0)),
            pl.BlockSpec((gp, L, L), lambda i: (0, 0, 0)),
            pl.BlockSpec(memory_space=pltpu.MemorySpace.SMEM),
            pl.BlockSpec((3, C), lambda i: (0, 0)),
        ],
        out_specs=pl.BlockSpec((BB, L, C), lambda i: (i, 0, 0)),
        compiler_params=pltpu.CompilerParams(
            dimension_semantics=("parallel",),
            vmem_limit_bytes=_VMEM_LIMIT),
    )(t, qe, ke, ve, sp, op)


# --------------------------------------------------------------------------
# Pure-JAX reference cores (same math / same dtype casts; verification only)
# --------------------------------------------------------------------------

def pointwise_ref(x, w, scale, bias, relu_out=False, out_dtype=jnp.bfloat16):
    y = jnp.dot(x.astype(jnp.bfloat16), w.astype(jnp.bfloat16),
                preferred_element_type=jnp.float32)
    y = y * scale + bias
    if relu_out:
        y = jnp.maximum(y, 0.0)
    return y.astype(out_dtype)


def pointwise_res_ref(x, w, scale, bias, res):
    y = jnp.dot(jnp.maximum(x, 0).astype(jnp.bfloat16), w.astype(jnp.bfloat16),
                preferred_element_type=jnp.float32) * scale + bias + res
    return jnp.maximum(y, 0.0)


def axial_attn_core_ref(t, qe, ke, ve, sp, op, *, groups, gp, block_b=16):
    B, L, _ = t.shape
    cq = gp // 2
    outs = []
    for g in range(groups):
        base = g * 2 * gp
        q = t[:, :, base:base + cq]
        k = t[:, :, base + cq:base + 2 * cq]
        v = t[:, :, base + 2 * cq:base + 2 * gp]
        qk = jnp.einsum('bic,bjc->bij', q, k, preferred_element_type=jnp.float32)
        qr = jnp.einsum('bic,cij->bij', q.astype(jnp.float32), qe)
        kr = jnp.einsum('bjc,cij->bij', k.astype(jnp.float32), ke)
        sim = qk * sp[0, g] + qr * sp[1, g] + kr * sp[2, g] + sp[3, g]
        p = jnp.exp(sim - jnp.max(sim, axis=-1, keepdims=True))
        den = jnp.sum(p, axis=-1, keepdims=True)
        sv = jnp.einsum('bij,bjc->bic', p.astype(jnp.bfloat16), v,
                        preferred_element_type=jnp.float32)
        sve = jnp.einsum('bij,cij->bic', p, ve)
        sl = slice(g * gp, (g + 1) * gp)
        outs.append((sv * op[0, sl] + sve * op[1, sl]) / den + op[2, sl])
    o = jnp.concatenate(outs, axis=-1) if groups > 1 else outs[0]
    return o.astype(jnp.bfloat16)


# --------------------------------------------------------------------------
# Glue: AxialAttention + AxialBlock forward
# --------------------------------------------------------------------------

def axial_attention(x_flat, N, H, W, p, axis, pw, core):
    """x_flat: (N*H*W, C) NHWC-flattened bf16. axis=0 -> attend along H
    ('hight_block'), axis=1 -> attend along W ('width_block').
    Returns (N*H*W, out_planes) bf16."""
    G, gp = p['groups'], p['group_planes']
    C = G * gp
    # qkv_transform (Conv1d k=1) + bn_qkv, fused into the pointwise kernel (bf16 out)
    qkv = pw(x_flat, p['w_qkv'], p['bn_qkv_s'], p['bn_qkv_b'])        # (P, 2C)
    qkv4 = qkv.reshape(N, H, W, 2 * C)
    if axis == 0:   # batch rows (n, w), sequence = H: one transpose in / one out
        t = jnp.transpose(qkv4, (0, 2, 1, 3)).reshape(N * W, H, 2 * C)
        L, B2 = H, W
    else:           # batch rows (n, h), sequence = W: channel-last layout is native
        t = qkv4.reshape(N * H, W, 2 * C)
        L, B2 = W, H
    o = core(t, p['q_emb'], p['k_emb'], p['v_emb'],
             p['sim_params'], p['out_params'], groups=G, gp=gp)       # (B, L, C)
    o = o.reshape(N, B2, L, C)
    if axis == 0:
        o = jnp.transpose(o, (0, 2, 1, 3))                            # -> (N, H, W, C)
    return o.reshape(N * H * W, C)


def axial_block_forward(x_nchw, prm, use_pallas=True):
    N, C, H, W = x_nchw.shape
    pw = pointwise_conv_bn if use_pallas else pointwise_ref
    pw_res = pointwise_conv_bn_res if use_pallas else pointwise_res_ref
    core = axial_attn_core if use_pallas else axial_attn_core_ref

    xp = jnp.transpose(x_nchw, (0, 2, 3, 1)).reshape(N * H * W, C)    # NHWC flat f32
    # conv_down + bn1 + relu  (bf16 activations from here on)
    h = pw(xp, prm['w_down'], prm['bn1_s'], prm['bn1_b'], relu_out=True)
    # hight_block (attend along H), then width_block (attend along W)
    h = axial_attention(h, N, H, W, prm['hb'], axis=0, pw=pw, core=core)
    h = axial_attention(h, N, H, W, prm['wb'], axis=1, pw=pw, core=core)
    # relu -> conv_up -> bn2 -> +identity -> relu (fused, f32 output)
    out = pw_res(h, prm['w_up'], prm['bn2_s'], prm['bn2_b'], xp)
    return jnp.transpose(out.reshape(N, H, W, -1), (0, 3, 1, 2))


# --------------------------------------------------------------------------
# Deterministic parameter construction
# --------------------------------------------------------------------------

def make_bn_fold(key, C, eps=1e-5):
    k1, k2 = jax.random.split(key)
    gamma = 1.0 + 0.1 * jax.random.normal(k1, (C,), jnp.float32)
    beta = 0.1 * jax.random.normal(k2, (C,), jnp.float32)
    running_mean = jnp.zeros((C,), jnp.float32)
    running_var = jnp.ones((C,), jnp.float32)
    s = gamma / jnp.sqrt(running_var + eps)
    return s, beta - running_mean * s


def make_axial_attention_params(key, in_planes, out_planes, groups, K):
    gp = out_planes // groups
    cq = gp // 2
    ks = jax.random.split(key, 5)
    w_qkv = (jax.random.normal(ks[0], (in_planes, 2 * out_planes), jnp.float32)
             * math.sqrt(1.0 / in_planes))
    relative = (jax.random.normal(ks[1], (2 * gp, 2 * K - 1), jnp.float32)
                * math.sqrt(1.0 / gp))
    bn_qkv_s, bn_qkv_b = make_bn_fold(ks[2], 2 * out_planes)
    bn_sim_s, bn_sim_b = make_bn_fold(ks[3], 3 * groups)
    bn_out_s, bn_out_b = make_bn_fold(ks[4], 2 * out_planes)

    # relative positional embeddings (torch.index_select on flatten_index)
    rel_idx = jnp.arange(K)[:, None] - jnp.arange(K)[None, :] + K - 1   # (K, K)
    all_emb = relative[:, rel_idx]                                      # (2gp, K, K)
    q_emb = all_emb[:cq]                                   # [c,i,j] = q_emb[c,i,j]
    k_emb = jnp.transpose(all_emb[cq:2 * cq], (0, 2, 1))   # [c,i,j] = k_emb[c,j,i]
    v_emb = all_emb[2 * cq:]                               # [c,i,j] = v_emb[c,i,j]

    # fold bn_similarity (channels ordered [qk(G), qr(G), kr(G)])
    sim_params = jnp.stack(
        [bn_sim_s[:groups], bn_sim_s[groups:2 * groups], bn_sim_s[2 * groups:],
         bn_sim_b[:groups] + bn_sim_b[groups:2 * groups] + bn_sim_b[2 * groups:]],
        axis=0)                                   # (4, G)

    # fold bn_output (channel = 2*(g*gp+c) + {0:sv, 1:sve}); sum over the "2" axis
    out_params = jnp.stack([bn_out_s[0::2], bn_out_s[1::2],
                            bn_out_b[0::2] + bn_out_b[1::2]], axis=0)   # (3, G*gp)

    return dict(groups=groups, group_planes=gp, w_qkv=w_qkv,
                bn_qkv_s=bn_qkv_s, bn_qkv_b=bn_qkv_b,
                q_emb=q_emb, k_emb=k_emb, v_emb=v_emb,
                sim_params=sim_params, out_params=out_params)


def make_axial_block_params(key, inplanes, planes, groups, K, base_width=64):
    width = int(planes * (base_width / 64.0))
    ks = jax.random.split(key, 6)
    w_down = (jax.random.normal(ks[0], (inplanes, width), jnp.float32)
              * math.sqrt(1.0 / inplanes))
    bn1_s, bn1_b = make_bn_fold(ks[1], width)
    hb = make_axial_attention_params(ks[2], width, width, groups, K)
    wb = make_axial_attention_params(ks[3], width, width, groups, K)
    w_up = (jax.random.normal(ks[4], (width, planes * 2), jnp.float32)
            * math.sqrt(1.0 / width))
    bn2_s, bn2_b = make_bn_fold(ks[5], planes * 2)
    return dict(w_down=w_down, bn1_s=bn1_s, bn1_b=bn1_b, hb=hb, wb=wb,
                w_up=w_up, bn2_s=bn2_s, bn2_b=bn2_b)


# --------------------------------------------------------------------------

if __name__ == "__main__":
    key = jax.random.PRNGKey(0)
    # AxialBlock(inplanes=16, planes=8, groups=2, kernel_size=8); expansion=2 so
    # planes*2 == inplanes (residual add, no downsample); H = W = kernel_size = 8.
    N, inplanes, H, W = 2, 16, 8, 8
    planes, groups, K = 8, 2, 8

    kx, kp = jax.random.split(key)
    x = jax.random.normal(kx, (N, inplanes, H, W), jnp.float32)
    prm = make_axial_block_params(kp, inplanes, planes, groups, K)

    fwd = jax.jit(lambda xx: axial_block_forward(xx, prm, use_pallas=True))
    ref_fwd = jax.jit(lambda xx: axial_block_forward(xx, prm, use_pallas=False))

    y = jax.block_until_ready(fwd(x))
    assert y.shape == (N, planes * 2, H, W), y.shape

    # verify Pallas kernels against a pure-JAX reference of the same math
    # (same bf16 casts; tolerance covers the approx-reciprocal softmax)
    y_ref = jax.block_until_ready(ref_fwd(x))
    scale = float(jnp.max(jnp.abs(y_ref)))
    err = float(jnp.max(jnp.abs(y - y_ref)))
    assert err <= 2e-2 * max(1.0, scale), f"mismatch vs reference: {err} (scale {scale})"

    print("KERNEL_OK")
</pallas_src>

<mosaic_0001>
module attributes {stable_mosaic.version = 11 : i64} {
  func.func @_pointwise_kernel(%arg0: i32, %arg1: i32, %arg2: memref<128x16xf32, #tpu.memory_space<vmem>>, %arg3: memref<16x8xbf16, #tpu.memory_space<vmem>>, %arg4: memref<1x8xf32, #tpu.memory_space<vmem>>, %arg5: memref<1x8xf32, #tpu.memory_space<vmem>>, %arg6: memref<128x8xbf16, #tpu.memory_space<vmem>>) attributes {dimension_semantics = [#tpu.dimension_semantics<parallel>, #tpu.dimension_semantics<parallel>], iteration_bounds = array<i64: 1, 1>, scalar_prefetch = 0 : i64, scratch_operands = 0 : i64, tpu.core_type = #tpu.core_type<tc>, window_params = [{transform_indices = @transform_0, window_bounds = array<i64: 128, 16>}, {transform_indices = @transform_1, window_bounds = array<i64: 16, 8>}, {transform_indices = @transform_2, window_bounds = array<i64: 1, 8>}, {transform_indices = @transform_3, window_bounds = array<i64: 1, 8>}, {transform_indices = @transform_4, window_bounds = array<i64: 128, 8>}]} {
    %c0 = arith.constant 0 : index
    %c0_0 = arith.constant 0 : index
    %0 = vector.load %arg2[%c0, %c0_0] : memref<128x16xf32, #tpu.memory_space<vmem>>, vector<128x16xf32>
    %1 = arith.truncf %0 : vector<128x16xf32> to vector<128x16xbf16>
    %c0_1 = arith.constant 0 : index
    %c0_2 = arith.constant 0 : index
    %2 = vector.load %arg3[%c0_1, %c0_2] : memref<16x8xbf16, #tpu.memory_space<vmem>>, vector<16x8xbf16>
    %cst = arith.constant dense<0.000000e+00> : vector<128x8xf32>
    %3 = tpu.matmul %1, %2, %cst {dimension_numbers = #tpu.dot_dimension_numbers<[1], [0], [0], [1], [0, 0, 1, 1], [], []>} : vector<128x16xbf16>, vector<16x8xbf16>, vector<128x8xf32> -> vector<128x8xf32>
    %c0_3 = arith.constant 0 : index
    %c0_4 = arith.constant 0 : index
    %4 = vector.load %arg4[%c0_3, %c0_4] : memref<1x8xf32, #tpu.memory_space<vmem>>, vector<1x8xf32>
    %5 = vector.broadcast %4 : vector<1x8xf32> to vector<128x8xf32>
    %6 = arith.mulf %3, %5 : vector<128x8xf32>
    %c0_5 = arith.constant 0 : index
    %c0_6 = arith.constant 0 : index
    %7 = vector.load %arg5[%c0_5, %c0_6] : memref<1x8xf32, #tpu.memory_space<vmem>>, vector<1x8xf32>
    %8 = vector.broadcast %7 : vector<1x8xf32> to vector<128x8xf32>
    %9 = arith.addf %6, %8 : vector<128x8xf32>
    %cst_7 = arith.constant 0.000000e+00 : f32
    %10 = vector.broadcast %cst_7 : f32 to vector<128x8xf32>
    %11 = arith.maximumf %9, %10 : vector<128x8xf32>
    %12 = arith.truncf %11 : vector<128x8xf32> to vector<128x8xbf16>
    %c0_8 = arith.constant 0 : index
    %c0_9 = arith.constant 0 : index
    %13 = vector.load %arg6[%c0_8, %c0_9] : memref<128x8xbf16, #tpu.memory_space<vmem>>, vector<128x8xbf16>
    tpu.vector_store %arg6[%c0_8, %c0_9], %12 {strides = array<i32>} : memref<128x8xbf16, #tpu.memory_space<vmem>>, vector<128x8xbf16>,
    return
  }
  func.func @transform_0(%arg0: i32, %arg1: i32) -> (i32, i32) {
    %c0_i32 = arith.constant 0 : i32
    %c0_i32_0 = arith.constant 0 : i32
    return %arg0, %c0_i32 : i32, i32
  }
  func.func @transform_1(%arg0: i32, %arg1: i32) -> (i32, i32) {
    %c0_i32 = arith.constant 0 : i32
    %c0_i32_0 = arith.constant 0 : i32
    return %c0_i32, %arg1 : i32, i32
  }
  func.func @transform_2(%arg0: i32, %arg1: i32) -> (i32, i32) {
    %c0_i32 = arith.constant 0 : i32
    %c0_i32_0 = arith.constant 0 : i32
    return %c0_i32, %arg1 : i32, i32
  }
  func.func @transform_3(%arg0: i32, %arg1: i32) -> (i32, i32) {
    %c0_i32 = arith.constant 0 : i32
    %c0_i32_0 = arith.constant 0 : i32
    return %c0_i32, %arg1 : i32, i32
  }
  func.func @transform_4(%arg0: i32, %arg1: i32) -> (i32, i32) {
    %c0_i32 = arith.constant 0 : i32
    return %arg0, %arg1 : i32, i32
  }
}

module attributes {stable_mosaic.version = 11 : i64} {
  func.func @_pointwise_kernel(%arg0: i32, %arg1: i32, %arg2: memref<128x8xbf16, #tpu.memory_space<vmem>>, %arg3: memref<8x16xbf16, #tpu.memory_space<vmem>>, %arg4: memref<1x16xf32, #tpu.memory_space<vmem>>, %arg5: memref<1x16xf32, #tpu.memory_space<vmem>>, %arg6: memref<128x16xbf16, #tpu.memory_space<vmem>>) attributes {dimension_semantics = [#tpu.dimension_semantics<parallel>, #tpu.dimension_semantics<parallel>], iteration_bounds = array<i64: 1, 1>, scalar_prefetch = 0 : i64, scratch_operands = 0 : i64, tpu.core_type = #tpu.core_type<tc>, window_params = [{transform_indices = @transform_0, window_bounds = array<i64: 128, 8>}, {transform_indices = @transform_1, window_bounds = array<i64: 8, 16>}, {transform_indices = @transform_2, window_bounds = array<i64: 1, 16>}, {transform_indices = @transform_3, window_bounds = array<i64: 1, 16>}, {transform_indices = @transform_4, window_bounds = array<i64: 128, 16>}]} {
    %c0 = arith.constant 0 : index
    %c0_0 = arith.constant 0 : index
    %0 = vector.load %arg2[%c0, %c0_0] : memref<128x8xbf16, #tpu.memory_space<vmem>>, vector<128x8xbf16>
    %c0_1 = arith.constant 0 : index
    %c0_2 = arith.constant 0 : index
    %1 = vector.load %arg3[%c0_1, %c0_2] : memref<8x16xbf16, #tpu.memory_space<vmem>>, vector<8x16xbf16>
    %cst = arith.constant dense<0.000000e+00> : vector<128x16xf32>
    %2 = tpu.matmul %0, %1, %cst {dimension_numbers = #tpu.dot_dimension_numbers<[1], [0], [0], [1], [0, 0, 1, 1], [], []>} : vector<128x8xbf16>, vector<8x16xbf16>, vector<128x16xf32> -> vector<128x16xf32>
    %c0_3 = arith.constant 0 : index
    %c0_4 = arith.constant 0 : index
    %3 = vector.load %arg4[%c0_3, %c0_4] : memref<1x16xf32, #tpu.memory_space<vmem>>, vector<1x16xf32>
    %4 = vector.broadcast %3 : vector<1x16xf32> to vector<128x16xf32>
    %5 = arith.mulf %2, %4 : vector<128x16xf32>
    %c0_5 = arith.constant 0 : index
    %c0_6 = arith.constant 0 : index
    %6 = vector.load %arg5[%c0_5, %c0_6] : memref<1x16xf32, #tpu.memory_space<vmem>>, vector<1x16xf32>
    %7 = vector.broadcast %6 : vector<1x16xf32> to vector<128x16xf32>
    %8 = arith.addf %5, %7 : vector<128x16xf32>
    %9 = arith.truncf %8 : vector<128x16xf32> to vector<128x16xbf16>
    %c0_7 = arith.constant 0 : index
    %c0_8 = arith.constant 0 : index
    %10 = vector.load %arg6[%c0_7, %c0_8] : memref<128x16xbf16, #tpu.memory_space<vmem>>, vector<128x16xbf16>
    tpu.vector_store %arg6[%c0_7, %c0_8], %9 {strides = array<i32>} : memref<128x16xbf16, #tpu.memory_space<vmem>>, vector<128x16xbf16>,
    return
  }
  func.func @transform_0(%arg0: i32, %arg1: i32) -> (i32, i32) {
    %c0_i32 = arith.constant 0 : i32
    %c0_i32_0 = arith.constant 0 : i32
    return %arg0, %c0_i32 : i32, i32
  }
  func.func @transform_1(%arg0: i32, %arg1: i32) -> (i32, i32) {
    %c0_i32 = arith.constant 0 : i32
    %c0_i32_0 = arith.constant 0 : i32
    return %c0_i32, %arg1 : i32, i32
  }
  func.func @transform_2(%arg0: i32, %arg1: i32) -> (i32, i32) {
    %c0_i32 = arith.constant 0 : i32
    %c0_i32_0 = arith.constant 0 : i32
    return %c0_i32, %arg1 : i32, i32
  }
  func.func @transform_3(%arg0: i32, %arg1: i32) -> (i32, i32) {
    %c0_i32 = arith.constant 0 : i32
    %c0_i32_0 = arith.constant 0 : i32
    return %c0_i32, %arg1 : i32, i32
  }
  func.func @transform_4(%arg0: i32, %arg1: i32) -> (i32, i32) {
    %c0_i32 = arith.constant 0 : i32
    return %arg0, %arg1 : i32, i32
  }
}

module attributes {stable_mosaic.version = 11 : i64} {
  func.func @_axial_attn_kernel(%arg0: i32, %arg1: memref<4x8x16xbf16, #tpu.memory_space<vmem>>, %arg2: memref<2x8x8xf32, #tpu.memory_space<vmem>>, %arg3: memref<2x8x8xf32, #tpu.memory_space<vmem>>, %arg4: memref<4x8x8xf32, #tpu.memory_space<vmem>>, %arg5: memref<4x2xf32, #tpu.memory_space<smem>>, %arg6: memref<3x8xf32, #tpu.memory_space<vmem>>, %arg7: memref<4x8x8xbf16, #tpu.memory_space<vmem>>) attributes {dimension_semantics = [#tpu.dimension_semantics<parallel>], iteration_bounds = array<i64: 4>, scalar_prefetch = 0 : i64, scratch_operands = 0 : i64, tpu.core_type = #tpu.core_type<tc>, window_params = [{transform_indices = @transform_0, window_bounds = array<i64: 4, 8, 16>}, {pipeline_mode = #tpu.pipeline_mode<synchronous>, transform_indices = @transform_1, window_bounds = array<i64: 2, 8, 8>}, {pipeline_mode = #tpu.pipeline_mode<synchronous>, transform_indices = @transform_2, window_bounds = array<i64: 2, 8, 8>}, {pipeline_mode = #tpu.pipeline_mode<synchronous>, transform_indices = @transform_3, window_bounds = array<i64: 4, 8, 8>}, {transform_indices = @transform_4, window_bounds = array<i64: 4, 2>}, {pipeline_mode = #tpu.pipeline_mode<synchronous>, transform_indices = @transform_5, window_bounds = array<i64: 3, 8>}, {transform_indices = @transform_6, window_bounds = array<i64: 4, 8, 8>}]} {
    %c0 = arith.constant 0 : index
    %c0_0 = arith.constant 0 : index
    %c0_1 = arith.constant 0 : index
    %0 = vector.load %arg2[%c0, %c0_0, %c0_1] : memref<2x8x8xf32, #tpu.memory_space<vmem>>, vector<2x8x8xf32>
    %c0_2 = arith.constant 0 : index
    %c0_3 = arith.constant 0 : index
    %c0_4 = arith.constant 0 : index
    %1 = vector.load %arg3[%c0_2, %c0_3, %c0_4] : memref<2x8x8xf32, #tpu.memory_space<vmem>>, vector<2x8x8xf32>
    %c0_5 = arith.constant 0 : index
    %c0_6 = arith.constant 0 : index
    %c0_7 = arith.constant 0 : index
    %2 = vector.load %arg4[%c0_5, %c0_6, %c0_7] : memref<4x8x8xf32, #tpu.memory_space<vmem>>, vector<4x8x8xf32>
    %c0_8 = arith.constant 0 : index
    %c0_9 = arith.constant 0 : index
    %3 = vector.load %arg6[%c0_8, %c0_9] : memref<3x8xf32, #tpu.memory_space<vmem>>, vector<3x8xf32>
    %c0_10 = arith.constant 0 : index
    %c0_11 = arith.constant 0 : index
    %c0_12 = arith.constant 0 : index
    %4 = vector.load %arg1[%c0_10, %c0_11, %c0_12] : memref<4x8x16xbf16, #tpu.memory_space<vmem>>, vector<4x8x2xbf16>
    %c0_13 = arith.constant 0 : index
    %c0_14 = arith.constant 0 : index
    %c2 = arith.constant 2 : index
    %5 = vector.load %arg1[%c0_13, %c0_14, %c2] : memref<4x8x16xbf16, #tpu.memory_space<vmem>>, vector<4x8x2xbf16>
    %c0_15 = arith.constant 0 : index
    %c0_16 = arith.constant 0 : index
    %c4 = arith.constant 4 : index
    %6 = vector.load %arg1[%c0_15, %c0_16, %c4] : memref<4x8x16xbf16, #tpu.memory_space<vmem>>, vector<4x8x4xbf16>
    %cst = arith.constant dense<0.000000e+00> : vector<4x8x8xf32>
    %7 = tpu.matmul %4, %5, %cst {dimension_numbers = #tpu.dot_dimension_numbers<[2], [2], [1], [1], [0, 0, 0, 1, 1, 1], [0], [0]>} : vector<4x8x2xbf16>, vector<4x8x2xbf16>, vector<4x8x8xf32> -> vector<4x8x8xf32>
    %8 = vector.extract_strided_slice %4 {offsets = [0, 0, 0], sizes = [4, 8, 1], strides = [1, 1, 1]} : vector<4x8x2xbf16> to vector<4x8x1xbf16>
    %9 = vector.extract_strided_slice %0 {offsets = [0, 0, 0], sizes = [1, 8, 8], strides = [1, 1, 1]} : vector<2x8x8xf32> to vector<1x8x8xf32>
    %10 = vector.shape_cast %9 : vector<1x8x8xf32> to vector<8x8xf32>
    %11 = vector.shape_cast %10 : vector<8x8xf32> to vector<1x8x8xf32>
    %12 = arith.extf %8 : vector<4x8x1xbf16> to vector<4x8x1xf32>
    %13 = vector.broadcast %12 : vector<4x8x1xf32> to vector<4x8x8xf32>
    %14 = vector.broadcast %11 : vector<1x8x8xf32> to vector<4x8x8xf32>
    %15 = arith.mulf %13, %14 : vector<4x8x8xf32>
    %16 = vector.extract_strided_slice %5 {offsets = [0, 0, 0], sizes = [4, 8, 1], strides = [1, 1, 1]} : vector<4x8x2xbf16> to vector<4x8x1xbf16>
    %17 = vector.shape_cast %16 : vector<4x8x1xbf16> to vector<4x8xbf16>
    %18 = vector.shape_cast %17 : vector<4x8xbf16> to vector<4x1x8xbf16>
    %19 = vector.extract_strided_slice %1 {offsets = [0, 0, 0], sizes = [1, 8, 8], strides = [1, 1, 1]} : vector<2x8x8xf32> to vector<1x8x8xf32>
    %20 = vector.shape_cast %19 : vector<1x8x8xf32> to vector<8x8xf32>
    %21 = vector.shape_cast %20 : vector<8x8xf32> to vector<1x8x8xf32>
    %22 = arith.extf %18 : vector<4x1x8xbf16> to vector<4x1x8xf32>
    %23 = vector.broadcast %22 : vector<4x1x8xf32> to vector<4x8x8xf32>
    %24 = vector.broadcast %21 : vector<1x8x8xf32> to vector<4x8x8xf32>
    %25 = arith.mulf %23, %24 : vector<4x8x8xf32>
    %26 = vector.extract_strided_slice %4 {offsets = [0, 0, 1], sizes = [4, 8, 1], strides = [1, 1, 1]} : vector<4x8x2xbf16> to vector<4x8x1xbf16>
    %27 = vector.extract_strided_slice %0 {offsets = [1, 0, 0], sizes = [1, 8, 8], strides = [1, 1, 1]} : vector<2x8x8xf32> to vector<1x8x8xf32>
    %28 = vector.shape_cast %27 : vector<1x8x8xf32> to vector<8x8xf32>
    %29 = vector.shape_cast %28 : vector<8x8xf32> to vector<1x8x8xf32>
    %30 = arith.extf %26 : vector<4x8x1xbf16> to vector<4x8x1xf32>
    %31 = vector.broadcast %30 : vector<4x8x1xf32> to vector<4x8x8xf32>
    %32 = vector.broadcast %29 : vector<1x8x8xf32> to vector<4x8x8xf32>
    %33 = arith.mulf %31, %32 : vector<4x8x8xf32>
    %34 = arith.addf %15, %33 : vector<4x8x8xf32>
    %35 = vector.extract_strided_slice %5 {offsets = [0, 0, 1], sizes = [4, 8, 1], strides = [1, 1, 1]} : vector<4x8x2xbf16> to vector<4x8x1xbf16>
    %36 = vector.shape_cast %35 : vector<4x8x1xbf16> to vector<4x8xbf16>
    %37 = vector.shape_cast %36 : vector<4x8xbf16> to vector<4x1x8xbf16>
    %38 = vector.extract_strided_slice %1 {offsets = [1, 0, 0], sizes = [1, 8, 8], strides = [1, 1, 1]} : vector<2x8x8xf32> to vector<1x8x8xf32>
    %39 = vector.shape_cast %38 : vector<1x8x8xf32> to vector<8x8xf32>
    %40 = vector.shape_cast %39 : vector<8x8xf32> to vector<1x8x8xf32>
    %41 = arith.extf %37 : vector<4x1x8xbf16> to vector<4x1x8xf32>
    %42 = vector.broadcast %41 : vector<4x1x8xf32> to vector<4x8x8xf32>
    %43 = vector.broadcast %40 : vector<1x8x8xf32> to vector<4x8x8xf32>
    %44 = arith.mulf %42, %43 : vector<4x8x8xf32>
    %45 = arith.addf %25, %44 : vector<4x8x8xf32>
    %c0_17 = arith.constant 0 : index
    %c0_18 = arith.constant 0 : index
    %46 = memref.load %arg5[%c0_17, %c0_18] : memref<4x2xf32, #tpu.memory_space<smem>>
    %47 = vector.broadcast %46 : f32 to vector<4x8x8xf32>
    %48 = arith.mulf %7, %47 : vector<4x8x8xf32>
    %c1 = arith.constant 1 : index
    %c0_19 = arith.constant 0 : index
    %49 = memref.load %arg5[%c1, %c0_19] : memref<4x2xf32, #tpu.memory_space<smem>>
    %50 = vector.broadcast %49 : f32 to vector<4x8x8xf32>
    %51 = arith.mulf %34, %50 : vector<4x8x8xf32>
    %52 = arith.addf %48, %51 : vector<4x8x8xf32>
    %c2_20 = arith.constant 2 : index
    %c0_21 = arith.constant 0 : index
    %53 = memref.load %arg5[%c2_20, %c0_21] : memref<4x2xf32, #tpu.memory_space<smem>>
    %54 = vector.broadcast %53 : f32 to vector<4x8x8xf32>
    %55 = arith.mulf %45, %54 : vector<4x8x8xf32>
    %56 = arith.addf %52, %55 : vector<4x8x8xf32>
    %c3 = arith.constant 3 : index
    %c0_22 = arith.constant 0 : index
    %57 = memref.load %arg5[%c3, %c0_22] : memref<4x2xf32, #tpu.memory_space<smem>>
    %58 = vector.broadcast %57 : f32 to vector<4x8x8xf32>
    %59 = arith.addf %56, %58 : vector<4x8x8xf32>
    %cst_23 = arith.constant dense<0xFF800000> : vector<4x8xf32>
    %60 = vector.multi_reduction <maximumf>, %59, %cst_23 [2] : vector<4x8x8xf32> to vector<4x8xf32>
    %61 = vector.shape_cast %60 : vector<4x8xf32> to vector<4x8x1xf32>
    %62 = vector.broadcast %61 : vector<4x8x1xf32> to vector<4x8x8xf32>
    %63 = arith.subf %59, %62 : vector<4x8x8xf32>
    %64 = math.exp %63 : vector<4x8x8xf32>
    %cst_24 = arith.constant dense<0.000000e+00> : vector<4x8xf32>
    %65 = vector.multi_reduction <add>, %64, %cst_24 [2] : vector<4x8x8xf32> to vector<4x8xf32>
    %66 = vector.shape_cast %65 : vector<4x8xf32> to vector<4x8x1xf32>
    %67 = tpu.reciprocal %66 {approx = true} : vector<4x8x1xf32> -> vector<4x8x1xf32>
    %68 = arith.truncf %64 : vector<4x8x8xf32> to vector<4x8x8xbf16>
    %cst_25 = arith.constant dense<0.000000e+00> : vector<4x8x4xf32>
    %69 = tpu.matmul %68, %6, %cst_25 {dimension_numbers = #tpu.dot_dimension_numbers<[2], [1], [1], [2], [0, 0, 0, 1, 1, 2], [0], [0]>} : vector<4x8x8xbf16>, vector<4x8x4xbf16>, vector<4x8x4xf32> -> vector<4x8x4xf32>
    %70 = vector.extract_strided_slice %2 {offsets = [0, 0, 0], sizes = [1, 8, 8], strides = [1, 1, 1]} : vector<4x8x8xf32> to vector<1x8x8xf32>
    %71 = vector.shape_cast %70 : vector<1x8x8xf32> to vector<8x8xf32>
    %72 = vector.shape_cast %71 : vector<8x8xf32> to vector<1x8x8xf32>
    %73 = vector.broadcast %72 : vector<1x8x8xf32> to vector<4x8x8xf32>
    %74 = arith.mulf %64, %73 : vector<4x8x8xf32>
    %cst_26 = arith.constant dense<0.000000e+00> : vector<4x8xf32>
    %75 = vector.multi_reduction <add>, %74, %cst_26 [2] : vector<4x8x8xf32> to vector<4x8xf32>
    %76 = vector.shape_cast %75 : vector<4x8xf32> to vector<4x8x1xf32>
    %77 = vector.extract_strided_slice %2 {offsets = [1, 0, 0], sizes = [1, 8, 8], strides = [1, 1, 1]} : vector<4x8x8xf32> to vector<1x8x8xf32>
    %78 = vector.shape_cast %77 : vector<1x8x8xf32> to vector<8x8xf32>
    %79 = vector.shape_cast %78 : vector<8x8xf32> to vector<1x8x8xf32>
    %80 = vector.broadcast %79 : vector<1x8x8xf32> to vector<4x8x8xf32>
    %81 = arith.mulf %64, %80 : vector<4x8x8xf32>
    %cst_27 = arith.constant dense<0.000000e+00> : vector<4x8xf32>
    %82 = vector.multi_reduction <add>, %81, %cst_27 [2] : vector<4x8x8xf32> to vector<4x8xf32>
    %83 = vector.shape_cast %82 : vector<4x8xf32> to vector<4x8x1xf32>
    %84 = vector.extract_strided_slice %2 {offsets = [2, 0, 0], sizes = [1, 8, 8], strides = [1, 1, 1]} : vector<4x8x8xf32> to vector<1x8x8xf32>
    %85 = vector.shape_cast %84 : vector<1x8x8xf32> to vector<8x8xf32>
    %86 = vector.shape_cast %85 : vector<8x8xf32> to vector<1x8x8xf32>
    %87 = vector.broadcast %86 : vector<1x8x8xf32> to vector<4x8x8xf32>
    %88 = arith.mulf %64, %87 : vector<4x8x8xf32>
    %cst_28 = arith.constant dense<0.000000e+00> : vector<4x8xf32>
    %89 = vector.multi_reduction <add>, %88, %cst_28 [2] : vector<4x8x8xf32> to vector<4x8xf32>
    %90 = vector.shape_cast %89 : vector<4x8xf32> to vector<4x8x1xf32>
    %91 = vector.extract_strided_slice %2 {offsets = [3, 0, 0], sizes = [1, 8, 8], strides = [1, 1, 1]} : vector<4x8x8xf32> to vector<1x8x8xf32>
    %92 = vector.shape_cast %91 : vector<1x8x8xf32> to vector<8x8xf32>
    %93 = vector.shape_cast %92 : vector<8x8xf32> to vector<1x8x8xf32>
    %94 = vector.broadcast %93 : vector<1x8x8xf32> to vector<4x8x8xf32>
    %95 = arith.mulf %64, %94 : vector<4x8x8xf32>
    %cst_29 = arith.constant dense<0.000000e+00> : vector<4x8xf32>
    %96 = vector.multi_reduction <add>, %95, %cst_29 [2] : vector<4x8x8xf32> to vector<4x8xf32>
    %97 = vector.shape_cast %96 : vector<4x8xf32> to vector<4x8x1xf32>
    %98 = tpu.concatenate %76, %83, %90, %97 in 2 : vector<4x8x1xf32>, vector<4x8x1xf32>, vector<4x8x1xf32>, vector<4x8x1xf32> -> vector<4x8x4xf32>
    %99 = vector.extract_strided_slice %3 {offsets = [0, 0], sizes = [1, 4], strides = [1, 1]} : vector<3x8xf32> to vector<1x4xf32>
    %100 = vector.shape_cast %99 : vector<1x4xf32> to vector<4xf32>
    %101 = vector.shape_cast %100 : vector<4xf32> to vector<1x1x4xf32>
    %102 = vector.broadcast %101 : vector<1x1x4xf32> to vector<4x8x4xf32>
    %103 = arith.mulf %69, %102 : vector<4x8x4xf32>
    %104 = vector.extract_strided_slice %3 {offsets = [1, 0], sizes = [1, 4], strides = [1, 1]} : vector<3x8xf32> to vector<1x4xf32>
    %105 = vector.shape_cast %104 : vector<1x4xf32> to vector<4xf32>
    %106 = vector.shape_cast %105 : vector<4xf32> to vector<1x1x4xf32>
    %107 = vector.broadcast %106 : vector<1x1x4xf32> to vector<4x8x4xf32>
    %108 = arith.mulf %98, %107 : vector<4x8x4xf32>
    %109 = arith.addf %103, %108 : vector<4x8x4xf32>
    %110 = vector.broadcast %67 : vector<4x8x1xf32> to vector<4x8x4xf32>
    %111 = arith.mulf %109, %110 : vector<4x8x4xf32>
    %112 = vector.extract_strided_slice %3 {offsets = [2, 0], sizes = [1, 4], strides = [1, 1]} : vector<3x8xf32> to vector<1x4xf32>
    %113 = vector.shape_cast %112 : vector<1x4xf32> to vector<4xf32>
    %114 = vector.shape_cast %113 : vector<4xf32> to vector<1x1x4xf32>
    %115 = vector.broadcast %114 : vector<1x1x4xf32> to vector<4x8x4xf32>
    %116 = arith.addf %111, %115 : vector<4x8x4xf32>
    %117 = arith.truncf %116 : vector<4x8x4xf32> to vector<4x8x4xbf16>
    %c0_30 = arith.constant 0 : index
    %c0_31 = arith.constant 0 : index
    %c0_32 = arith.constant 0 : index
    %118 = vector.load %arg7[%c0_30, %c0_31, %c0_32] : memref<4x8x8xbf16, #tpu.memory_space<vmem>>, vector<4x8x4xbf16>
    tpu.vector_store %arg7[%c0_30, %c0_31, %c0_32], %117 {strides = array<i32>} : memref<4x8x8xbf16, #tpu.memory_space<vmem>>, vector<4x8x4xbf16>,
    %c0_33 = arith.constant 0 : index
    %c0_34 = arith.constant 0 : index
    %c8 = arith.constant 8 : index
    %119 = vector.load %arg1[%c0_33, %c0_34, %c8] : memref<4x8x16xbf16, #tpu.memory_space<vmem>>, vector<4x8x2xbf16>
    %c0_35 = arith.constant 0 : index
    %c0_36 = arith.constant 0 : index
    %c10 = arith.constant 10 : index
    %120 = vector.load %arg1[%c0_35, %c0_36, %c10] : memref<4x8x16xbf16, #tpu.memory_space<vmem>>, vector<4x8x2xbf16>
    %c0_37 = arith.constant 0 : index
    %c0_38 = arith.constant 0 : index
    %c12 = arith.constant 12 : index
    %121 = vector.load %arg1[%c0_37, %c0_38, %c12] : memref<4x8x16xbf16, #tpu.memory_space<vmem>>, vector<4x8x4xbf16>
    %cst_39 = arith.constant dense<0.000000e+00> : vector<4x8x8xf32>
    %122 = tpu.matmul %119, %120, %cst_39 {dimension_numbers = #tpu.dot_dimension_numbers<[2], [2], [1], [1], [0, 0, 0, 1, 1, 1], [0], [0]>} : vector<4x8x2xbf16>, vector<4x8x2xbf16>, vector<4x8x8xf32> -> vector<4x8x8xf32>
    %123 = vector.extract_strided_slice %119 {offsets = [0, 0, 0], sizes = [4, 8, 1], strides = [1, 1, 1]} : vector<4x8x2xbf16> to vector<4x8x1xbf16>
    %124 = vector.extract_strided_slice %0 {offsets = [0, 0, 0], sizes = [1, 8, 8], strides = [1, 1, 1]} : vector<2x8x8xf32> to vector<1x8x8xf32>
    %125 = vector.shape_cast %124 : vector<1x8x8xf32> to vector<8x8xf32>
    %126 = vector.shape_cast %125 : vector<8x8xf32> to vector<1x8x8xf32>
    %127 = arith.extf %123 : vector<4x8x1xbf16> to vector<4x8x1xf32>
    %128 = vector.broadcast %127 : vector<4x8x1xf32> to vector<4x8x8xf32>
    %129 = vector.broadcast %126 : vector<1x8x8xf32> to vector<4x8x8xf32>
    %130 = arith.mulf %128, %129 : vector<4x8x8xf32>
    %131 = vector.extract_strided_slice %120 {offsets = [0, 0, 0], sizes = [4, 8, 1], strides = [1, 1, 1]} : vector<4x8x2xbf16> to vector<4x8x1xbf16>
    %132 = vector.shape_cast %131 : vector<4x8x1xbf16> to vector<4x8xbf16>
    %133 = vector.shape_cast %132 : vector<4x8xbf16> to vector<4x1x8xbf16>
    %134 = vector.extract_strided_slice %1 {offsets = [0, 0, 0], sizes = [1, 8, 8], strides = [1, 1, 1]} : vector<2x8x8xf32> to vector<1x8x8xf32>
    %135 = vector.shape_cast %134 : vector<1x8x8xf32> to vector<8x8xf32>
    %136 = vector.shape_cast %135 : vector<8x8xf32> to vector<1x8x8xf32>
    %137 = arith.extf %133 : vector<4x1x8xbf16> to vector<4x1x8xf32>
    %138 = vector.broadcast %137 : vector<4x1x8xf32> to vector<4x8x8xf32>
    %139 = vector.broadcast %136 : vector<1x8x8xf32> to vector<4x8x8xf32>
    %140 = arith.mulf %138, %139 : vector<4x8x8xf32>
    %141 = vector.extract_strided_slice %119 {offsets = [0, 0, 1], sizes = [4, 8, 1], strides = [1, 1, 1]} : vector<4x8x2xbf16> to vector<4x8x1xbf16>
    %142 = vector.extract_strided_slice %0 {offsets = [1, 0, 0], sizes = [1, 8, 8], strides = [1, 1, 1]} : vector<2x8x8xf32> to vector<1x8x8xf32>
    %143 = vector.shape_cast %142 : vector<1x8x8xf32> to vector<8x8xf32>
    %144 = vector.shape_cast %143 : vector<8x8xf32> to vector<1x8x8xf32>
    %145 = arith.extf %141 : vector<4x8x1xbf16> to vector<4x8x1xf32>
    %146 = vector.broadcast %145 : vector<4x8x1xf32> to vector<4x8x8xf32>
    %147 = vector.broadcast %144 : vector<1x8x8xf32> to vector<4x8x8xf32>
    %148 = arith.mulf %146, %147 : vector<4x8x8xf32>
    %149 = arith.addf %130, %148 : vector<4x8x8xf32>
    %150 = vector.extract_strided_slice %120 {offsets = [0, 0, 1], sizes = [4, 8, 1], strides = [1, 1, 1]} : vector<4x8x2xbf16> to vector<4x8x1xbf16>
    %151 = vector.shape_cast %150 : vector<4x8x1xbf16> to vector<4x8xbf16>
    %152 = vector.shape_cast %151 : vector<4x8xbf16> to vector<4x1x8xbf16>
    %153 = vector.extract_strided_slice %1 {offsets = [1, 0, 0], sizes = [1, 8, 8], strides = [1, 1, 1]} : vector<2x8x8xf32> to vector<1x8x8xf32>
    %154 = vector.shape_cast %153 : vector<1x8x8xf32> to vector<8x8xf32>
    %155 = vector.shape_cast %154 : vector<8x8xf32> to vector<1x8x8xf32>
    %156 = arith.extf %152 : vector<4x1x8xbf16> to vector<4x1x8xf32>
    %157 = vector.broadcast %156 : vector<4x1x8xf32> to vector<4x8x8xf32>
    %158 = vector.broadcast %155 : vector<1x8x8xf32> to vector<4x8x8xf32>
    %159 = arith.mulf %157, %158 : vector<4x8x8xf32>
    %160 = arith.addf %140, %159 : vector<4x8x8xf32>
    %c0_40 = arith.constant 0 : index
    %c1_41 = arith.constant 1 : index
    %161 = memref.load %arg5[%c0_40, %c1_41] : memref<4x2xf32, #tpu.memory_space<smem>>
    %162 = vector.broadcast %161 : f32 to vector<4x8x8xf32>
    %163 = arith.mulf %122, %162 : vector<4x8x8xf32>
    %c1_42 = arith.constant 1 : index
    %c1_43 = arith.constant 1 : index
    %164 = memref.load %arg5[%c1_42, %c1_43] : memref<4x2xf32, #tpu.memory_space<smem>>
    %165 = vector.broadcast %164 : f32 to vector<4x8x8xf32>
    %166 = arith.mulf %149, %165 : vector<4x8x8xf32>
    %167 = arith.addf %163, %166 : vector<4x8x8xf32>
    %c2_44 = arith.constant 2 : index
    %c1_45 = arith.constant 1 : index
    %168 = memref.load %arg5[%c2_44, %c1_45] : memref<4x2xf32, #tpu.memory_space<smem>>
    %169 = vector.broadcast %168 : f32 to vector<4x8x8xf32>
    %170 = arith.mulf %160, %169 : vector<4x8x8xf32>
    %171 = arith.addf %167, %170 : vector<4x8x8xf32>
    %c3_46 = arith.constant 3 : index
    %c1_47 = arith.constant 1 : index
    %172 = memref.load %arg5[%c3_46, %c1_47] : memref<4x2xf32, #tpu.memory_space<smem>>
    %173 = vector.broadcast %172 : f32 to vector<4x8x8xf32>
    %174 = arith.addf %171, %173 : vector<4x8x8xf32>
    %cst_48 = arith.constant dense<0xFF800000> : vector<4x8xf32>
    %175 = vector.multi_reduction <maximumf>, %174, %cst_48 [2] : vector<4x8x8xf32> to vector<4x8xf32>
    %176 = vector.shape_cast %175 : vector<4x8xf32> to vector<4x8x1xf32>
    %177 = vector.broadcast %176 : vector<4x8x1xf32> to vector<4x8x8xf32>
    %178 = arith.subf %174, %177 : vector<4x8x8xf32>
    %179 = math.exp %178 : vector<4x8x8xf32>
    %cst_49 = arith.constant dense<0.000000e+00> : vector<4x8xf32>
    %180 = vector.multi_reduction <add>, %179, %cst_49 [2] : vector<4x8x8xf32> to vector<4x8xf32>
    %181 = vector.shape_cast %180 : vector<4x8xf32> to vector<4x8x1xf32>
    %182 = tpu.reciprocal %181 {approx = true} : vector<4x8x1xf32> -> vector<4x8x1xf32>
    %183 = arith.truncf %179 : vector<4x8x8xf32> to vector<4x8x8xbf16>
    %cst_50 = arith.constant dense<0.000000e+00> : vector<4x8x4xf32>
    %184 = tpu.matmul %183, %121, %cst_50 {dimension_numbers = #tpu.dot_dimension_numbers<[2], [1], [1], [2], [0, 0, 0, 1, 1, 2], [0], [0]>} : vector<4x8x8xbf16>, vector<4x8x4xbf16>, vector<4x8x4xf32> -> vector<4x8x4xf32>
    %185 = vector.extract_strided_slice %2 {offsets = [0, 0, 0], sizes = [1, 8, 8], strides = [1, 1, 1]} : vector<4x8x8xf32> to vector<1x8x8xf32>
    %186 = vector.shape_cast %185 : vector<1x8x8xf32> to vector<8x8xf32>
    %187 = vector.shape_cast %186 : vector<8x8xf32> to vector<1x8x8xf32>
    %188 = vector.broadcast %187 : vector<1x8x8xf32> to vector<4x8x8xf32>
    %189 = arith.mulf %179, %188 : vector<4x8x8xf32>
    %cst_51 = arith.constant dense<0.000000e+00> : vector<4x8xf32>
    %190 = vector.multi_reduction <add>, %189, %cst_51 [2] : vector<4x8x8xf32> to vector<4x8xf32>
    %191 = vector.shape_cast %190 : vector<4x8xf32> to vector<4x8x1xf32>
    %192 = vector.extract_strided_slice %2 {offsets = [1, 0, 0], sizes = [1, 8, 8], strides = [1, 1, 1]} : vector<4x8x8xf32> to vector<1x8x8xf32>
    %193 = vector.shape_cast %192 : vector<1x8x8xf32> to vector<8x8xf32>
    %194 = vector.shape_cast %193 : vector<8x8xf32> to vector<1x8x8xf32>
    %195 = vector.broadcast %194 : vector<1x8x8xf32> to vector<4x8x8xf32>
    %196 = arith.mulf %179, %195 : vector<4x8x8xf32>
    %cst_52 = arith.constant dense<0.000000e+00> : vector<4x8xf32>
    %197 = vector.multi_reduction <add>, %196, %cst_52 [2] : vector<4x8x8xf32> to vector<4x8xf32>
    %198 = vector.shape_cast %197 : vector<4x8xf32> to vector<4x8x1xf32>
    %199 = vector.extract_strided_slice %2 {offsets = [2, 0, 0], sizes = [1, 8, 8], strides = [1, 1, 1]} : vector<4x8x8xf32> to vector<1x8x8xf32>
    %200 = vector.shape_cast %199 : vector<1x8x8xf32> to vector<8x8xf32>
    %201 = vector.shape_cast %200 : vector<8x8xf32> to vector<1x8x8xf32>
    %202 = vector.broadcast %201 : vector<1x8x8xf32> to vector<4x8x8xf32>
    %203 = arith.mulf %179, %202 : vector<4x8x8xf32>
    %cst_53 = arith.constant dense<0.000000e+00> : vector<4x8xf32>
    %204 = vector.multi_reduction <add>, %203, %cst_53 [2] : vector<4x8x8xf32> to vector<4x8xf32>
    %205 = vector.shape_cast %204 : vector<4x8xf32> to vector<4x8x1xf32>
    %206 = vector.extract_strided_slice %2 {offsets = [3, 0, 0], sizes = [1, 8, 8], strides = [1, 1, 1]} : vector<4x8x8xf32> to vector<1x8x8xf32>
    %207 = vector.shape_cast %206 : vector<1x8x8xf32> to vector<8x8xf32>
    %208 = vector.shape_cast %207 : vector<8x8xf32> to vector<1x8x8xf32>
    %209 = vector.broadcast %208 : vector<1x8x8xf32> to vector<4x8x8xf32>
    %210 = arith.mulf %179, %209 : vector<4x8x8xf32>
    %cst_54 = arith.constant dense<0.000000e+00> : vector<4x8xf32>
    %211 = vector.multi_reduction <add>, %210, %cst_54 [2] : vector<4x8x8xf32> to vector<4x8xf32>
    %212 = vector.shape_cast %211 : vector<4x8xf32> to vector<4x8x1xf32>
    %213 = tpu.concatenate %191, %198, %205, %212 in 2 : vector<4x8x1xf32>, vector<4x8x1xf32>, vector<4x8x1xf32>, vector<4x8x1xf32> -> vector<4x8x4xf32>
    %214 = vector.extract_strided_slice %3 {offsets = [0, 4], sizes = [1, 4], strides = [1, 1]} : vector<3x8xf32> to vector<1x4xf32>
    %215 = vector.shape_cast %214 : vector<1x4xf32> to vector<4xf32>
    %216 = vector.shape_cast %215 : vector<4xf32> to vector<1x1x4xf32>
    %217 = vector.broadcast %216 : vector<1x1x4xf32> to vector<4x8x4xf32>
    %218 = arith.mulf %184, %217 : vector<4x8x4xf32>
    %219 = vector.extract_strided_slice %3 {offsets = [1, 4], sizes = [1, 4], strides = [1, 1]} : vector<3x8xf32> to vector<1x4xf32>
    %220 = vector.shape_cast %219 : vector<1x4xf32> to vector<4xf32>
    %221 = vector.shape_cast %220 : vector<4xf32> to vector<1x1x4xf32>
    %222 = vector.broadcast %221 : vector<1x1x4xf32> to vector<4x8x4xf32>
    %223 = arith.mulf %213, %222 : vector<4x8x4xf32>
    %224 = arith.addf %218, %223 : vector<4x8x4xf32>
    %225 = vector.broadcast %182 : vector<4x8x1xf32> to vector<4x8x4xf32>
    %226 = arith.mulf %224, %225 : vector<4x8x4xf32>
    %227 = vector.extract_strided_slice %3 {offsets = [2, 4], sizes = [1, 4], strides = [1, 1]} : vector<3x8xf32> to vector<1x4xf32>
    %228 = vector.shape_cast %227 : vector<1x4xf32> to vector<4xf32>
    %229 = vector.shape_cast %228 : vector<4xf32> to vector<1x1x4xf32>
    %230 = vector.broadcast %229 : vector<1x1x4xf32> to vector<4x8x4xf32>
    %231 = arith.addf %226, %230 : vector<4x8x4xf32>
    %232 = arith.truncf %231 : vector<4x8x4xf32> to vector<4x8x4xbf16>
    %c0_55 = arith.constant 0 : index
    %c0_56 = arith.constant 0 : index
    %c4_57 = arith.constant 4 : index
    %233 = vector.load %arg7[%c0_55, %c0_56, %c4_57] : memref<4x8x8xbf16, #tpu.memory_space<vmem>>, vector<4x8x4xbf16>
    tpu.vector_store %arg7[%c0_55, %c0_56, %c4_57], %232 {strides = array<i32>} : memref<4x8x8xbf16, #tpu.memory_space<vmem>>, vector<4x8x4xbf16>,
    return
  }
  func.func @transform_0(%arg0: i32) -> (i32, i32, i32) {
    %c0_i32 = arith.constant 0 : i32
    %c0_i32_0 = arith.constant 0 : i32
    %c0_i32_1 = arith.constant 0 : i32
    return %arg0, %c0_i32, %c0_i32_0 : i32, i32, i32
  }
  func.func @transform_1(%arg0: i32) -> (i32, i32, i32) {
    %c0_i32 = arith.constant 0 : i32
    %c0_i32_0 = arith.constant 0 : i32
    %c0_i32_1 = arith.constant 0 : i32
    %c0_i32_2 = arith.constant 0 : i32
    return %c0_i32, %c0_i32_0, %c0_i32_1 : i32, i32, i32
  }
  func.func @transform_2(%arg0: i32) -> (i32, i32, i32) {
    %c0_i32 = arith.constant 0 : i32
    %c0_i32_0 = arith.constant 0 : i32
    %c0_i32_1 = arith.constant 0 : i32
    %c0_i32_2 = arith.constant 0 : i32
    return %c0_i32, %c0_i32_0, %c0_i32_1 : i32, i32, i32
  }
  func.func @transform_3(%arg0: i32) -> (i32, i32, i32) {
    %c0_i32 = arith.constant 0 : i32
    %c0_i32_0 = arith.constant 0 : i32
    %c0_i32_1 = arith.constant 0 : i32
    %c0_i32_2 = arith.constant 0 : i32
    return %c0_i32, %c0_i32_0, %c0_i32_1 : i32, i32, i32
  }
  func.func @transform_4(%arg0: i32) -> (i32, i32) {
    %c0_i32 = arith.constant 0 : i32
    %c0_i32_0 = arith.constant 0 : i32
    %c0_i32_1 = arith.constant 0 : i32
    return %c0_i32, %c0_i32_0 : i32, i32
  }
  func.func @transform_5(%arg0: i32) -> (i32, i32) {
    %c0_i32 = arith.constant 0 : i32
    %c0_i32_0 = arith.constant 0 : i32
    %c0_i32_1 = arith.constant 0 : i32
    return %c0_i32, %c0_i32_0 : i32, i32
  }
  func.func @transform_6(%arg0: i32) -> (i32, i32, i32) {
    %c0_i32 = arith.constant 0 : i32
    %c0_i32_0 = arith.constant 0 : i32
    %c0_i32_1 = arith.constant 0 : i32
    return %arg0, %c0_i32, %c0_i32_0 : i32, i32, i32
  }
}

module attributes {stable_mosaic.version = 11 : i64} {
  func.func @_pointwise_res_kernel(%arg0: i32, %arg1: i32, %arg2: memref<128x8xbf16, #tpu.memory_space<vmem>>, %arg3: memref<8x16xbf16, #tpu.memory_space<vmem>>, %arg4: memref<1x16xf32, #tpu.memory_space<vmem>>, %arg5: memref<1x16xf32, #tpu.memory_space<vmem>>, %arg6: memref<128x16xf32, #tpu.memory_space<vmem>>, %arg7: memref<128x16xf32, #tpu.memory_space<vmem>>) attributes {dimension_semantics = [#tpu.dimension_semantics<parallel>, #tpu.dimension_semantics<parallel>], iteration_bounds = array<i64: 1, 1>, scalar_prefetch = 0 : i64, scratch_operands = 0 : i64, tpu.core_type = #tpu.core_type<tc>, window_params = [{transform_indices = @transform_0, window_bounds = array<i64: 128, 8>}, {transform_indices = @transform_1, window_bounds = array<i64: 8, 16>}, {transform_indices = @transform_2, window_bounds = array<i64: 1, 16>}, {transform_indices = @transform_3, window_bounds = array<i64: 1, 16>}, {transform_indices = @transform_4, window_bounds = array<i64: 128, 16>}, {transform_indices = @transform_5, window_bounds = array<i64: 128, 16>}]} {
    %c0 = arith.constant 0 : index
    %c0_0 = arith.constant 0 : index
    %0 = vector.load %arg2[%c0, %c0_0] : memref<128x8xbf16, #tpu.memory_space<vmem>>, vector<128x8xbf16>
    %cst = arith.constant 0.000000e+00 : bf16
    %1 = vector.broadcast %cst : bf16 to vector<128x8xbf16>
    %2 = arith.maximumf %0, %1 : vector<128x8xbf16>
    %c0_1 = arith.constant 0 : index
    %c0_2 = arith.constant 0 : index
    %3 = vector.load %arg3[%c0_1, %c0_2] : memref<8x16xbf16, #tpu.memory_space<vmem>>, vector<8x16xbf16>
    %cst_3 = arith.constant dense<0.000000e+00> : vector<128x16xf32>
    %4 = tpu.matmul %2, %3, %cst_3 {dimension_numbers = #tpu.dot_dimension_numbers<[1], [0], [0], [1], [0, 0, 1, 1], [], []>} : vector<128x8xbf16>, vector<8x16xbf16>, vector<128x16xf32> -> vector<128x16xf32>
    %c0_4 = arith.constant 0 : index
    %c0_5 = arith.constant 0 : index
    %5 = vector.load %arg4[%c0_4, %c0_5] : memref<1x16xf32, #tpu.memory_space<vmem>>, vector<1x16xf32>
    %6 = vector.broadcast %5 : vector<1x16xf32> to vector<128x16xf32>
    %7 = arith.mulf %4, %6 : vector<128x16xf32>
    %c0_6 = arith.constant 0 : index
    %c0_7 = arith.constant 0 : index
    %8 = vector.load %arg5[%c0_6, %c0_7] : memref<1x16xf32, #tpu.memory_space<vmem>>, vector<1x16xf32>
    %9 = vector.broadcast %8 : vector<1x16xf32> to vector<128x16xf32>
    %10 = arith.addf %7, %9 : vector<128x16xf32>
    %c0_8 = arith.constant 0 : index
    %c0_9 = arith.constant 0 : index
    %11 = vector.load %arg6[%c0_8, %c0_9] : memref<128x16xf32, #tpu.memory_space<vmem>>, vector<128x16xf32>
    %12 = arith.addf %10, %11 : vector<128x16xf32>
    %cst_10 = arith.constant 0.000000e+00 : f32
    %13 = vector.broadcast %cst_10 : f32 to vector<128x16xf32>
    %14 = arith.maximumf %12, %13 : vector<128x16xf32>
    %c0_11 = arith.constant 0 : index
    %c0_12 = arith.constant 0 : index
    %15 = vector.load %arg7[%c0_11, %c0_12] : memref<128x16xf32, #tpu.memory_space<vmem>>, vector<128x16xf32>
    tpu.vector_store %arg7[%c0_11, %c0_12], %14 {strides = array<i32>} : memref<128x16xf32, #tpu.memory_space<vmem>>, vector<128x16xf32>,
    return
  }
  func.func @transform_0(%arg0: i32, %arg1: i32) -> (i32, i32) {
    %c0_i32 = arith.constant 0 : i32
    %c0_i32_0 = arith.constant 0 : i32
    return %arg0, %c0_i32 : i32, i32
  }
  func.func @transform_1(%arg0: i32, %arg1: i32) -> (i32, i32) {
    %c0_i32 = arith.constant 0 : i32
    %c0_i32_0 = arith.constant 0 : i32
    return %c0_i32, %arg1 : i32, i32
  }
  func.func @transform_2(%arg0: i32, %arg1: i32) -> (i32, i32) {
    %c0_i32 = arith.constant 0 : i32
    %c0_i32_0 = arith.constant 0 : i32
    return %c0_i32, %arg1 : i32, i32
  }
  func.func @transform_3(%arg0: i32, %arg1: i32) -> (i32, i32) {
    %c0_i32 = arith.constant 0 : i32
    %c0_i32_0 = arith.constant 0 : i32
    return %c0_i32, %arg1 : i32, i32
  }
  func.func @transform_4(%arg0: i32, %arg1: i32) -> (i32, i32) {
    %c0_i32 = arith.constant 0 : i32
    return %arg0, %arg1 : i32, i32
  }
  func.func @transform_5(%arg0: i32, %arg1: i32) -> (i32, i32) {
    %c0_i32 = arith.constant 0 : i32
    return %arg0, %arg1 : i32, i32
  }
}

</mosaic_0001>

<bundles_post_ra>
// kernel: _lambda_.6
= control target key start
LH: loop header
LB: loop body
LE: loop exit
PB: predicated region body
PF: predicated region fallthrough
CT: control target
= control target key end

     0   :  { %9 = vsyncpa [#allocation3], 0  ;;  %s434_s15 = smov [#allocation2]   ;;  %s591_s0 = inlined_call_operand.hbm [shape: f32[128,16], index: 0, kind: input, shape index: {}]   ;;  %s592_s1 = inlined_call_operand.vmem [shape: bf16[16,8], index: 1, kind: input, shape index: {}]   ;;  %s593_s2 = inlined_call_operand.vmem [shape: f32[1,8], index: 2, kind: input, shape index: {}]   ;;  %s594_s3 = inlined_call_operand.vmem [shape: f32[1,8], index: 3, kind: input, shape index: {}]   ;;  %s595_s4 = inlined_call_operand.vmem [shape: bf16[128,8], index: 4, kind: output, shape index: {}]  }
   0x1   :  { %s15_s16 = sshll.u32 %s434_s15, 4  ;;  %s410_s19 = scalar_lea.hbm %s591_s0, 2048  ;;  %s16_s16 = int_to_ptr.vmem [resolvable:$true] %s15_s16 }
   0x2   :  { %p411_p0 = scmp.ne.s32.totalorder %s591_s0, %s410_s19  ;;  %p414_p1 = scmp.lt.u32.totalorder %s410_s19, %s591_s0 }
   0x4   :  { %p416_p2 = pnand %p414_p1, %p411_p0 }
   0x6   :  { %419 = shalt.err (!%p416_p2)
}
   0x7   :  { %s420_s24 = scalar_lea.vmem %s16_s16, 2048  ;;  %p425_p4 = scmp.lt.s32.totalorder %s16_s16, %s16_s16 }
   0x8   :  { %p421_p3 = scmp.ne.s32.totalorder %s16_s16, %s420_s24  ;;  %p426_p5 = scmp.lt.s32.totalorder %s420_s24, %s420_s24 }
   0xa   :  { %p427_p6 = por %p426_p5, %p425_p4 }
   0xc   :  { %p428_p7 = pnand %p427_p6, %p421_p3 }
   0xe   :  { %431 = shalt.err (!%p428_p7)
}
   0xf   :  { %s435_s25 = smov 128   ;;  %s436_s26 = smov 8  }
  0x10   :  { %21 = dma.hbm_to_vmem [thread:$0]  %s591_s0, 2048, %s16_s16, [#allocation3], %s435_s25, %s435_s25, %s436_s26  }
  0x11   :  { %432 = dma.done.wait [#allocation3], 2048  }
  0x12   :  { %433 = vsyncadd [#allocation3], 4294965248  ;;  %v409_v0 = vld [vmem:[%s592_s1] sm:$0xff]   ;;  %v33_v2 = vld [vmem:[#allocation2 + $0x8] sm:$0xff]  ;;  %vm64_vm0 = vcmask 130048   ;;  %vm312_vm1 = vcmask 60416  }
  0x13   :  { %v32_v1 = vld [vmem:[#allocation2] sm:$0xff]  ;;  %386 = vmatprep.subr.bf16.mxu0 %v409_v0  ;;  %404 = vmatprep.subr.bf16.mxu1 %v409_v0  ;;  %v41_v5 = vld [vmem:[#allocation2 + $0x48] sm:$0xff]  ;;  %v34_v6 = vld [vmem:[#allocation2 + $0x10] sm:$0xff] }
  0x14   :  { %v40_v3 = vld [vmem:[#allocation2 + $0x40] sm:$0xff]  ;;  %v48_v4 = vpack.c.bf16 %v33_v2, %v32_v1  ;;  %v35_v7 = vld [vmem:[#allocation2 + $0x18] sm:$0xff]  ;;  %387 = vmatpush3.bf16.msra.mxu0 %v409_v0  ;;  %405 = vmatpush3.bf16.msra.mxu1 %v409_v0  ;;  %v42_v10 = vld [vmem:[#allocation2 + $0x50] sm:$0xff] }
  0x15   :  { %v52_v8 = vpack.c.bf16 %v41_v5, %v40_v3  ;;  %v49_v9 = vpack.c.bf16 %v35_v7, %v34_v6  ;;  %v43_v11 = vld [vmem:[#allocation2 + $0x58] sm:$0xff]  ;;  %v36_v12 = vld [vmem:[#allocation2 + $0x20] sm:$0xff]  ;;  %v37_v14 = vld [vmem:[#allocation2 + $0x28] sm:$0xff] }
  0x16   :  { %388 = vmatprep.mubr.msk.bf16.mxu0 %vm64_vm0, %v48_v4  ;;  %v53_v13 = vpack.c.bf16 %v43_v11, %v42_v10  ;;  %v44_v15 = vld [vmem:[#allocation2 + $0x60] sm:$0xff]  ;;  %v45_v16 = vld [vmem:[#allocation2 + $0x68] sm:$0xff]  ;;  %v50_v17 = vpack.c.bf16 %v37_v14, %v36_v12  ;;  %v38_v19 = vld [vmem:[#allocation2 + $0x30] sm:$0xff] }
  0x17   :  { %396 = vmatprep.mubr.msk.bf16.mxu1 %vm64_vm0, %v52_v8  ;;  %v54_v18 = vpack.c.bf16 %v45_v16, %v44_v15  ;;  %389 = vmatmul.mubr.msk.bf16.vlgmr.msra.gmra.mrb[0].mxu0 %vm64_vm0, %v49_v9  ;;  %v39_v20 = vld [vmem:[#allocation2 + $0x38] sm:$0xff]  ;;  %v46_v21 = vld [vmem:[#allocation2 + $0x70] sm:$0xff]  ;;  %v488_v25 = vld [vmem:[%s593_s2] ss:$0 sm:$0xff] }
  0x18   :  { %397 = vmatmul.mubr.msk.bf16.vlgmr.msra.gmra.mrb[0].mxu1 %vm64_vm0, %v53_v13  ;;  %392 = vmatprep.mubr.msk.bf16.mxu0 %vm64_vm0, %v50_v17  ;;  %v47_v22 = vld [vmem:[#allocation2 + $0x78] sm:$0xff]  ;;  %v51_v23 = vpack.c.bf16 %v39_v20, %v38_v19  ;;  %v493_v27 = vld [vmem:[%s594_s3] ss:$0 sm:$0xff] }
  0x19   :  { %400 = vmatprep.mubr.msk.bf16.mxu1 %vm64_vm0, %v54_v18  ;;  %v55_v24 = vpack.c.bf16 %v47_v22, %v46_v21 }
  0x1f   :  { %393 = vmatmul.mubr.msk.bf16.gmra.mrb[4].mxu0 %vm64_vm0, %v51_v23 }
  0x20   :  { %401 = vmatmul.mubr.msk.bf16.gmra.mrb[4].mxu1 %vm64_vm0, %v55_v24 }
  0xea   :  { %v390_v26 = vpop.f32.mrb[0].mxu0 }
  0xeb   :  { %v398_v28 = vpop.f32.mrb[0].mxu1  ;;  %v195_v29 = vmul.f32 %v390_v26, %v488_v25  ;;  %v123_v31 = vpop.f32.mrb[1].mxu0 }
  0xec   :  { %v203_v30 = vmul.f32 %v398_v28, %v488_v25  ;;  %v155_v32 = vpop.f32.mrb[1].mxu1  ;;  %v193_v33 = vmul.f32 %v488_v25, %v123_v31  ;;  %v391_v35 = vpop.f32.mrb[2].mxu0 }
  0xed   :  { %v201_v34 = vmul.f32 %v488_v25, %v155_v32  ;;  %v399_v36 = vpop.f32.mrb[2].mxu1  ;;  %v218_v37 = vadd.f32 %v493_v27, %v195_v29  ;;  %v196_v39 = vmul.f32 %v391_v35, %v488_v25  ;;  %v126_v41 = vpop.f32.mrb[3].mxu0 }
  0xee   :  { %v226_v38 = vadd.f32 %v493_v27, %v203_v30  ;;  %v204_v40 = vmul.f32 %v399_v36, %v488_v25  ;;  %v158_v42 = vpop.f32.mrb[3].mxu1  ;;  %v216_v43 = vadd.f32 %v493_v27, %v193_v33  ;;  %v194_v45 = vmul.f32 %v488_v25, %v126_v41 }
  0xef   :  { %v224_v44 = vadd.f32 %v493_v27, %v201_v34  ;;  %v202_v46 = vmul.f32 %v488_v25, %v158_v42  ;;  %v234_v47 = vmax.f32 %v218_v37, 0.0  ;;  %v219_v49 = vadd.f32 %v493_v27, %v196_v39 }
  0xf0   :  { %v242_v48 = vmax.f32 %v226_v38, 0.0  ;;  %v227_v50 = vadd.f32 %v493_v27, %v204_v40  ;;  %v232_v51 = vmax.f32 %v216_v43, 0.0  ;;  %v217_v53 = vadd.f32 %v493_v27, %v194_v45 }
  0xf1   :  { %v240_v52 = vmax.f32 %v224_v44, 0.0  ;;  %v225_v54 = vadd.f32 %v493_v27, %v202_v46  ;;  %v363_v55 = vpack.c.bf16 %v234_v47, %v234_v47  ;;  %v235_v57 = vmax.f32 %v219_v49, 0.0 }
  0xf2   :  { %v371_v56 = vpack.c.bf16 %v242_v48, %v242_v48  ;;  %v243_v58 = vmax.f32 %v227_v50, 0.0  ;;  %v361_v59 = vpack.c.bf16 %v232_v51, %v232_v51  ;;  %v233_v61 = vmax.f32 %v217_v53, 0.0  ;;  %v394_v63 = vpop.f32.mrb[4].mxu0 }
  0xf3   :  { %v369_v60 = vpack.c.bf16 %v240_v52, %v240_v52  ;;  %v241_v62 = vmax.f32 %v225_v54, 0.0  ;;  %v402_v0 = vpop.f32.mrb[4].mxu1  ;;  %315 = vst.msk [vmem:[%s595_s4 + $0x8] sm:$0xf] %vm312_vm1, %v363_v55  ;;  %v364_v1 = vpack.c.bf16 %v235_v57, %v235_v57  ;;  %v199_v3 = vmul.f32 %v394_v63, %v488_v25  ;;  %v139_v5 = vpop.f32.mrb[5].mxu0 }
  0xf4   :  { %323 = vst.msk [vmem:[%s595_s4 + $0x28] sm:$0xf] %vm312_vm1, %v371_v56  ;;  %v372_v2 = vpack.c.bf16 %v243_v58, %v243_v58  ;;  %v207_v4 = vmul.f32 %v402_v0, %v488_v25  ;;  %v171_v6 = vpop.f32.mrb[5].mxu1  ;;  %313 = vst.msk [vmem:[%s595_s4] sm:$0xf] %vm312_vm1, %v361_v59  ;;  %v362_v7 = vpack.c.bf16 %v233_v61, %v233_v61  ;;  %v395_v11 = vpop.f32.mrb[6].mxu0 }
  0xf5   :  { %321 = vst.msk [vmem:[%s595_s4 + $0x20] sm:$0xf] %vm312_vm1, %v369_v60  ;;  %v370_v8 = vpack.c.bf16 %v241_v62, %v241_v62  ;;  %v197_v9 = vmul.f32 %v488_v25, %v139_v5  ;;  %v205_v10 = vmul.f32 %v488_v25, %v171_v6  ;;  %v403_v12 = vpop.f32.mrb[6].mxu1  ;;  %316 = vst.msk [vmem:[%s595_s4 + $0xc] sm:$0xf] %vm312_vm1, %v364_v1  ;;  %v142_v17 = vpop.f32.mrb[7].mxu0 }
  0xf6   :  { %324 = vst.msk [vmem:[%s595_s4 + $0x2c] sm:$0xf] %vm312_vm1, %v372_v2  ;;  %v222_v13 = vadd.f32 %v493_v27, %v199_v3  ;;  %v230_v14 = vadd.f32 %v493_v27, %v207_v4  ;;  %v200_v15 = vmul.f32 %v395_v11, %v488_v25  ;;  %v208_v16 = vmul.f32 %v403_v12, %v488_v25  ;;  %v174_v18 = vpop.f32.mrb[7].mxu1 }
  0xf7   :  { %314 = vst.msk [vmem:[%s595_s4 + $0x4] sm:$0xf] %vm312_vm1, %v362_v7  ;;  %322 = vst.msk [vmem:[%s595_s4 + $0x24] sm:$0xf] %vm312_vm1, %v370_v8  ;;  %v220_v19 = vadd.f32 %v493_v27, %v197_v9  ;;  %v228_v20 = vadd.f32 %v493_v27, %v205_v10  ;;  %v198_v21 = vmul.f32 %v488_v25, %v142_v17 }
  0xf8   :  { %v206_v22 = vmul.f32 %v488_v25, %v174_v18  ;;  %v238_v23 = vmax.f32 %v222_v13, 0.0  ;;  %v246_v24 = vmax.f32 %v230_v14, 0.0  ;;  %v223_v26 = vadd.f32 %v493_v27, %v200_v15 }
  0xf9   :  { %v231_v28 = vadd.f32 %v493_v27, %v208_v16  ;;  %v236_v29 = vmax.f32 %v220_v19, 0.0  ;;  %v244_v30 = vmax.f32 %v228_v20, 0.0  ;;  %v221_v31 = vadd.f32 %v493_v27, %v198_v21 }
  0xfa   :  { %v229_v32 = vadd.f32 %v493_v27, %v206_v22  ;;  %v367_v33 = vpack.c.bf16 %v238_v23, %v238_v23  ;;  %v375_v34 = vpack.c.bf16 %v246_v24, %v246_v24  ;;  %v239_v35 = vmax.f32 %v223_v26, 0.0 }
  0xfb   :  { %v247_v36 = vmax.f32 %v231_v28, 0.0  ;;  %v365_v37 = vpack.c.bf16 %v236_v29, %v236_v29  ;;  %v373_v38 = vpack.c.bf16 %v244_v30, %v244_v30  ;;  %v237_v39 = vmax.f32 %v221_v31, 0.0 }
  0xfc   :  { %v245_v25 = vmax.f32 %v229_v32, 0.0  ;;  %319 = vst.msk [vmem:[%s595_s4 + $0x18] sm:$0xf] %vm312_vm1, %v367_v33  ;;  %327 = vst.msk [vmem:[%s595_s4 + $0x38] sm:$0xf] %vm312_vm1, %v375_v34  ;;  %v368_v40 = vpack.c.bf16 %v239_v35, %v239_v35 }
  0xfd   :  { %v376_v27 = vpack.c.bf16 %v247_v36, %v247_v36  ;;  %317 = vst.msk [vmem:[%s595_s4 + $0x10] sm:$0xf] %vm312_vm1, %v365_v37  ;;  %325 = vst.msk [vmem:[%s595_s4 + $0x30] sm:$0xf] %vm312_vm1, %v373_v38  ;;  %v366_v41 = vpack.c.bf16 %v237_v39, %v237_v39 }
  0xfe   :  { %v374_v42 = vpack.c.bf16 %v245_v25, %v245_v25  ;;  %320 = vst.msk [vmem:[%s595_s4 + $0x1c] sm:$0xf] %vm312_vm1, %v368_v40 }
  0xff   :  { %328 = vst.msk [vmem:[%s595_s4 + $0x3c] sm:$0xf] %vm312_vm1, %v376_v27  ;;  %318 = vst.msk [vmem:[%s595_s4 + $0x14] sm:$0xf] %vm312_vm1, %v366_v41 }
 0x100   :  { %326 = vst.msk [vmem:[%s595_s4 + $0x34] sm:$0xf] %vm312_vm1, %v374_v42 }
 0x101   :  { %333 = vsyncpa [#allocation3], 1 }

// kernel: _lambda_.7
= control target key start
LH: loop header
LB: loop body
LE: loop exit
PB: predicated region body
PF: predicated region fallthrough
CT: control target
= control target key end

     0   :  { %vm100_vm0 = vcmask 1043456   ;;  %vm75_vm1 = vcmask 64512   ;;  %vm311_vm2 = vcmask 125952   ;;  %s587_s1 = inlined_call_operand.vmem [shape: bf16[8,16], index: 1, kind: input, shape index: {}]   ;;  %s588_s0 = inlined_call_operand.vmem [shape: bf16[128,8], index: 0, kind: input, shape index: {}]   ;;  %s589_s2 = inlined_call_operand.vmem [shape: f32[1,16], index: 2, kind: input, shape index: {}]   ;;  %s590_s3 = inlined_call_operand.vmem [shape: f32[1,16], index: 3, kind: input, shape index: {}]   ;;  %s591_s4 = inlined_call_operand.vmem [shape: bf16[128,16], index: 4, kind: output, shape index: {}]  }
   0x1   :  { %v34_v0 = vld [vmem:[%s587_s1] sm:$0xf]  ;;  %v415_v4 = vld [vmem:[%s588_s0 + $0x8] sm:$0xff]   ;;  %v417_v6 = vld [vmem:[%s588_s0 + $0x10] sm:$0xff]  }
   0x2   :  { %411 = vmatprep.subr.msk.bf16.mxu0 %vm100_vm0, %v34_v0  ;;  %412 = vmatprep.subr.msk.bf16.mxu1 %vm100_vm0, %v34_v0  ;;  %v102_v1 = vsel %vm100_vm0, %v34_v0, 0  ;;  %v413_v2 = vld [vmem:[%s588_s0] sm:$0xff]   ;;  %v416_v5 = vld [vmem:[%s588_s0 + $0x28] sm:$0xff]   ;;  %v418_v7 = vld [vmem:[%s588_s0 + $0x30] sm:$0xff]  }
   0x3   :  { %392 = vmatpush3.bf16.msra.mxu0 %v102_v1  ;;  %410 = vmatpush3.bf16.msra.mxu1 %v102_v1  ;;  %v414_v3 = vld [vmem:[%s588_s0 + $0x20] sm:$0xff]   ;;  %v419_v8 = vld [vmem:[%s588_s0 + $0x18] sm:$0xff]  }
   0x4   :  { %393 = vmatprep.mubr.msk.bf16.mxu0 %vm75_vm1, %v413_v2  ;;  %401 = vmatprep.mubr.msk.bf16.mxu1 %vm75_vm1, %v414_v3  ;;  %v420_v9 = vld [vmem:[%s588_s0 + $0x38] sm:$0xff]   ;;  %v484_v10 = vld [vmem:[%s589_s2] ss:$0 sm:$0xff] }
   0x5   :  { %v489_v12 = vld [vmem:[%s590_s3] ss:$0 sm:$0xff] }
   0x6   :  { %394 = vmatmul.mubr.msk.bf16.vlgmr.msra.gmra.mrb[0].mxu0 %vm75_vm1, %v415_v4  ;;  %402 = vmatmul.mubr.msk.bf16.vlgmr.msra.gmra.mrb[0].mxu1 %vm75_vm1, %v416_v5 }
   0x7   :  { %397 = vmatprep.mubr.msk.bf16.mxu0 %vm75_vm1, %v417_v6  ;;  %405 = vmatprep.mubr.msk.bf16.mxu1 %vm75_vm1, %v418_v7 }
   0xe   :  { %398 = vmatmul.mubr.msk.bf16.gmra.mrb[4].mxu0 %vm75_vm1, %v419_v8  ;;  %406 = vmatmul.mubr.msk.bf16.gmra.mrb[4].mxu1 %vm75_vm1, %v420_v9 }
  0xd9   :  { %v395_v11 = vpop.f32.mrb[0].mxu0  ;;  %v403_v14 = vpop.f32.mrb[0].mxu1 }
  0xda   :  { %v210_v13 = vmul.f32 %v395_v11, %v484_v10  ;;  %v138_v15 = vpop.f32.mrb[1].mxu0  ;;  %v218_v16 = vmul.f32 %v403_v14, %v484_v10  ;;  %v170_v18 = vpop.f32.mrb[1].mxu1 }
  0xdb   :  { %v208_v17 = vmul.f32 %v484_v10, %v138_v15  ;;  %v396_v19 = vpop.f32.mrb[2].mxu0  ;;  %v216_v21 = vmul.f32 %v484_v10, %v170_v18  ;;  %v404_v23 = vpop.f32.mrb[2].mxu1 }
  0xdc   :  { %v233_v20 = vadd.f32 %v489_v12, %v210_v13  ;;  %v211_v22 = vmul.f32 %v396_v19, %v484_v10  ;;  %v141_v24 = vpop.f32.mrb[3].mxu0  ;;  %v241_v25 = vadd.f32 %v489_v12, %v218_v16  ;;  %v219_v27 = vmul.f32 %v404_v23, %v484_v10  ;;  %v173_v29 = vpop.f32.mrb[3].mxu1 }
  0xdd   :  { %v231_v26 = vadd.f32 %v489_v12, %v208_v17  ;;  %v209_v28 = vmul.f32 %v484_v10, %v141_v24  ;;  %v239_v31 = vadd.f32 %v489_v12, %v216_v21  ;;  %v217_v33 = vmul.f32 %v484_v10, %v173_v29 }
  0xde   :  { %v368_v30 = vpack.c.bf16 %v233_v20, %v233_v20  ;;  %v234_v32 = vadd.f32 %v489_v12, %v211_v22  ;;  %v376_v34 = vpack.c.bf16 %v241_v25, %v241_v25  ;;  %v242_v36 = vadd.f32 %v489_v12, %v219_v27 }
  0xdf   :  { %v366_v35 = vpack.c.bf16 %v231_v26, %v231_v26  ;;  %v232_v37 = vadd.f32 %v489_v12, %v209_v28  ;;  %v374_v38 = vpack.c.bf16 %v239_v31, %v239_v31  ;;  %v240_v40 = vadd.f32 %v489_v12, %v217_v33 }
  0xe0   :  { %314 = vst.msk [vmem:[%s591_s4 + $0x8] sm:$0xf] %vm311_vm2, %v368_v30  ;;  %v369_v39 = vpack.c.bf16 %v234_v32, %v234_v32  ;;  %322 = vst.msk [vmem:[%s591_s4 + $0x28] sm:$0xf] %vm311_vm2, %v376_v34  ;;  %v377_v41 = vpack.c.bf16 %v242_v36, %v242_v36 }
  0xe1   :  { %312 = vst.msk [vmem:[%s591_s4] sm:$0xf] %vm311_vm2, %v366_v35  ;;  %v367_v42 = vpack.c.bf16 %v232_v37, %v232_v37  ;;  %v399_v43 = vpop.f32.mrb[4].mxu0  ;;  %320 = vst.msk [vmem:[%s591_s4 + $0x20] sm:$0xf] %vm311_vm2, %v374_v38  ;;  %v375_v44 = vpack.c.bf16 %v240_v40, %v240_v40  ;;  %v407_v46 = vpop.f32.mrb[4].mxu1 }
  0xe2   :  { %315 = vst.msk [vmem:[%s591_s4 + $0xc] sm:$0xf] %vm311_vm2, %v369_v39  ;;  %v214_v45 = vmul.f32 %v399_v43, %v484_v10  ;;  %v154_v47 = vpop.f32.mrb[5].mxu0  ;;  %323 = vst.msk [vmem:[%s591_s4 + $0x2c] sm:$0xf] %vm311_vm2, %v377_v41  ;;  %v222_v48 = vmul.f32 %v407_v46, %v484_v10  ;;  %v186_v50 = vpop.f32.mrb[5].mxu1 }
  0xe3   :  { %313 = vst.msk [vmem:[%s591_s4 + $0x4] sm:$0xf] %vm311_vm2, %v367_v42  ;;  %v212_v49 = vmul.f32 %v484_v10, %v154_v47  ;;  %v400_v51 = vpop.f32.mrb[6].mxu0  ;;  %321 = vst.msk [vmem:[%s591_s4 + $0x24] sm:$0xf] %vm311_vm2, %v375_v44  ;;  %v220_v53 = vmul.f32 %v484_v10, %v186_v50  ;;  %v408_v55 = vpop.f32.mrb[6].mxu1 }
  0xe4   :  { %v237_v52 = vadd.f32 %v489_v12, %v214_v45  ;;  %v215_v54 = vmul.f32 %v400_v51, %v484_v10  ;;  %v157_v56 = vpop.f32.mrb[7].mxu0  ;;  %v245_v57 = vadd.f32 %v489_v12, %v222_v48  ;;  %v223_v59 = vmul.f32 %v408_v55, %v484_v10  ;;  %v189_v61 = vpop.f32.mrb[7].mxu1 }
  0xe5   :  { %v235_v58 = vadd.f32 %v489_v12, %v212_v49  ;;  %v213_v60 = vmul.f32 %v484_v10, %v157_v56  ;;  %v243_v63 = vadd.f32 %v489_v12, %v220_v53  ;;  %v221_v1 = vmul.f32 %v484_v10, %v189_v61 }
  0xe6   :  { %v372_v62 = vpack.c.bf16 %v237_v52, %v237_v52  ;;  %v238_v0 = vadd.f32 %v489_v12, %v215_v54  ;;  %v380_v2 = vpack.c.bf16 %v245_v57, %v245_v57  ;;  %v246_v4 = vadd.f32 %v489_v12, %v223_v59 }
  0xe7   :  { %v370_v3 = vpack.c.bf16 %v235_v58, %v235_v58  ;;  %v236_v5 = vadd.f32 %v489_v12, %v213_v60  ;;  %v378_v6 = vpack.c.bf16 %v243_v63, %v243_v63  ;;  %v244_v8 = vadd.f32 %v489_v12, %v221_v1 }
  0xe8   :  { %318 = vst.msk [vmem:[%s591_s4 + $0x18] sm:$0xf] %vm311_vm2, %v372_v62  ;;  %v373_v7 = vpack.c.bf16 %v238_v0, %v238_v0  ;;  %326 = vst.msk [vmem:[%s591_s4 + $0x38] sm:$0xf] %vm311_vm2, %v380_v2  ;;  %v381_v9 = vpack.c.bf16 %v246_v4, %v246_v4 }
  0xe9   :  { %316 = vst.msk [vmem:[%s591_s4 + $0x10] sm:$0xf] %vm311_vm2, %v370_v3  ;;  %v371_v10 = vpack.c.bf16 %v236_v5, %v236_v5  ;;  %324 = vst.msk [vmem:[%s591_s4 + $0x30] sm:$0xf] %vm311_vm2, %v378_v6  ;;  %v379_v11 = vpack.c.bf16 %v244_v8, %v244_v8 }
  0xea   :  { %319 = vst.msk [vmem:[%s591_s4 + $0x1c] sm:$0xf] %vm311_vm2, %v373_v7  ;;  %327 = vst.msk [vmem:[%s591_s4 + $0x3c] sm:$0xf] %vm311_vm2, %v381_v9 }
  0xeb   :  { %317 = vst.msk [vmem:[%s591_s4 + $0x14] sm:$0xf] %vm311_vm2, %v371_v10  ;;  %325 = vst.msk [vmem:[%s591_s4 + $0x34] sm:$0xf] %vm311_vm2, %v379_v11 }

// kernel: _lambda_.11
= control target key start
LH: loop header
LB: loop body
LE: loop exit
PB: predicated region body
PF: predicated region fallthrough
CT: control target
= control target key end

     0   :  { %vm120_vm0 = vcmask 1043456   ;;  %v425_v4 = vmov 0   ;;  %vm95_vm1 = vcmask 64512   ;;  %s636_s0 = inlined_call_operand.vmem [shape: bf16[128,8], index: 0, kind: input, shape index: {}]   ;;  %s637_s1 = inlined_call_operand.vmem [shape: bf16[8,16], index: 1, kind: input, shape index: {}]   ;;  %s638_s2 = inlined_call_operand.vmem [shape: f32[1,16], index: 2, kind: input, shape index: {}]   ;;  %s639_s3 = inlined_call_operand.vmem [shape: f32[1,16], index: 3, kind: input, shape index: {}]   ;;  %s640_s4 = inlined_call_operand.vmem [shape: f32[128,16], index: 4, kind: input, shape index: {}]   ;;  %s641_s5 = inlined_call_operand.hbm [shape: f32[128,16], index: 5, kind: output, shape index: {}]  }
   0x1   :  { %v54_v0 = vld [vmem:[%s637_s1] sm:$0xf]  ;;  %v23_v3 = vld [vmem:[%s636_s0 + $0x4] sm:$0xf]  ;;  %v24_v10 = vld [vmem:[%s636_s0 + $0x8] sm:$0xf] }
   0x2   :  { %v22_v1 = vld [vmem:[%s636_s0] sm:$0xf]  ;;  %395 = vmatprep.subr.msk.bf16.mxu0 %vm120_vm0, %v54_v0  ;;  %396 = vmatprep.subr.msk.bf16.mxu1 %vm120_vm0, %v54_v0  ;;  %v122_v2 = vsel %vm120_vm0, %v54_v0, 0  ;;  %v39_v7 = vmax.bf16 %v425_v4, %v23_v3  ;;  %v31_v8 = vld [vmem:[%s636_s0 + $0x24] sm:$0xf]  ;;  %v40_v13 = vmax.bf16 %v425_v4, %v24_v10 }
   0x3   :  { %v38_v5 = vmax.bf16 %v425_v4, %v22_v1  ;;  %v30_v6 = vld [vmem:[%s636_s0 + $0x20] sm:$0xf]  ;;  %376 = vmatpush3.bf16.msra.mxu0 %v122_v2  ;;  %394 = vmatpush3.bf16.msra.mxu1 %v122_v2  ;;  %v25_v11 = vld [vmem:[%s636_s0 + $0xc] sm:$0xf]  ;;  %v47_v12 = vmax.bf16 %v425_v4, %v31_v8  ;;  %v32_v15 = vld [vmem:[%s636_s0 + $0x28] sm:$0xf] }
   0x4   :  { %v46_v9 = vmax.bf16 %v425_v4, %v30_v6  ;;  %v41_v14 = vmax.bf16 %v425_v4, %v25_v11  ;;  %v33_v16 = vld [vmem:[%s636_s0 + $0x2c] sm:$0xf]  ;;  %v26_v17 = vld [vmem:[%s636_s0 + $0x10] sm:$0xf]  ;;  %v48_v19 = vmax.bf16 %v425_v4, %v32_v15  ;;  %v27_v21 = vld [vmem:[%s636_s0 + $0x14] sm:$0xf] }
   0x5   :  { %v348_v18 = vcombine.low %v38_v5, %v39_v7  ;;  %v49_v20 = vmax.bf16 %v425_v4, %v33_v16  ;;  %v42_v22 = vmax.bf16 %v425_v4, %v26_v17  ;;  %v34_v23 = vld [vmem:[%s636_s0 + $0x30] sm:$0xf]  ;;  %v35_v24 = vld [vmem:[%s636_s0 + $0x34] sm:$0xf]  ;;  %v43_v27 = vmax.bf16 %v425_v4, %v27_v21  ;;  %v28_v29 = vld [vmem:[%s636_s0 + $0x18] sm:$0xf] }
   0x6   :  { %v352_v25 = vcombine.low %v46_v9, %v47_v12  ;;  %v349_v26 = vcombine.low %v40_v13, %v41_v14  ;;  %v50_v28 = vmax.bf16 %v425_v4, %v34_v23  ;;  %v29_v30 = vld [vmem:[%s636_s0 + $0x1c] sm:$0xf]  ;;  %v36_v31 = vld [vmem:[%s636_s0 + $0x38] sm:$0xf]  ;;  %v51_v33 = vmax.bf16 %v425_v4, %v35_v24 }
   0x7   :  { %377 = vmatprep.mubr.msk.bf16.mxu0 %vm95_vm1, %v348_v18  ;;  %v353_v32 = vcombine.low %v48_v19, %v49_v20  ;;  %v37_v34 = vld [vmem:[%s636_s0 + $0x3c] sm:$0xf] }
   0x8   :  { %10 = vsyncpa [#allocation3], 0  ;;  %385 = vmatprep.mubr.msk.bf16.mxu1 %vm95_vm1, %v352_v25  ;;  %378 = vmatmul.mubr.msk.bf16.vlgmr.msra.gmra.mrb[0].mxu0 %vm95_vm1, %v349_v26  ;;  %v350_v35 = vcombine.low %v42_v22, %v43_v27  ;;  %v44_v36 = vmax.bf16 %v425_v4, %v28_v29  ;;  %v45_v37 = vmax.bf16 %v425_v4, %v29_v30  ;;  %v521_v43 = vld [vmem:[%s638_s2] ss:$0 sm:$0xff]  ;;  %v269_v49 = vld [vmem:[%s640_s4 + $0x10] sm:$0xff]  ;;  %vm315_vm2 = vcmask 130048  }
   0x9   :  { %386 = vmatmul.mubr.msk.bf16.vlgmr.msra.gmra.mrb[0].mxu1 %vm95_vm1, %v353_v32  ;;  %v354_v38 = vcombine.low %v50_v28, %v51_v33  ;;  %v52_v39 = vmax.bf16 %v425_v4, %v36_v31  ;;  %v53_v40 = vmax.bf16 %v425_v4, %v37_v34  ;;  %v526_v45 = vld [vmem:[%s639_s3] ss:$0 sm:$0xff]  ;;  %v277_v55 = vld [vmem:[%s640_s4 + $0x50] sm:$0xff]  ;;  %v270_v0 = vld [vmem:[%s640_s4 + $0x18] sm:$0xff]  ;;  %s426_s3 = smov [#allocation2]  }
   0xa   :  { %381 = vmatprep.mubr.msk.bf16.mxu0 %vm95_vm1, %v350_v35  ;;  %v351_v41 = vcombine.low %v44_v36, %v45_v37  ;;  %v267_v56 = vld [vmem:[%s640_s4] sm:$0xff]  ;;  %v278_v7 = vld [vmem:[%s640_s4 + $0x58] sm:$0xff]  ;;  %v268_v8 = vld [vmem:[%s640_s4 + $0x8] sm:$0xff]  ;;  %s337_s30 = sshll.u32 %s426_s3, 4  ;;  %s338_s30 = int_to_ptr.vmem [resolvable:$true] %s337_s30 }
   0xb   :  { %389 = vmatprep.mubr.msk.bf16.mxu1 %vm95_vm1, %v354_v38  ;;  %v355_v42 = vcombine.low %v52_v39, %v53_v40  ;;  %v275_v63 = vld [vmem:[%s640_s4 + $0x40] sm:$0xff]  ;;  %v276_v14 = vld [vmem:[%s640_s4 + $0x48] sm:$0xff]  ;;  %v273_v32 = vld [vmem:[%s640_s4 + $0x30] sm:$0xff]  ;;  %p406_p1 = scmp.lt.s32.totalorder %s338_s30, %s338_s30 }
   0xc   :  { %v281_v39 = vld [vmem:[%s640_s4 + $0x70] sm:$0xff]  ;;  %v271_v40 = vld [vmem:[%s640_s4 + $0x20] sm:$0xff] }
  0x10   :  { %382 = vmatmul.mubr.msk.bf16.gmra.mrb[4].mxu0 %vm95_vm1, %v351_v41 }
  0x11   :  { %390 = vmatmul.mubr.msk.bf16.gmra.mrb[4].mxu1 %vm95_vm1, %v355_v42 }
  0xdb   :  { %v379_v44 = vpop.f32.mrb[0].mxu0 }
  0xdc   :  { %v230_v46 = vmul.f32 %v379_v44, %v521_v43  ;;  %v387_v47 = vpop.f32.mrb[0].mxu1  ;;  %v158_v48 = vpop.f32.mrb[1].mxu0 }
  0xdd   :  { %v238_v50 = vmul.f32 %v387_v47, %v521_v43  ;;  %v228_v51 = vmul.f32 %v521_v43, %v158_v48  ;;  %v190_v52 = vpop.f32.mrb[1].mxu1  ;;  %v380_v53 = vpop.f32.mrb[2].mxu0 }
  0xde   :  { %v253_v54 = vadd.f32 %v526_v45, %v230_v46  ;;  %v236_v57 = vmul.f32 %v521_v43, %v190_v52  ;;  %v231_v58 = vmul.f32 %v380_v53, %v521_v43  ;;  %v388_v59 = vpop.f32.mrb[2].mxu1  ;;  %v161_v60 = vpop.f32.mrb[3].mxu0 }
  0xdf   :  { %v261_v61 = vadd.f32 %v526_v45, %v238_v50  ;;  %v251_v62 = vadd.f32 %v526_v45, %v228_v51  ;;  %v239_v1 = vmul.f32 %v388_v59, %v521_v43  ;;  %v229_v2 = vmul.f32 %v521_v43, %v161_v60  ;;  %v193_v3 = vpop.f32.mrb[3].mxu1  ;;  %v274_v50 = vld [vmem:[%s640_s4 + $0x38] sm:$0xff] }
  0xe0   :  { %v285_v4 = vadd.f32 %v269_v49, %v253_v54  ;;  %v259_v5 = vadd.f32 %v526_v45, %v236_v57  ;;  %v254_v6 = vadd.f32 %v526_v45, %v231_v58  ;;  %v237_v9 = vmul.f32 %v521_v43, %v193_v3  ;;  %v279_v49 = vld [vmem:[%s640_s4 + $0x60] sm:$0xff]  ;;  %v282_v57 = vld [vmem:[%s640_s4 + $0x78] sm:$0xff]  ;;  %v272_v58 = vld [vmem:[%s640_s4 + $0x28] sm:$0xff] }
  0xe1   :  { %v293_v10 = vadd.f32 %v277_v55, %v261_v61  ;;  %v283_v11 = vadd.f32 %v267_v56, %v251_v62  ;;  %v262_v12 = vadd.f32 %v526_v45, %v239_v1  ;;  %v252_v13 = vadd.f32 %v526_v45, %v229_v2 }
  0xe2   :  { %v301_v15 = vmax.f32 %v285_v4, 0.0  ;;  %v291_v16 = vadd.f32 %v275_v63, %v259_v5  ;;  %v286_v17 = vadd.f32 %v270_v0, %v254_v6  ;;  %v260_v18 = vadd.f32 %v526_v45, %v237_v9  ;;  %v280_v0 = vld [vmem:[%s640_s4 + $0x68] sm:$0xff]  ;;  %s401_s4 = scalar_lea.vmem %s338_s30, 2048 }
  0xe3   :  { %v309_v19 = vmax.f32 %v293_v10, 0.0  ;;  %v299_v20 = vmax.f32 %v283_v11, 0.0  ;;  %v294_v21 = vadd.f32 %v278_v7, %v262_v12  ;;  %v284_v22 = vadd.f32 %v268_v8, %v252_v13  ;;  %v383_v23 = vpop.f32.mrb[4].mxu0  ;;  %p402_p0 = scmp.ne.s32.totalorder %s338_s30, %s401_s4  ;;  %p407_p2 = scmp.lt.s32.totalorder %s401_s4, %s401_s4 }
  0xe4   :  { %318 = vst.msk [vmem:[#allocation2 + $0x10] sm:$0xff] %vm315_vm2, %v301_v15  ;;  %v307_v24 = vmax.f32 %v291_v16, 0.0  ;;  %v302_v25 = vmax.f32 %v286_v17, 0.0  ;;  %v292_v26 = vadd.f32 %v276_v14, %v260_v18  ;;  %v234_v27 = vmul.f32 %v383_v23, %v521_v43  ;;  %v391_v28 = vpop.f32.mrb[4].mxu1  ;;  %v174_v29 = vpop.f32.mrb[5].mxu0 }
  0xe5   :  { %326 = vst.msk [vmem:[#allocation2 + $0x50] sm:$0xff] %vm315_vm2, %v309_v19  ;;  %316 = vst.msk [vmem:[#allocation2] sm:$0xff] %vm315_vm2, %v299_v20  ;;  %v310_v30 = vmax.f32 %v294_v21, 0.0  ;;  %v300_v31 = vmax.f32 %v284_v22, 0.0  ;;  %v242_v33 = vmul.f32 %v391_v28, %v521_v43  ;;  %v232_v34 = vmul.f32 %v521_v43, %v174_v29  ;;  %v206_v35 = vpop.f32.mrb[5].mxu1  ;;  %v384_v36 = vpop.f32.mrb[6].mxu0  ;;  %p408_p3 = por %p407_p2, %p406_p1 }
  0xe6   :  { %324 = vst.msk [vmem:[#allocation2 + $0x40] sm:$0xff] %vm315_vm2, %v307_v24  ;;  %319 = vst.msk [vmem:[#allocation2 + $0x18] sm:$0xff] %vm315_vm2, %v302_v25  ;;  %v308_v37 = vmax.f32 %v292_v26, 0.0  ;;  %v257_v38 = vadd.f32 %v526_v45, %v234_v27  ;;  %v240_v41 = vmul.f32 %v521_v43, %v206_v35  ;;  %v235_v42 = vmul.f32 %v384_v36, %v521_v43  ;;  %v392_v44 = vpop.f32.mrb[6].mxu1  ;;  %v177_v46 = vpop.f32.mrb[7].mxu0 }
  0xe7   :  { %327 = vst.msk [vmem:[#allocation2 + $0x58] sm:$0xff] %vm315_vm2, %v310_v30  ;;  %317 = vst.msk [vmem:[#allocation2 + $0x8] sm:$0xff] %vm315_vm2, %v300_v31  ;;  %v265_v47 = vadd.f32 %v526_v45, %v242_v33  ;;  %v255_v48 = vadd.f32 %v526_v45, %v232_v34  ;;  %v243_v51 = vmul.f32 %v392_v44, %v521_v43  ;;  %v209_v53 = vpop.f32.mrb[7].mxu1  ;;  %p409_p4 = pnand %p408_p3, %p402_p0 }
  0xe8   :  { %v233_v52 = vmul.f32 %v521_v43, %v177_v46  ;;  %325 = vst.msk [vmem:[#allocation2 + $0x48] sm:$0xff] %vm315_vm2, %v308_v37  ;;  %v289_v54 = vadd.f32 %v273_v32, %v257_v38  ;;  %v263_v55 = vadd.f32 %v526_v45, %v240_v41  ;;  %v258_v56 = vadd.f32 %v526_v45, %v235_v42 }
  0xe9   :  { %v241_v59 = vmul.f32 %v521_v43, %v209_v53  ;;  %v297_v60 = vadd.f32 %v281_v39, %v265_v47  ;;  %v287_v61 = vadd.f32 %v271_v40, %v255_v48  ;;  %v266_v62 = vadd.f32 %v526_v45, %v243_v51 }
  0xea   :  { %v256_v63 = vadd.f32 %v526_v45, %v233_v52  ;;  %v305_v1 = vmax.f32 %v289_v54, 0.0  ;;  %v295_v2 = vadd.f32 %v279_v49, %v263_v55  ;;  %v290_v3 = vadd.f32 %v274_v50, %v258_v56 }
  0xeb   :  { %v264_v4 = vadd.f32 %v526_v45, %v241_v59  ;;  %v313_v5 = vmax.f32 %v297_v60, 0.0  ;;  %v303_v6 = vmax.f32 %v287_v61, 0.0  ;;  %v298_v43 = vadd.f32 %v282_v57, %v266_v62 }
  0xec   :  { %v288_v7 = vadd.f32 %v272_v58, %v256_v63  ;;  %322 = vst.msk [vmem:[#allocation2 + $0x30] sm:$0xff] %vm315_vm2, %v305_v1  ;;  %v311_v8 = vmax.f32 %v295_v2, 0.0  ;;  %v306_v9 = vmax.f32 %v290_v3, 0.0 }
  0xed   :  { %v296_v10 = vadd.f32 %v280_v0, %v264_v4  ;;  %330 = vst.msk [vmem:[#allocation2 + $0x70] sm:$0xff] %vm315_vm2, %v313_v5  ;;  %320 = vst.msk [vmem:[#allocation2 + $0x20] sm:$0xff] %vm315_vm2, %v303_v6  ;;  %v314_v11 = vmax.f32 %v298_v43, 0.0 }
  0xee   :  { %v304_v12 = vmax.f32 %v288_v7, 0.0  ;;  %328 = vst.msk [vmem:[#allocation2 + $0x60] sm:$0xff] %vm315_vm2, %v311_v8  ;;  %323 = vst.msk [vmem:[#allocation2 + $0x38] sm:$0xff] %vm315_vm2, %v306_v9 }
  0xef   :  { %v312_v45 = vmax.f32 %v296_v10, 0.0  ;;  %331 = vst.msk [vmem:[#allocation2 + $0x78] sm:$0xff] %vm315_vm2, %v314_v11 }
  0xf0   :  { %321 = vst.msk [vmem:[#allocation2 + $0x28] sm:$0xff] %vm315_vm2, %v304_v12 }
  0xf1   :  { %329 = vst.msk [vmem:[#allocation2 + $0x68] sm:$0xff] %vm315_vm2, %v312_v45 }
  0xf2   :  { %412 = shalt.err (!%p409_p4)
}
  0xf3   :  { %s413_s8 = scalar_lea.hbm %s641_s5, 2048 }
  0xf4   :  { %p414_p5 = scmp.ne.s32.totalorder %s641_s5, %s413_s8  ;;  %p417_p6 = scmp.lt.u32.totalorder %s413_s8, %s641_s5 }
  0xf6   :  { %p419_p7 = pnand %p417_p6, %p414_p5 }
  0xf8   :  { %422 = shalt.err (!%p419_p7)
}
  0xf9   :  { %s427_s13 = smov 128   ;;  %s428_s14 = smov 8  }
  0xfa   :  { %343 = dma.vmem_to_hbm [thread:$0]  %s338_s30, 2048, %s641_s5, [#allocation3], %s427_s13, %s427_s13, %s428_s14  }
  0xfb   :  { %423 = dma.done.wait [#allocation3], 2048  }
  0xfc   :  { %424 = vsyncadd [#allocation3], 4294965248 }
  0xfd   :  { %347 = vsyncpa [#allocation3], 1 }

// kernel: _lambda_.8
= control target key start
LH: loop header
LB: loop body
LE: loop exit
PB: predicated region body
PF: predicated region fallthrough
CT: control target
= control target key end

     0   :  { %11 = vsyncpa [#allocation3], 0  ;;  %s3279_s21 = smov 0   ;;  %s4510_s0 = inlined_call_operand.vmem [shape: bf16[16,8,16], index: 0, kind: input, shape index: {}]   ;;  %s4511_s1 = inlined_call_operand.vmem [shape: f32[2,8,8], index: 1, kind: input, shape index: {}]   ;;  %s4512_s2 = inlined_call_operand.vmem [shape: f32[2,8,8], index: 2, kind: input, shape index: {}]   ;;  %s4513_s3 = inlined_call_operand.vmem [shape: f32[4,8,8], index: 3, kind: input, shape index: {}]   ;;  %s4514_s4 = inlined_call_operand.vmem [shape: f32[4,2], index: 4, kind: input, shape index: {}]   ;;  %s4515_s5 = inlined_call_operand.vmem [shape: f32[3,8], index: 5, kind: input, shape index: {}]   ;;  %s4516_s6 = inlined_call_operand.vmem [shape: bf16[16,8,8], index: 6, kind: output, shape index: {}]  }
   0x1 LB: > { %s2893_s22 = sadd.s32 4294967295, %s3226_s21   ;;  %p2895_p0 = scmp.ge.s32.totalorder %s3226_s21, 1  ;;  %s3226_s21 = sphi %s3279_s21, %s17_s21  }
   0x2   : > { %p179_p1 = scmp.lt.s32.totalorder %s3226_s21, 5  ;;  %s201_s25 = sshll.u32 %s4514_s4, 4  ;;  %s202_s25 = int_to_ptr.vmem [resolvable:$true] %s201_s25 }
   0x3   : > { %p3294_p3 = scmp.eq.s32.totalorder %s2893_s22, 0  ;;  %s3201_s28 = scalar_lea.vmem %s202_s25, 64 }
   0x4   : > { %p3290_p2 = pnand %p2895_p0, %p179_p1  ;;  %p3202_p6 = scmp.ne.s32.totalorder %s202_s25, %s3201_s28 }
   0x5   : > { %p3209_p10 = scmp.lt.s32.totalorder %s202_s25, %s202_s25  ;;  %p3210_p11 = scmp.lt.s32.totalorder %s3201_s28, %s3201_s28 }
   0x6   : > { %p3077_p4 = pneg %p3290_p2 }
   0x7   : > { %p3211_p12 = por %p3210_p11, %p3209_p10 }
   0x8   : > { %p3078_p5 = pnand %p3294_p3, %p3077_p4 }
   0xa   : > { %p3203_p7 = pneg %p3078_p5 }
   0xc   : > { %p3204_p8 = pnand %p3203_p7, %p3202_p6 }
   0xe   : > { %p3205_p9 = pneg %p3204_p8 }
  0x10   : > { %p3212_p13 = pnand %p3211_p12, %p3205_p9 }
  0x12   : > { %3215 = shalt.err (!%p3212_p13)
}
  0x13   : > { %s3228_s29 = smov [#allocation2]   ;;  %226 = sbr.rel (%p3290_p2) target bundleno = 1396 (0x574), region = 44 }
  0x14   : > { %3080 = dma.vmem_to_smem (!%p3078_p5), %s202_s25, 64, %s3228_s29, [#allocation3]  }
  0x1a   : > { %3221 = dma.done.wait (%p3294_p3), [#allocation3], 64  }
  0x1b   : > { %3223 = vsyncadd (%p3294_p3), [#allocation3], 4294967232 }
  0x1c   : > { %232 = sfence }
  0x1d   : > { %s2900_s30 = sshll.u32 %s2893_s22, 2  ;;  %v517_v0 = vlaneseq  ;;  %v3229_v3 = vmov 1   ;;  %v3230_v4 = vmov 0   ;;  %v3231_v5 = vmov 0.0   ;;  %v278_v8 = vld [vmem:[%s4515_s5] sm:$0x7] }
  0x1e   : > { %p258_p0 = scmp.lt.s32.totalorder %s2900_s30, 15  ;;  %3113 = vset.pattern.permute.xlu0 %v3229_v3  ;;  %3107 = vset.pattern.permute.xlu1 %v3230_v4  ;;  %vm3232_vm0 = vmmov 0   ;;  %s3233_s13 = smov 126   ;;  %v273_v21 = vld [vmem:[%s4512_s2 + $0x8] sm:$0xff]  ;;  %v272_v35 = vld [vmem:[%s4512_s2] sm:$0xff]  ;;  %vm288_vm1 = vcmask 15360  }
  0x1f   : > { %v3308_v1 = vshrl.u32 %v517_v0, 7  ;;  %v1073_v2 = vand.u32 127, %v517_v0  ;;  %2977 = vmatprep.subr.bf16.mxu0 %v3231_v5  ;;  %2983 = vmatprep.subr.bf16.mxu1 %v3231_v5  ;;  %v3234_v53 = vmov 2   ;;  %s3235_s18 = smov 127   ;;  %s3236_s19 = smov 124   ;;  %vm1301_vm2 = vcmask 1043456  }
  0x20   : > { %s4520_s30 = smov (!%p258_p0, %s2900_s30), 15  ;;  %2979 = vmatprep.mubr.msk.bf16.mxu0 %vm3232_vm0, %v3231_v5  ;;  %2985 = vmatprep.mubr.msk.bf16.mxu1 %vm3232_vm0, %v3231_v5  ;;  %s2913_s20 = sld [smem:[#allocation2 + $0x100]]  ;;  %vm1202_vm3 = vcmask 1041409   ;;  %vm1204_vm4 = vcmask 1042434   ;;  %vm1206_vm5 = vcmask 1043459   ;;  %vm1208_vm6 = vcmask 1044484  }
  0x21   : > { %v526_v6 = vsub.s32 1, %v3308_v1  ;;  %v3316_v7 = vsub.s32 %v1073_v2, %v3308_v1  ;;  %s2901_s7 = sshll.u32 %s4520_s30, 2  ;;  %v533_v9 = vsub.s32 2, %v3308_v1  ;;  %v3369_v20 = vsub.s32 0, %v3308_v1  ;;  %s2912_s22 = sld [smem:[#allocation2 + $0x80]] }
  0x22   : > { %s3332_s12 = scalar_lea.vmem %s4510_s0, %s2901_s7  ;;  %v540_v24 = vsub.s32 3, %v3308_v1  ;;  %v547_v27 = vsub.s32 4, %v3308_v1  ;;  %v554_v28 = vsub.s32 5, %v3308_v1  ;;  %v561_v31 = vsub.s32 6, %v3308_v1  ;;  %s894_s23 = sld [smem:[#allocation2]] }
  0x23   : > { %v3334_v10 = vrot.slane %v278_v8, %v526_v6  ;;  %v3337_v11 = vld [vmem:[%s3332_s12 + $0x8] sm:$0xf]  ;;  %v3340_v12 = vld [vmem:[%s3332_s12] sm:$0xf]  ;;  %v3343_v13 = vld [vmem:[%s3332_s12 + $0xc] sm:$0xf]  ;;  %v3345_v14 = vrot.slane %v278_v8, %v533_v9  ;;  %v648_v22 = vrot.slane %v273_v21, %v526_v6  ;;  %v641_v23 = vrot.slane %v273_v21, %v3369_v20 }
  0x24   : > { %v3349_v15 = vcombine.low %v3337_v11, %v3337_v11  ;;  %v3353_v16 = vcombine.low %v3340_v12, %v3340_v12  ;;  %v3356_v17 = vld [vmem:[%s3332_s12 + $0x4] sm:$0xf]  ;;  %v3362_v18 = vcombine.low %v3343_v13, %v3343_v13  ;;  %v655_v25 = vrot.slane %v273_v21, %v533_v9  ;;  %s3703_s28 = sld [smem:[#allocation2 + $0x180]]  ;;  %s3237_s29 = smov 118  }
  0x25   : > { %v3366_v19 = vcombine.low %v3356_v17, %v3356_v17  ;;  %v662_v26 = vrot.slane %v273_v21, %v540_v24  ;;  %v669_v29 = vrot.slane %v273_v21, %v547_v27  ;;  %v676_v30 = vrot.slane %v273_v21, %v554_v28  ;;  %s3238_s8 = smov 120   ;;  %s2929_s9 = sld [smem:[#allocation2 + $0x101]] }
  0x26   : > { %389 = vrot.lane.b32.xlu1 %v3349_v15, %s3233_s13  ;;  %286 = vrot.lane.b32.xlu0 %v3353_v16, %s3233_s13  ;;  %v568_v32 = vsub.s32 7, %v3308_v1  ;;  %v683_v33 = vrot.slane %v273_v21, %v561_v31  ;;  %v527_v36 = vrot.slane %v272_v35, %v526_v6  ;;  %v520_v37 = vrot.slane %v272_v35, %v3369_v20  ;;  %s3242_s10 = smov 116   ;;  %s4155_s11 = sld [smem:[#allocation2 + $0x81]] }
  0x27   : > { %v541_v38 = vrot.slane %v272_v35, %v540_v24  ;;  %v534_v39 = vrot.slane %v272_v35, %v533_v9  ;;  %v555_v40 = vrot.slane %v272_v35, %v554_v28  ;;  %v548_v41 = vrot.slane %v272_v35, %v547_v27  ;;  %s4181_s17 = sld [smem:[#allocation2 + $0x181]] }
  0x28   : > { %v690_v34 = vrot.slane %v273_v21, %v568_v32  ;;  %v3387_v42 = vunpack.c.l.bf16 %v3340_v12  ;;  %v3390_v43 = vunpack.c.l.bf16 %v3356_v17  ;;  %v569_v44 = vrot.slane %v272_v35, %v568_v32 }
  0x29   : > { %v562_v45 = vrot.slane %v272_v35, %v561_v31  ;;  %v3393_v46 = vunpack.c.l.bf16 %v3337_v11  ;;  %v3396_v47 = vunpack.c.l.bf16 %v3343_v13  ;;  %vm1210_vm7 = vcmask 1045509  }
  0x2a   : > { %440 = vrot.lane.b32.xlu1 %v3362_v18, %s3233_s13  ;;  %338 = vrot.lane.b32.xlu0 %v3366_v19, %s3233_s13  ;;  %v3108_v48 = vpack.i.bf16 %v3390_v43, %v3387_v42  ;;  %vm1212_vm8 = vcmask 1046534   ;;  %vm1214_vm9 = vcmask 1047559   ;;  %vm1251_vm10 = vcmask 64512  }
  0x2b   : > { %v3119_v49 = vpack.i.bf16 %v3396_v47, %v3393_v46  ;;  %vm1553_vm11 = vcmask 7168   ;;  %vm1562_vm12 = vcmask 23552   ;;  %vm1603_vm13 = vcmask 27648  }
  0x2c   : > { %vm2820_vm14 = vcmask 60448  }
  0x2e   : > { %650 = vbcast.lane.b32.xlu1 %v648_v22, 256  ;;  %643 = vbcast.lane.b32.xlu0 %v641_v23, 256 }
  0x32   : > { %657 = vbcast.lane.b32.xlu0 %v655_v25, 256  ;;  %664 = vbcast.lane.b32.xlu1 %v662_v26, 256 }
  0x36   : > { %671 = vbcast.lane.b32.xlu0 %v669_v29, 256  ;;  %678 = vbcast.lane.b32.xlu1 %v676_v30, 256 }
  0x3a   : > { %685 = vbcast.lane.b32.xlu0 %v683_v33, 256  ;;  %692 = vbcast.lane.b32.xlu1 %v690_v34, 256 }
  0x3e   : > { %529 = vbcast.lane.b32.xlu1 %v527_v36, 256  ;;  %522 = vbcast.lane.b32.xlu0 %v520_v37, 256 }
  0x42   : > { %543 = vbcast.lane.b32.xlu1 %v541_v38, 256  ;;  %536 = vbcast.lane.b32.xlu0 %v534_v39, 256 }
  0x46   : > { %557 = vbcast.lane.b32.xlu1 %v555_v40, 256  ;;  %550 = vbcast.lane.b32.xlu0 %v548_v41, 256 }
  0x4a   : > { %571 = vbcast.lane.b32.xlu1 %v569_v44, 256  ;;  %564 = vbcast.lane.b32.xlu0 %v562_v45, 256 }
  0x4e   : > { %3109 = vperm.xlu1 %3107, %v3108_v48   ;;  %3115 = vperm.xlu0 %3113, %v3108_v48  }
  0x52   : > { %3120 = vperm.xlu1 %3107, %v3119_v49   ;;  %3125 = vperm.xlu0 %3113, %v3119_v49  }
  0x56   : > { %3130 = vset.pattern.permute.xlu1 %v3234_v53  ;;  %3129 = vset.pattern.permute.xlu0 %v3234_v53 }
  0x98   : > { %v390_v50 = vpop.permute.xlu1 %389  ;;  %v287_v51 = vpop.permute.xlu0 %286 }
  0x99   : > { %v293_v52 = vsel %vm288_vm1, %v287_v51, 0  ;;  %v395_v59 = vsel %vm288_vm1, %v390_v50, 0 }
  0x9a   : > { %2978 = vmatpush3.bf16.xpose.msra.mxu0 %v293_v52 }
  0x9b   : > { %2989 = vmatprep.subr.bf16.mxu0 %v3231_v5 }
  0x9c   : > { %v441_v54 = vpop.permute.xlu1 %440  ;;  %v339_v55 = vpop.permute.xlu0 %338 }
  0x9d   : > { %v344_v56 = vsel %vm288_vm1, %v339_v55, 0  ;;  %v446_v63 = vsel %vm288_vm1, %v441_v54, 0 }
  0x9e   : > { %2984 = vmatpush3.bf16.xpose.msra.mxu1 %v344_v56 }
  0x9f   : > { %2995 = vmatprep.subr.bf16.mxu1 %v3231_v5 }
  0xa0   : > { %v3406_v57 = vpop.permute.xlu1 %650  ;;  %v3408_v58 = vpop.permute.xlu0 %643 }
  0xa1   : > { %2980 = vmatmul.mubr.msk.bf16.vlgmr.msra.gmra.mrb[0].mxu0 %vm288_vm1, %v3340_v12  ;;  %v703_v60 = vmul.f32 %v3406_v57, %v3387_v42  ;;  %v702_v61 = vmul.f32 %v3408_v58, %v3387_v42  ;;  %v711_v0 = vmul.f32 %v3406_v57, %v3390_v43  ;;  %v710_v1 = vmul.f32 %v3408_v58, %v3390_v43 }
  0xa2   : > { %2990 = vmatpush3.bf16.xpose.msra.mxu0 %v395_v59  ;;  %2991 = vmatprep.mubr.msk.bf16.mxu0 %vm3232_vm0, %v3231_v5  ;;  %v719_v28 = vmul.f32 %v3406_v57, %v3393_v46  ;;  %v718_v29 = vmul.f32 %v3408_v58, %v3393_v46  ;;  %v727_v30 = vmul.f32 %v3406_v57, %v3396_v47 }
  0xa3   : > { %768 = vrot.lane.b32.xlu1 %v703_v60, %s3235_s18  ;;  %766 = vrot.lane.b32.xlu0 %v702_v61, %s3235_s18  ;;  %v726_v31 = vmul.f32 %v3408_v58, %v3396_v47 }
  0xa4   : > { %v3421_v62 = vpop.permute.xlu0 %657  ;;  %3001 = vmatprep.subr.bf16.mxu0 %v3231_v5  ;;  %v3439_v4 = vpop.permute.xlu1 %664 }
  0xa5   : > { %2986 = vmatmul.mubr.msk.bf16.vlgmr.msra.gmra.mrb[0].mxu1 %vm288_vm1, %v3356_v17  ;;  %v712_v2 = vmul.f32 %v3421_v62, %v3390_v43  ;;  %v704_v3 = vmul.f32 %v3421_v62, %v3387_v42  ;;  %v705_v6 = vmul.f32 %v3439_v4, %v3387_v42  ;;  %v713_v8 = vmul.f32 %v3439_v4, %v3390_v43 }
  0xa6   : > { %2996 = vmatpush3.bf16.xpose.msra.mxu1 %v446_v63  ;;  %2997 = vmatprep.mubr.msk.bf16.mxu1 %vm3232_vm0, %v3231_v5  ;;  %v728_v32 = vmul.f32 %v3421_v62, %v3396_v47  ;;  %v720_v33 = vmul.f32 %v3421_v62, %v3393_v46  ;;  %v729_v34 = vmul.f32 %v3439_v4, %v3396_v47  ;;  %v3570_v63 = vstv %s2913_s20 }
  0xa7   : > { %784 = vrot.lane.b32.xlu1 %v711_v0, %s3235_s18  ;;  %782 = vrot.lane.b32.xlu0 %v710_v1, %s3235_s18  ;;  %v721_v35 = vmul.f32 %v3439_v4, %v3393_v46 }
  0xa8   : > { %3007 = vmatprep.subr.bf16.mxu1 %v3231_v5  ;;  %v3452_v9 = vpop.permute.xlu0 %671  ;;  %v3464_v17 = vpop.permute.xlu1 %678 }
  0xa9   : > { %2992 = vmatmul.mubr.msk.bf16.vlgmr.msra.gmra.mrb[4].mxu0 %vm288_vm1, %v3337_v11  ;;  %v714_v11 = vmul.f32 %v3452_v9, %v3390_v43  ;;  %v706_v12 = vmul.f32 %v3452_v9, %v3387_v42  ;;  %v715_v21 = vmul.f32 %v3464_v17, %v3390_v43  ;;  %v730_v36 = vmul.f32 %v3452_v9, %v3396_v47 }
  0xaa   : > { %3003 = vmatprep.mubr.msk.bf16.mxu0 %vm3232_vm0, %v3231_v5  ;;  %v722_v37 = vmul.f32 %v3452_v9, %v3393_v46  ;;  %v731_v38 = vmul.f32 %v3464_v17, %v3396_v47  ;;  %v723_v39 = vmul.f32 %v3464_v17, %v3393_v46 }
  0xab   : > { %786 = vrot.lane.b32.xlu0 %v712_v2, %s3235_s18  ;;  %770 = vrot.lane.b32.xlu1 %v704_v3, %s3235_s18 }
  0xac   : > { %v3472_v22 = vpop.permute.xlu0 %685  ;;  %v3480_v25 = vpop.permute.xlu1 %692 }
  0xad   : > { %2998 = vmatmul.mubr.msk.bf16.vlgmr.msra.gmra.mrb[4].mxu1 %vm288_vm1, %v3343_v13  ;;  %v707_v13 = vmul.f32 %v3464_v17, %v3387_v42  ;;  %v716_v23 = vmul.f32 %v3472_v22, %v3390_v43  ;;  %v708_v24 = vmul.f32 %v3472_v22, %v3387_v42  ;;  %v717_v26 = vmul.f32 %v3480_v25, %v3390_v43 }
  0xae   : > { %3009 = vmatprep.mubr.msk.bf16.mxu1 %vm3232_vm0, %v3231_v5  ;;  %v709_v27 = vmul.f32 %v3480_v25, %v3387_v42  ;;  %v732_v40 = vmul.f32 %v3472_v22, %v3396_v47  ;;  %v724_v41 = vmul.f32 %v3472_v22, %v3393_v46  ;;  %v725_v44 = vmul.f32 %v3480_v25, %v3393_v46 }
  0xaf   : > { %772 = vrot.lane.b32.xlu0 %v705_v6, %s3235_s18  ;;  %788 = vrot.lane.b32.xlu1 %v713_v8, %s3235_s18  ;;  %v733_v45 = vmul.f32 %v3480_v25, %v3396_v47 }
  0xb0   : > { %v3542_v48 = vpop.permute.xlu1 %529  ;;  %v3544_v49 = vpop.permute.xlu0 %522 }
  0xb1   : > { %v582_v60 = vmul.f32 %v3542_v48, %v3387_v42  ;;  %v581_v61 = vmul.f32 %v3544_v49, %v3387_v42 }
  0xb3   : > { %790 = vrot.lane.b32.xlu0 %v714_v11, %s3235_s18  ;;  %774 = vrot.lane.b32.xlu1 %v706_v12, %s3235_s18  ;;  %v590_v11 = vmul.f32 %v3542_v48, %v3390_v43  ;;  %v589_v12 = vmul.f32 %v3544_v49, %v3390_v43 }
  0xb4   : > { %v3546_v50 = vpop.permute.xlu1 %543  ;;  %v3548_v51 = vpop.permute.xlu0 %536 }
  0xb7   : > { %776 = vrot.lane.b32.xlu0 %v707_v13, %s3235_s18  ;;  %792 = vrot.lane.b32.xlu1 %v715_v21, %s3235_s18 }
  0xb8   : > { %v3550_v52 = vpop.permute.xlu1 %557 }
  0xbb   : > { %794 = vrot.lane.b32.xlu1 %v716_v23, %s3235_s18  ;;  %778 = vrot.lane.b32.xlu0 %v708_v24, %s3235_s18 }
  0xbc   : > { %v3554_v53 = vpop.permute.xlu1 %571 }
  0xbf   : > { %796 = vrot.lane.b32.xlu1 %v717_v26, %s3235_s18  ;;  %780 = vrot.lane.b32.xlu0 %v709_v27, %s3235_s18 }
  0xc3   : > { %800 = vrot.lane.b32.xlu1 %v719_v28, %s3235_s18  ;;  %798 = vrot.lane.b32.xlu0 %v718_v29, %s3235_s18  ;;  %v583_v28 = vmul.f32 %v3548_v51, %v3387_v42 }
  0xc7   : > { %816 = vrot.lane.b32.xlu1 %v727_v30, %s3235_s18  ;;  %814 = vrot.lane.b32.xlu0 %v726_v31, %s3235_s18 }
  0xcb   : > { %818 = vrot.lane.b32.xlu1 %v728_v32, %s3235_s18  ;;  %802 = vrot.lane.b32.xlu0 %v720_v33, %s3235_s18  ;;  %v591_v32 = vmul.f32 %v3548_v51, %v3390_v43 }
  0xcd   : > { %v3558_v55 = vpop.permute.xlu1 %3109 }
  0xcf   : > { %820 = vrot.lane.b32.xlu1 %v729_v34, %s3235_s18  ;;  %804 = vrot.lane.b32.xlu0 %v721_v35, %s3235_s18  ;;  %v584_v35 = vmul.f32 %v3546_v50, %v3387_v42 }
  0xd3   : > { %822 = vrot.lane.b32.xlu1 %v730_v36, %s3235_s18  ;;  %806 = vrot.lane.b32.xlu0 %v722_v37, %s3235_s18 }
  0xd7   : > { %824 = vrot.lane.b32.xlu1 %v731_v38, %s3235_s18  ;;  %808 = vrot.lane.b32.xlu0 %v723_v39, %s3235_s18  ;;  %v592_v38 = vmul.f32 %v3546_v50, %v3390_v43 }
  0xdb   : > { %826 = vrot.lane.b32.xlu1 %v732_v40, %s3235_s18  ;;  %810 = vrot.lane.b32.xlu0 %v724_v41, %s3235_s18 }
  0xdf   : > { %1345 = vrot.lane.b32.xlu1 %v3366_v19, %s3236_s19  ;;  %812 = vrot.lane.b32.xlu0 %v725_v44, %s3235_s18  ;;  %v3552_v19 = vpop.permute.xlu0 %550 }
  0xe3   : > { %828 = vrot.lane.b32.xlu1 %v733_v45, %s3235_s18  ;;  %1296 = vrot.lane.b32.xlu0 %v3353_v16, %s3236_s19  ;;  %v3556_v54 = vpop.permute.xlu0 %564  ;;  %v3562_v16 = vpop.permute.xlu1 %3120  ;;  %v593_v45 = vmul.f32 %v3552_v19, %v3390_v43 }
  0xe7   : > { %v3560_v56 = vpop.permute.xlu0 %3115 }
  0xeb   : > { %v3564_v59 = vpop.permute.xlu0 %3125 }
 0x115   : > { %v769_v0 = vpop.permute.xlu1 %768  ;;  %v767_v1 = vpop.permute.xlu0 %766 }
 0x116   : > { %v863_v2 = vadd.f32 %v769_v0, %v582_v60  ;;  %v862_v3 = vadd.f32 %v767_v1, %v581_v61  ;;  %v585_v0 = vmul.f32 %v3552_v19, %v3387_v42 }
 0x118   : > { %v913_v6 = vmul.f32 %v3570_v63, %v863_v2  ;;  %v912_v8 = vmul.f32 %v3570_v63, %v862_v3 }
 0x119   : > { %v785_v13 = vpop.permute.xlu1 %784  ;;  %v783_v21 = vpop.permute.xlu0 %782 }
 0x11a   : > { %v871_v23 = vadd.f32 %v785_v13, %v590_v11  ;;  %v870_v24 = vadd.f32 %v783_v21, %v589_v12  ;;  %980 = vperm.xlu1 %3130, %v913_v6   ;;  %977 = vperm.xlu0 %3129, %v912_v8   ;;  %v594_v8 = vmul.f32 %v3550_v52, %v3390_v43 }
 0x11b   : > { %v586_v21 = vmul.f32 %v3550_v52, %v3387_v42 }
 0x11c   : > { %v921_v26 = vmul.f32 %v3570_v63, %v871_v23  ;;  %v920_v27 = vmul.f32 %v3570_v63, %v870_v24 }
 0x11d   : > { %v771_v29 = vpop.permute.xlu1 %770  ;;  %v787_v30 = vpop.permute.xlu0 %786 }
 0x11e   : > { %v864_v31 = vadd.f32 %v771_v29, %v583_v28  ;;  %1004 = vperm.xlu0 %3129, %v921_v26   ;;  %1001 = vperm.xlu1 %3130, %v920_v27   ;;  %v872_v34 = vadd.f32 %v787_v30, %v591_v32  ;;  %v595_v27 = vmul.f32 %v3556_v54, %v3390_v43 }
 0x120   : > { %v914_v33 = vmul.f32 %v3570_v63, %v864_v31  ;;  %v922_v40 = vmul.f32 %v3570_v63, %v872_v34  ;;  %v587_v31 = vmul.f32 %v3556_v54, %v3387_v42 }
 0x121   : > { %v789_v36 = vpop.permute.xlu1 %788  ;;  %v773_v37 = vpop.permute.xlu0 %772 }
 0x122   : > { %v865_v39 = vadd.f32 %v773_v37, %v584_v35  ;;  %983 = vperm.xlu1 %3130, %v914_v33   ;;  %v873_v41 = vadd.f32 %v789_v36, %v592_v38  ;;  %v596_v35 = vmul.f32 %v3554_v53, %v3390_v43  ;;  %v597_v43 = vmul.f32 %v3544_v49, %v3393_v46 }
 0x124   : > { %v915_v44 = vmul.f32 %v3570_v63, %v865_v39  ;;  %v923_v2 = vmul.f32 %v3570_v63, %v873_v41  ;;  %v588_v39 = vmul.f32 %v3554_v53, %v3387_v42 }
 0x125   : > { %v775_v60 = vpop.permute.xlu1 %774  ;;  %v791_v61 = vpop.permute.xlu0 %790 }
 0x126   : > { %v874_v1 = vadd.f32 %v791_v61, %v593_v45  ;;  %1007 = vperm.xlu1 %3130, %v922_v40   ;;  %986 = vperm.xlu0 %3129, %v915_v44   ;;  %v866_v3 = vadd.f32 %v775_v60, %v585_v0  ;;  %v598_v45 = vmul.f32 %v3542_v48, %v3393_v46 }
 0x128   : > { %v924_v6 = vmul.f32 %v3570_v63, %v874_v1  ;;  %v916_v23 = vmul.f32 %v3570_v63, %v866_v3  ;;  %v606_v3 = vmul.f32 %v3542_v48, %v3396_v47 }
 0x129   : > { %v793_v11 = vpop.permute.xlu1 %792  ;;  %v777_v12 = vpop.permute.xlu0 %776 }
 0x12a   : > { %v875_v13 = vadd.f32 %v793_v11, %v594_v8  ;;  %1010 = vperm.xlu1 %3130, %v923_v2   ;;  %1013 = vperm.xlu0 %3129, %v924_v6   ;;  %v867_v26 = vadd.f32 %v777_v12, %v586_v21  ;;  %v605_v12 = vmul.f32 %v3544_v49, %v3396_v47 }
 0x12c   : > { %v925_v24 = vmul.f32 %v3570_v63, %v875_v13  ;;  %v917_v32 = vmul.f32 %v3570_v63, %v867_v26 }
 0x12d   : > { %v795_v28 = vpop.permute.xlu1 %794  ;;  %v779_v29 = vpop.permute.xlu0 %778 }
 0x12e   : > { %v876_v30 = vadd.f32 %v795_v28, %v595_v27  ;;  %989 = vperm.xlu1 %3130, %v916_v23   ;;  %1016 = vperm.xlu0 %3129, %v925_v24   ;;  %v868_v34 = vadd.f32 %v779_v29, %v587_v31  ;;  %v599_v27 = vmul.f32 %v3548_v51, %v3393_v46 }
 0x130   : > { %v926_v33 = vmul.f32 %v3570_v63, %v876_v30  ;;  %v918_v40 = vmul.f32 %v3570_v63, %v868_v34  ;;  %v600_v30 = vmul.f32 %v3546_v50, %v3393_v46 }
 0x131   : > { %v797_v36 = vpop.permute.xlu1 %796  ;;  %v781_v37 = vpop.permute.xlu0 %780 }
 0x132   : > { %v877_v38 = vadd.f32 %v797_v36, %v596_v35  ;;  %1019 = vperm.xlu0 %3129, %v926_v33   ;;  %992 = vperm.xlu1 %3130, %v917_v32   ;;  %v869_v44 = vadd.f32 %v781_v37, %v588_v39  ;;  %v607_v33 = vmul.f32 %v3548_v51, %v3396_v47 }
 0x134   : > { %v927_v41 = vmul.f32 %v3570_v63, %v877_v38  ;;  %v919_v42 = vmul.f32 %v3570_v63, %v869_v44  ;;  %v609_v38 = vmul.f32 %v3552_v19, %v3396_v47 }
 0x135   : > { %v801_v60 = vpop.permute.xlu1 %800  ;;  %v799_v61 = vpop.permute.xlu0 %798 }
 0x136   : > { %v879_v0 = vadd.f32 %v801_v60, %v598_v45  ;;  %1022 = vperm.xlu0 %3129, %v927_v41   ;;  %995 = vperm.xlu1 %3130, %v918_v40   ;;  %v878_v2 = vadd.f32 %v799_v61, %v597_v43  ;;  %v608_v41 = vmul.f32 %v3546_v50, %v3396_v47 }
 0x138   : > { %v929_v1 = vmul.f32 %v3570_v63, %v879_v0  ;;  %v928_v13 = vmul.f32 %v3570_v63, %v878_v2  ;;  %v610_v0 = vmul.f32 %v3550_v52, %v3396_v47 }
 0x139   : > { %v817_v6 = vpop.permute.xlu1 %816  ;;  %v815_v8 = vpop.permute.xlu0 %814 }
 0x13a   : > { %v887_v11 = vadd.f32 %v817_v6, %v606_v3  ;;  %1028 = vperm.xlu0 %3129, %v929_v1   ;;  %998 = vperm.xlu1 %3130, %v919_v42   ;;  %v886_v23 = vadd.f32 %v815_v8, %v605_v12  ;;  %v601_v1 = vmul.f32 %v3552_v19, %v3393_v46 }
 0x13c   : > { %v937_v21 = vmul.f32 %v3570_v63, %v887_v11  ;;  %v936_v28 = vmul.f32 %v3570_v63, %v886_v23  ;;  %v611_v11 = vmul.f32 %v3556_v54, %v3396_v47 }
 0x13d   : > { %v819_v24 = vpop.permute.xlu1 %818  ;;  %v803_v26 = vpop.permute.xlu0 %802 }
 0x13e   : > { %1052 = vperm.xlu0 %3129, %v937_v21   ;;  %1025 = vperm.xlu1 %3130, %v928_v13   ;;  %v880_v29 = vadd.f32 %v803_v26, %v599_v27  ;;  %v888_v35 = vadd.f32 %v819_v24, %v607_v33  ;;  %v602_v21 = vmul.f32 %v3550_v52, %v3393_v46 }
 0x140   : > { %v930_v36 = vmul.f32 %v3570_v63, %v880_v29  ;;  %v938_v45 = vmul.f32 %v3570_v63, %v888_v35 }
 0x141   : > { %v821_v31 = vpop.permute.xlu1 %820  ;;  %v805_v32 = vpop.permute.xlu0 %804 }
 0x142   : > { %v881_v34 = vadd.f32 %v805_v32, %v600_v30  ;;  %1049 = vperm.xlu1 %3130, %v936_v28   ;;  %v889_v60 = vadd.f32 %v821_v31, %v608_v41  ;;  %v603_v30 = vmul.f32 %v3556_v54, %v3393_v46 }
 0x144   : > { %v931_v37 = vmul.f32 %v3570_v63, %v881_v34  ;;  %v939_v3 = vmul.f32 %v3570_v63, %v889_v60  ;;  %v612_v34 = vmul.f32 %v3554_v53, %v3396_v47 }
 0x145   : > { %v823_v39 = vpop.permute.xlu1 %822  ;;  %v807_v40 = vpop.permute.xlu0 %806 }
 0x146   : > { %v890_v44 = vadd.f32 %v823_v39, %v609_v38  ;;  %1031 = vperm.xlu1 %3130, %v930_v36   ;;  %1034 = vperm.xlu0 %3129, %v931_v37   ;;  %v882_v6 = vadd.f32 %v807_v40, %v601_v1  ;;  %v604_v37 = vmul.f32 %v3554_v53, %v3393_v46 }
 0x148   : > { %v940_v61 = vmul.f32 %v3570_v63, %v890_v44  ;;  %v932_v24 = vmul.f32 %v3570_v63, %v882_v6 }
 0x149   : > { %v825_v43 = vpop.permute.xlu1 %824  ;;  %v809_v42 = vpop.permute.xlu0 %808 }
 0x14a   : > { %v891_v2 = vadd.f32 %v825_v43, %v610_v0  ;;  %1055 = vperm.xlu1 %3130, %v938_v45   ;;  %1061 = vperm.xlu0 %3129, %v940_v61   ;;  %v883_v26 = vadd.f32 %v809_v42, %v602_v21 }
 0x14c   : > { %v941_v8 = vmul.f32 %v3570_v63, %v891_v2  ;;  %v933_v32 = vmul.f32 %v3570_v63, %v883_v26 }
 0x14d   : > { %v827_v12 = vpop.permute.xlu1 %826  ;;  %v811_v13 = vpop.permute.xlu0 %810 }
 0x14e   : > { %v892_v23 = vadd.f32 %v827_v12, %v611_v11  ;;  %1058 = vperm.xlu1 %3130, %v939_v3   ;;  %1064 = vperm.xlu0 %3129, %v941_v8   ;;  %v884_v33 = vadd.f32 %v811_v13, %v603_v30  ;;  %v3118_v30 = vunpack.i.h.bf16 %v3560_v56 }
 0x150   : > { %v942_v27 = vmul.f32 %v3570_v63, %v892_v23  ;;  %v934_v40 = vmul.f32 %v3570_v63, %v884_v33 }
 0x151   : > { %v1346_v28 = vpop.permute.xlu1 %1345  ;;  %v813_v29 = vpop.permute.xlu0 %812 }
 0x152   : > { %v1351_v31 = vsel %vm1301_vm2, %v1346_v28, 0  ;;  %1067 = vperm.xlu0 %3129, %v942_v27   ;;  %1037 = vperm.xlu1 %3130, %v932_v24   ;;  %v885_v41 = vadd.f32 %v813_v29, %v604_v37  ;;  %v3112_v29 = vunpack.i.h.bf16 %v3558_v55 }
 0x153   : > { %3008 = vmatpush3.bf16.msra.mxu1 %v1351_v31  ;;  %v3681_v31 = vld [vmem:[%s4511_s1] sm:$0xff] }
 0x154   : > { %3019 = vmatprep.subr.bf16.mxu1 %v3231_v5  ;;  %v935_v47 = vmul.f32 %v3570_v63, %v885_v41  ;;  %v513_v37 = vmul.f32 %v3112_v29, %v3681_v31 }
 0x155   : > { %v829_v35 = vpop.permute.xlu1 %828  ;;  %v1297_v36 = vpop.permute.xlu0 %1296 }
 0x156   : > { %v893_v38 = vadd.f32 %v829_v35, %v612_v34  ;;  %1040 = vperm.xlu1 %3130, %v933_v32   ;;  %v1303_v39 = vsel %vm1301_vm2, %v1297_v36, 0  ;;  %v3686_v32 = vld [vmem:[%s4511_s1 + $0x8] sm:$0xff]  ;;  %v3111_v35 = vunpack.i.l.bf16 %v3558_v55  ;;  %v3117_v36 = vunpack.i.l.bf16 %v3560_v56 }
 0x157   : > { %3002 = vmatpush3.bf16.msra.mxu0 %v1303_v39  ;;  %v3700_v56 = vstv %s894_s23 }
 0x158   : > { %v943_v44 = vmul.f32 %v3570_v63, %v893_v38  ;;  %3013 = vmatprep.subr.bf16.mxu0 %v3231_v5  ;;  %v630_v38 = vmul.f32 %v3118_v30, %v3686_v32  ;;  %v629_v55 = vmul.f32 %v3117_v36, %v3686_v32 }
 0x15a   : > { %1070 = vperm.xlu0 %3129, %v943_v44   ;;  %1043 = vperm.xlu1 %3130, %v934_v40  }
 0x15e   : > { %1046 = vperm.xlu1 %3130, %v935_v47  }
 0x162   : > { %1393 = vrot.lane.b32.xlu1 %v3349_v15, %s3236_s19 }
 0x174   : > { %v3670_v46 = vpop.f32.mrb[0].mxu0 }
 0x175   : > { %v2981_v45 = vpop.f32.mrb[1].mxu0 }
 0x176   : > { %v332_v60 = vpop.f32.mrb[2].mxu0 }
 0x177   : > { %v2982_v61 = vpop.f32.mrb[3].mxu0  ;;  %v512_v60 = vmul.f32 %v3111_v35, %v3681_v31 }
 0x178   : > { %v380_v0 = vpop.f32.mrb[0].mxu1  ;;  %v3698_v61 = vstv %s2912_s22 }
 0x179   : > { %v2987_v43 = vpop.f32.mrb[1].mxu1  ;;  %v633_v30 = vadd.f32 %v629_v55, %v512_v60 }
 0x17a   : > { %v383_v42 = vpop.f32.mrb[2].mxu1  ;;  %v634_v43 = vadd.f32 %v630_v38, %v513_v37 }
 0x17b   : > { %v2988_v1 = vpop.f32.mrb[3].mxu1  ;;  %v902_v60 = vmul.f32 %v3698_v61, %v633_v30 }
 0x17c   : > { %v3672_v2 = vpop.f32.mrb[4].mxu0 }
 0x17d   : > { %v2993_v3 = vpop.f32.mrb[5].mxu0 }
 0x17e   : > { %v434_v6 = vpop.f32.mrb[6].mxu0 }
 0x17f   : > { %v2994_v8 = vpop.f32.mrb[7].mxu0 }
 0x180   : > { %v3674_v11 = vpop.f32.mrb[4].mxu1 }
 0x181   : > { %v2999_v63 = vpop.f32.mrb[5].mxu1 }
 0x182   : > { %v485_v12 = vpop.f32.mrb[6].mxu1 }
 0x183   : > { %v3000_v13 = vpop.f32.mrb[7].mxu1 }
 0x199   : > { %v981_v15 = vpop.permute.xlu1 %980  ;;  %v978_v21 = vpop.permute.xlu0 %977 }
 0x19a   : > { %v1081_v63 = vrot.slane %v981_v15, %v3316_v7  ;;  %v1077_v12 = vrot.slane %v978_v21, %v3316_v7  ;;  %v896_v15 = vmul.f32 %v3700_v56, %v3670_v46 }
 0x19d   : > { %v1002_v23 = vpop.permute.xlu1 %1001  ;;  %v1005_v24 = vpop.permute.xlu0 %1004 }
 0x19e   : > { %v1109_v39 = vrot.slane %v1002_v23, %v3316_v7  ;;  %v1113_v40 = vrot.slane %v1005_v24, %v3316_v7  ;;  %v897_v24 = vmul.f32 %v3700_v56, %v380_v0 }
 0x1a0   : > { %v1216_v42 = vsel %vm1202_vm3, %v1113_v40, %v1109_v39 }
 0x1a1   : > { %v984_v26 = vpop.permute.xlu1 %983 }
 0x1a5   : > { %v1008_v27 = vpop.permute.xlu1 %1007  ;;  %v987_v28 = vpop.permute.xlu0 %986 }
 0x1a6   : > { %v1117_v41 = vrot.slane %v1008_v27, %v3316_v7  ;;  %v1085_v27 = vrot.slane %v984_v26, %v3316_v7  ;;  %v1203_v26 = vsel %vm1202_vm3, %v1081_v63, %v1077_v12 }
 0x1a8   : > { %v1217_v1 = vsel %vm1204_vm4, %v1117_v41, %v1216_v42  ;;  %v1205_v40 = vsel %vm1204_vm4, %v1085_v27, %v1203_v26 }
 0x1a9   : > { %v1011_v33 = vpop.permute.xlu1 %1010  ;;  %v1014_v34 = vpop.permute.xlu0 %1013 }
 0x1aa   : > { %v1121_v45 = vrot.slane %v1011_v33, %v3316_v7  ;;  %v1125_v3 = vrot.slane %v1014_v34, %v3316_v7  ;;  %v903_v33 = vmul.f32 %v3698_v61, %v634_v43  ;;  %v1089_v34 = vrot.slane %v987_v28, %v3316_v7 }
 0x1ac   : > { %v1218_v13 = vsel %vm1206_vm5, %v1121_v45, %v1217_v1  ;;  %v907_v39 = vadd.f32 %v903_v33, %v897_v24  ;;  %v3730_v45 = vstv %s3703_s28 }
 0x1ad   : > { %v990_v44 = vpop.permute.xlu1 %989  ;;  %v1017_v47 = vpop.permute.xlu0 %1016  ;;  %v1219_v21 = vsel %vm1208_vm6, %v1125_v3, %v1218_v13 }
 0x1ae   : > { %v1129_v23 = vrot.slane %v1017_v47, %v3316_v7  ;;  %v1093_v35 = vrot.slane %v990_v44, %v3316_v7  ;;  %v1207_v44 = vsel %vm1206_vm5, %v1089_v34, %v1205_v40  ;;  %v3127_v40 = vunpack.i.l.bf16 %v3564_v59 }
 0x1b0   : > { %v1220_v37 = vsel %vm1210_vm7, %v1129_v23, %v1219_v21  ;;  %v1209_v55 = vsel %vm1208_vm6, %v1093_v35, %v1207_v44 }
 0x1b1   : > { %v993_v6 = vpop.permute.xlu1 %992  ;;  %v1020_v8 = vpop.permute.xlu0 %1019 }
 0x1b2   : > { %v1133_v29 = vrot.slane %v1020_v8, %v3316_v7  ;;  %v1097_v38 = vrot.slane %v993_v6, %v3316_v7  ;;  %v906_v6 = vadd.f32 %v902_v60, %v896_v15 }
 0x1b4   : > { %v1221_v46 = vsel %vm1212_vm8, %v1133_v29, %v1220_v37  ;;  %v1211_v1 = vsel %vm1210_vm7, %v1097_v38, %v1209_v55 }
 0x1b5   : > { %v996_v0 = vpop.permute.xlu1 %995  ;;  %v1023_v36 = vpop.permute.xlu0 %1022 }
 0x1b6   : > { %v1137_v28 = vrot.slane %v1023_v36, %v3316_v7  ;;  %v1101_v41 = vrot.slane %v996_v0, %v3316_v7  ;;  %v3749_v36 = vld [vmem:[%s3332_s12] sm:$0xf] }
 0x1b7   : > { %v3753_v26 = vcombine.low %v3749_v36, %v3749_v36 }
 0x1b8   : > { %v1222_v47 = vsel %vm1214_vm9, %v1137_v28, %v1221_v46  ;;  %v1213_v8 = vsel %vm1212_vm8, %v1101_v41, %v1211_v1 }
 0x1b9   : > { %v999_v43 = vpop.permute.xlu1 %998  ;;  %v1242_v42 = vadd.f32 %v1222_v47, %v907_v39  ;;  %v1029_v33 = vpop.permute.xlu0 %1028  ;;  %v3122_v39 = vunpack.i.l.bf16 %v3562_v16 }
 0x1ba   : > { %v1105_v3 = vrot.slane %v999_v43, %v3316_v7  ;;  %v3123_v43 = vunpack.i.h.bf16 %v3562_v16 }
 0x1bb   : > { %v3738_v63 = vadd.f32 %v3730_v45, %v1242_v42  ;;  %v1145_v42 = vrot.slane %v1029_v33, %v3316_v7 }
 0x1bc   : > { %v1215_v12 = vsel %vm1214_vm9, %v1105_v3, %v1213_v8  ;;  %v514_v3 = vmul.f32 %v3122_v39, %v3681_v31  ;;  %v631_v8 = vmul.f32 %v3127_v40, %v3686_v32 }
 0x1bd   : > { %v1026_v13 = vpop.permute.xlu1 %1025  ;;  %v1255_v23 = vsel %vm1251_vm10, %v3738_v63, -inf  ;;  %v1241_v24 = vadd.f32 %v1215_v12, %v906_v6  ;;  %v1053_v21 = vpop.permute.xlu0 %1052  ;;  %v3128_v6 = vunpack.i.h.bf16 %v3564_v59 }
 0x1be   : > { %1256 = vmax.xlane.f32.xlu0 %v1255_v23  ;;  %v1141_v44 = vrot.slane %v1026_v13, %v3316_v7 }
 0x1bf   : > { %v3744_v27 = vadd.f32 %v3730_v45, %v1241_v24 }
 0x1c0   : > { %v1223_v12 = vsel %vm1202_vm3, %v1145_v42, %v1141_v44 }
 0x1c1   : > { %v1050_v29 = vpop.permute.xlu1 %1049  ;;  %v1252_v30 = vsel %vm1251_vm10, %v3744_v27, -inf }
 0x1c2   : > { %1253 = vmax.xlane.f32.xlu1 %v1252_v30  ;;  %v1173_v47 = vrot.slane %v1050_v29, %v3316_v7 }
 0x1c5   : > { %v1032_v34 = vpop.permute.xlu1 %1031  ;;  %v1035_v0 = vpop.permute.xlu0 %1034 }
 0x1c6   : > { %v1149_v60 = vrot.slane %v1032_v34, %v3316_v7  ;;  %v1153_v23 = vrot.slane %v1035_v0, %v3316_v7  ;;  %v515_v34 = vmul.f32 %v3123_v43, %v3681_v31 }
 0x1c8   : > { %v1224_v16 = vsel %vm1204_vm4, %v1149_v60, %v1223_v12 }
 0x1c9   : > { %v1056_v15 = vpop.permute.xlu1 %1055  ;;  %v1062_v38 = vpop.permute.xlu0 %1061  ;;  %v1225_v40 = vsel %vm1206_vm5, %v1153_v23, %v1224_v16 }
 0x1ca   : > { %v1181_v55 = vrot.slane %v1056_v15, %v3316_v7  ;;  %v1189_v39 = vrot.slane %v1062_v38, %v3316_v7 }
 0x1cd   : > { %v1059_v35 = vpop.permute.xlu1 %1058  ;;  %v1065_v46 = vpop.permute.xlu0 %1064 }
 0x1ce   : > { %v1185_v1 = vrot.slane %v1059_v35, %v3316_v7  ;;  %v635_v35 = vadd.f32 %v631_v8, %v514_v3 }
 0x1d0   : > { %v904_v38 = vmul.f32 %v3698_v61, %v635_v35 }
 0x1d1   : > { %v1038_v37 = vpop.permute.xlu1 %1037  ;;  %v1068_v30 = vpop.permute.xlu0 %1067 }
 0x1d2   : > { %v1157_v29 = vrot.slane %v1038_v37, %v3316_v7  ;;  %v898_v37 = vmul.f32 %v3700_v56, %v3672_v2 }
 0x1d3   : > { %1617 = vrot.lane.b32.xlu1 %v3753_v26, %s3237_s29 }
 0x1d4   : > { %1441 = vrot.lane.b32.xlu0 %v3362_v18, %s3236_s19  ;;  %v1177_v18 = vrot.slane %v1053_v21, %v3316_v7  ;;  %v632_v21 = vmul.f32 %v3128_v6, %v3686_v32 }
 0x1d5   : > { %v1041_v28 = vpop.permute.xlu1 %1040 }
 0x1d6   : > { %v1230_v13 = vsel %vm1202_vm3, %v1177_v18, %v1173_v47  ;;  %v1161_v15 = vrot.slane %v1041_v28, %v3316_v7  ;;  %v1226_v47 = vsel %vm1208_vm6, %v1157_v29, %v1225_v40  ;;  %v1193_v28 = vrot.slane %v1065_v46, %v3316_v7 }
 0x1d7   : > { %v1231_v24 = vsel %vm1204_vm4, %v1181_v55, %v1230_v13  ;;  %v636_v55 = vadd.f32 %v632_v21, %v515_v34  ;;  %v899_v46 = vmul.f32 %v3700_v56, %v3674_v11 }
 0x1d8   : > { %v1232_v59 = vsel %vm1206_vm5, %v1185_v1, %v1231_v24  ;;  %v1227_v32 = vsel %vm1210_vm7, %v1161_v15, %v1226_v47  ;;  %v908_v1 = vadd.f32 %v904_v38, %v898_v37  ;;  %v3239_v15 = vmov 8  }
 0x1d9   : > { %v1044_v41 = vpop.permute.xlu1 %1043  ;;  %v1233_v31 = vsel %vm1208_vm6, %v1189_v39, %v1232_v59  ;;  %v1071_v60 = vpop.permute.xlu0 %1070  ;;  %v905_v3 = vmul.f32 %v3698_v61, %v636_v55  ;;  %v1609_v61 = vld [vmem:[%s3332_s12 + $0x4] sm:$0xf]  ;;  %v3829_v59 = vunpack.c.l.bf16 %v3749_v36  ;;  %3132 = vset.pattern.permute.xlu0 %v3239_v15 }
 0x1da   : > { %v1165_v0 = vrot.slane %v1044_v41, %v3316_v7  ;;  %v1197_v41 = vrot.slane %v1068_v30, %v3316_v7  ;;  %v1234_v42 = vsel %vm1210_vm7, %v1193_v28, %v1233_v31  ;;  %v1201_v2 = vrot.slane %v1071_v60, %v3316_v7  ;;  %v1610_v30 = vld [vmem:[%s3332_s12 + $0x8] sm:$0xf] }
 0x1db   : > { %v909_v13 = vadd.f32 %v905_v3, %v899_v46  ;;  %v3814_v56 = vcombine.low %v1609_v61, %v1609_v61  ;;  %v3834_v21 = vunpack.c.l.bf16 %v1609_v61  ;;  %v1908_v35 = vmul.f32 %v3829_v59, %v3408_v58 }
 0x1dc   : > { %v1228_v43 = vsel %vm1212_vm8, %v1165_v0, %v1227_v32  ;;  %v1235_v6 = vsel %vm1212_vm8, %v1197_v41, %v1234_v42  ;;  %v1909_v39 = vmul.f32 %v3829_v59, %v3406_v57  ;;  %v3240_v0 = vmov 10  }
 0x1dd   : > { %v1047_v33 = vpop.permute.xlu1 %1046  ;;  %v1236_v12 = vsel %vm1214_vm9, %v1201_v2, %v1235_v6  ;;  %v1916_v36 = vmul.f32 %v3834_v21, %v3408_v58  ;;  %3131 = vset.pattern.permute.xlu1 %v3240_v0  ;;  %v1910_v40 = vmul.f32 %v3829_v59, %v3421_v62  ;;  %v1911_v37 = vmul.f32 %v3829_v59, %v3439_v4 }
 0x1de   : > { %v1169_v44 = vrot.slane %v1047_v33, %v3316_v7  ;;  %v1244_v16 = vadd.f32 %v1236_v12, %v909_v13  ;;  %v3818_v33 = vcombine.low %v1610_v30, %v1610_v30  ;;  %v1918_v31 = vmul.f32 %v3834_v21, %v3421_v62 }
 0x1df   : > { %v1912_v47 = vmul.f32 %v3829_v59, %v3452_v9  ;;  %v1919_v60 = vmul.f32 %v3834_v21, %v3439_v4  ;;  %v1913_v28 = vmul.f32 %v3829_v59, %v3464_v17  ;;  %v1920_v32 = vmul.f32 %v3834_v21, %v3452_v9 }
 0x1e0   : > { %v1229_v18 = vsel %vm1214_vm9, %v1169_v44, %v1228_v43  ;;  %v3809_v29 = vadd.f32 %v3730_v45, %v1244_v16  ;;  %v1917_v44 = vmul.f32 %v3834_v21, %v3406_v57  ;;  %v1914_v38 = vmul.f32 %v3829_v59, %v3472_v22 }
 0x1e1   : > { %v1243_v8 = vadd.f32 %v1229_v18, %v908_v1  ;;  %v1921_v55 = vmul.f32 %v3834_v21, %v3464_v17  ;;  %v3877_v41 = vunpack.c.l.bf16 %v1610_v30  ;;  %v1915_v43 = vmul.f32 %v3829_v59, %v3480_v25 }
 0x1e2   : > { %v1261_v11 = vsel %vm1251_vm10, %v3809_v29, -inf  ;;  %v1922_v42 = vmul.f32 %v3834_v21, %v3472_v22  ;;  %v1923_v1 = vmul.f32 %v3834_v21, %v3480_v25 }
 0x1e3   : > { %v3804_v23 = vadd.f32 %v3730_v45, %v1243_v8  ;;  %v1611_v45 = vld [vmem:[%s3332_s12 + $0xc] sm:$0xf]  ;;  %v1924_v18 = vmul.f32 %v3877_v41, %v3408_v58  ;;  %v1925_v3 = vmul.f32 %v3877_v41, %v3406_v57  ;;  %v1926_v6 = vmul.f32 %v3877_v41, %v3421_v62  ;;  %s4163_s12 = sld [smem:[#allocation2 + $0x1]] }
 0x1e4   : > { %v3826_v34 = vcombine.low %v1611_v45, %v1611_v45  ;;  %v3885_v2 = vunpack.c.l.bf16 %v1611_v45  ;;  %v1928_v13 = vmul.f32 %v3877_v41, %v3452_v9  ;;  %v1929_v16 = vmul.f32 %v3877_v41, %v3464_v17 }
 0x1e5   : > { %v1258_v24 = vsel %vm1251_vm10, %v3804_v23, -inf }
 0x1e6   : > { %v1932_v46 = vmul.f32 %v3885_v2, %v3408_v58  ;;  %v1933_v8 = vmul.f32 %v3885_v2, %v3406_v57  ;;  %v1927_v58 = vmul.f32 %v3877_v41, %v3439_v4  ;;  %v1934_v12 = vmul.f32 %v3885_v2, %v3421_v62 }
 0x1e7   : > { %v1935_v57 = vmul.f32 %v3885_v2, %v3439_v4  ;;  %v1936_v62 = vmul.f32 %v3885_v2, %v3452_v9  ;;  %v1937_v4 = vmul.f32 %v3885_v2, %v3464_v17  ;;  %v1931_v9 = vmul.f32 %v3877_v41, %v3480_v25 }
 0x1f3   : > { %1259 = vmax.xlane.f32.xlu0 %v1258_v24  ;;  %v1930_v24 = vmul.f32 %v3877_v41, %v3472_v22 }
 0x1f7   : > { %1262 = vmax.xlane.f32.xlu1 %v1261_v11  ;;  %v1394_v11 = vpop.permute.xlu1 %1393 }
 0x208   : > { %1615 = vrot.lane.b32.xlu1 %v3753_v26, %s3238_s8 }
 0x209   : > { %1670 = vrot.lane.b32.xlu0 %v3814_v56, %s3237_s29 }
 0x20c   : > { %1723 = vrot.lane.b32.xlu1 %v3818_v33, %s3237_s29 }
 0x20d   : > { %1668 = vrot.lane.b32.xlu0 %v3814_v56, %s3238_s8 }
 0x210   : > { %1721 = vrot.lane.b32.xlu1 %v3818_v33, %s3238_s8 }
 0x211   : > { %1776 = vrot.lane.b32.xlu0 %v3826_v34, %s3237_s29 }
 0x214   : > { %1972 = vrot.lane.b32.xlu1 %v1908_v35, %s3235_s18  ;;  %v1938_v35 = vmul.f32 %v3885_v2, %v3472_v22  ;;  %v3947_v22 = vpack.i.bf16 %v3885_v2, %v3877_v41 }
 0x215   : > { %1774 = vrot.lane.b32.xlu0 %v3826_v34, %s3238_s8 }
 0x218   : > { %1988 = vrot.lane.b32.xlu1 %v1916_v36, %s3235_s18 }
 0x219   : > { %1974 = vrot.lane.b32.xlu0 %v1909_v39, %s3235_s18  ;;  %v3942_v39 = vpack.i.bf16 %v3834_v21, %v3829_v59 }
 0x21c   : > { %1976 = vrot.lane.b32.xlu1 %v1910_v40, %s3235_s18 }
 0x21d   : > { %1990 = vrot.lane.b32.xlu0 %v1917_v44, %s3235_s18 }
 0x220   : > { %1978 = vrot.lane.b32.xlu1 %v1911_v37, %s3235_s18 }
 0x221   : > { %1992 = vrot.lane.b32.xlu0 %v1918_v31, %s3235_s18 }
 0x224   : > { %1980 = vrot.lane.b32.xlu1 %v1912_v47, %s3235_s18  ;;  %v1399_v47 = vsel %vm1301_vm2, %v1394_v11, 0 }
 0x225   : > { %1994 = vrot.lane.b32.xlu0 %v1919_v60, %s3235_s18 }
 0x228   : > { %1982 = vrot.lane.b32.xlu1 %v1913_v28, %s3235_s18 }
 0x229   : > { %1996 = vrot.lane.b32.xlu0 %v1920_v32, %s3235_s18 }
 0x22c   : > { %1984 = vrot.lane.b32.xlu1 %v1914_v38, %s3235_s18 }
 0x22d   : > { %1998 = vrot.lane.b32.xlu0 %v1921_v55, %s3235_s18 }
 0x230   : > { %1986 = vrot.lane.b32.xlu1 %v1915_v43, %s3235_s18 }
 0x231   : > { %2000 = vrot.lane.b32.xlu0 %v1922_v42, %s3235_s18 }
 0x234   : > { %2004 = vrot.lane.b32.xlu1 %v1924_v18, %s3235_s18 }
 0x235   : > { %2002 = vrot.lane.b32.xlu0 %v1923_v1, %s3235_s18 }
 0x238   : > { %2020 = vrot.lane.b32.xlu1 %v1932_v46, %s3235_s18 }
 0x239   : > { %2006 = vrot.lane.b32.xlu0 %v1925_v3, %s3235_s18 }
 0x23c   : > { %2008 = vrot.lane.b32.xlu1 %v1926_v6, %s3235_s18 }
 0x23d   : > { %2022 = vrot.lane.b32.xlu0 %v1933_v8, %s3235_s18 }
 0x240   : > { %2010 = vrot.lane.b32.xlu1 %v1927_v58, %s3235_s18 }
 0x241   : > { %2024 = vrot.lane.b32.xlu0 %v1934_v12, %s3235_s18 }
 0x244   : > { %2012 = vrot.lane.b32.xlu1 %v1928_v13, %s3235_s18 }
 0x245   : > { %2026 = vrot.lane.b32.xlu0 %v1935_v57, %s3235_s18  ;;  %v1853_v57 = vmul.f32 %v3829_v59, %v3542_v48 }
 0x248   : > { %2014 = vrot.lane.b32.xlu1 %v1929_v16, %s3235_s18  ;;  %v1852_v16 = vmul.f32 %v3829_v59, %v3544_v49 }
 0x249   : > { %2028 = vrot.lane.b32.xlu0 %v1936_v62, %s3235_s18 }
 0x24b   : > { %v1257_v61 = vpop.xlane.xlu0 %1256 }
 0x24c   : > { %v1265_v30 = vsub.f32 %v3738_v63, %v1257_v61  ;;  %2016 = vrot.lane.b32.xlu1 %v1930_v24, %s3235_s18  ;;  %v1939_v63 = vmul.f32 %v3885_v2, %v3480_v25  ;;  %v3988_v24 = vstv %s2929_s9 }
 0x24d   : > { %2030 = vrot.lane.b32.xlu0 %v1937_v4, %s3235_s18 }
 0x24e   : > { %v1270_v45 = vmul.f32 1.442695, %v1265_v30 }
 0x24f   : > { %v1254_v15 = vpop.xlane.xlu1 %1253  ;;  %v1442_v40 = vpop.permute.xlu0 %1441 }
 0x250   : > { %3166 = vpow2.f32 %v1270_v45  ;;  %v1264_v36 = vsub.f32 %v3744_v27, %v1254_v15  ;;  %2018 = vrot.lane.b32.xlu1 %v1931_v9, %s3235_s18  ;;  %v1447_v25 = vsel %vm1301_vm2, %v1442_v40, 0  ;;  %v1861_v40 = vmul.f32 %v3834_v21, %v3542_v48 }
 0x251   : > { %2032 = vrot.lane.b32.xlu0 %v1938_v35, %s3235_s18  ;;  %v1860_v35 = vmul.f32 %v3834_v21, %v3544_v49 }
 0x252   : > { %v1268_v17 = vmul.f32 1.442695, %v1264_v36 }
 0x253   : > { %v1618_v60 = vpop.permute.xlu1 %1617 }
 0x254   : > { %3168 = vpow2.f32 %v1268_v17  ;;  %v1623_v13 = vsel %vm288_vm1, %v1618_v60, 0 }
 0x255   : > { %2034 = vrot.lane.b32.xlu0 %v1939_v63, %s3235_s18 }
 0x259   : > { %3134 = vperm.xlu0 %3132, %v3942_v39  }
 0x25a   : > { %v3949_v27 = vpop.eup %3166 }
 0x25b   : > { %v1293_v44 = vpack.c.bf16 %v3949_v27, %v3949_v27 }
 0x25d   : > { %3010 = vmatmul.mubr.msk.bf16.vlgmr.msra.gmra.mrb[8].mxu1 %vm1251_vm10, %v1293_v44  ;;  %3146 = vperm.xlu0 %3132, %v3947_v22  }
 0x25e   : > { %v3956_v37 = vpop.eup %3168  ;;  %3020 = vmatpush3.bf16.msra.mxu1 %v1447_v25  ;;  %3021 = vmatprep.mubr.msk.bf16.mxu1 %vm3232_vm0, %v3231_v5 }
 0x25f   : > { %v1292_v31 = vpack.c.bf16 %v3956_v37, %v3956_v37  ;;  %3031 = vmatprep.subr.bf16.mxu1 %v3231_v5 }
 0x261   : > { %3004 = vmatmul.mubr.msk.bf16.vlgmr.msra.gmra.mrb[8].mxu0 %vm1251_vm10, %v1292_v31  ;;  %3150 = vset.pattern.permute.xlu0 %v3240_v0 }
 0x262   : > { %3014 = vmatpush3.bf16.msra.mxu0 %v1399_v47  ;;  %3015 = vmatprep.mubr.msk.bf16.mxu0 %vm3232_vm0, %v3231_v5  ;;  %v1862_v47 = vmul.f32 %v3834_v21, %v3548_v51 }
 0x263   : > { %3025 = vmatprep.subr.bf16.mxu0 %v3231_v5 }
 0x280   : > { %v1260_v28 = vpop.xlane.xlu0 %1259 }
 0x281   : > { %v1266_v32 = vsub.f32 %v3804_v23, %v1260_v28 }
 0x283   : > { %v1272_v38 = vmul.f32 1.442695, %v1266_v32 }
 0x284   : > { %v1671_v55 = vpop.permute.xlu0 %1670  ;;  %v1263_v43 = vpop.xlane.xlu1 %1262 }
 0x285   : > { %3170 = vpow2.f32 %v1272_v38  ;;  %v1267_v42 = vsub.f32 %v3809_v29, %v1263_v43  ;;  %v1676_v62 = vsel %vm288_vm1, %v1671_v55, 0 }
 0x287   : > { %v1274_v18 = vmul.f32 1.442695, %v1267_v42 }
 0x288   : > { %v1669_v1 = vpop.permute.xlu0 %1668  ;;  %v1616_v46 = vpop.permute.xlu1 %1615 }
 0x289   : > { %3172 = vpow2.f32 %v1274_v18 }
 0x28c   : > { %v1777_v3 = vpop.permute.xlu0 %1776  ;;  %v1724_v6 = vpop.permute.xlu1 %1723 }
 0x28d   : > { %v1729_v36 = vsel %vm288_vm1, %v1724_v6, 0  ;;  %v1782_v60 = vsel %vm288_vm1, %v1777_v3, 0 }
 0x28f   : > { %v3971_v8 = vpop.eup %3170 }
 0x290   : > { %v3973_v58 = vpop.permute.xlu0 %1774  ;;  %v1722_v12 = vpop.permute.xlu1 %1721  ;;  %v1294_v23 = vpack.c.bf16 %v3971_v8, %v3971_v8 }
 0x292   : > { %3016 = vmatmul.mubr.msk.bf16.vlgmr.msra.gmra.mrb[12].mxu0 %vm1251_vm10, %v1294_v23 }
 0x293   : > { %v3979_v29 = vpop.eup %3172  ;;  %3026 = vmatpush3.bf16.xpose.msra.mxu0 %v1623_v13  ;;  %3027 = vmatprep.mubr.msk.bf16.mxu0 %vm3232_vm0, %v3231_v5 }
 0x294   : > { %v1975_v11 = vpop.permute.xlu0 %1974  ;;  %v1973_v61 = vpop.permute.xlu1 %1972  ;;  %v1295_v4 = vpack.c.bf16 %v3979_v29, %v3979_v29  ;;  %3037 = vmatprep.subr.bf16.mxu0 %v3231_v5 }
 0x295   : > { %v2069_v30 = vadd.f32 %v1975_v11, %v1853_v57  ;;  %v2068_v45 = vadd.f32 %v1973_v61, %v1852_v16  ;;  %v3241_v57 = vmov 9  }
 0x296   : > { %3022 = vmatmul.mubr.msk.bf16.vlgmr.msra.gmra.mrb[12].mxu1 %vm1251_vm10, %v1295_v4 }
 0x297   : > { %v2119_v9 = vmul.f32 %v3988_v24, %v2069_v30  ;;  %v2118_v15 = vmul.f32 %v3988_v24, %v2068_v45  ;;  %3032 = vmatpush3.bf16.xpose.msra.mxu1 %v1676_v62  ;;  %3033 = vmatprep.mubr.msk.bf16.mxu1 %vm3232_vm0, %v3231_v5  ;;  %v1857_v62 = vmul.f32 %v3829_v59, %v3550_v52 }
 0x298   : > { %v1991_v17 = vpop.permute.xlu0 %1990  ;;  %v1989_v63 = vpop.permute.xlu1 %1988  ;;  %3043 = vmatprep.subr.bf16.mxu1 %v3231_v5 }
 0x299   : > { %v2076_v44 = vadd.f32 %v1989_v63, %v1860_v35  ;;  %2186 = vperm.xlu0 %3150, %v2119_v9   ;;  %2183 = vperm.xlu1 %3131, %v2118_v15   ;;  %v2077_v25 = vadd.f32 %v1991_v17, %v1861_v40  ;;  %v1858_v9 = vmul.f32 %v3829_v59, %v3556_v54 }
 0x29a   : > { %3028 = vmatmul.mubr.msk.bf16.vlgmr.msra.gmra.mrb[16].mxu0 %vm288_vm1, %v1616_v46  ;;  %v1854_v46 = vmul.f32 %v3829_v59, %v3548_v51  ;;  %v1864_v40 = vmul.f32 %v3834_v21, %v3552_v19 }
 0x29b   : > { %v2126_v31 = vmul.f32 %v3988_v24, %v2076_v44  ;;  %3038 = vmatpush3.bf16.xpose.msra.mxu0 %v1729_v36  ;;  %3039 = vmatprep.mubr.msk.bf16.mxu0 %vm3232_vm0, %v3231_v5  ;;  %v2127_v55 = vmul.f32 %v3988_v24, %v2077_v25  ;;  %v1859_v25 = vmul.f32 %v3829_v59, %v3554_v53 }
 0x29c   : > { %v1993_v28 = vpop.permute.xlu0 %1992  ;;  %v1977_v32 = vpop.permute.xlu1 %1976  ;;  %3049 = vmatprep.subr.bf16.mxu0 %v3231_v5 }
 0x29d   : > { %v2078_v38 = vadd.f32 %v1993_v28, %v1862_v47  ;;  %2207 = vperm.xlu1 %3131, %v2126_v31   ;;  %v2070_v23 = vadd.f32 %v1977_v32, %v1854_v46 }
 0x29e   : > { %3034 = vmatmul.mubr.msk.bf16.vlgmr.msra.gmra.mrb[16].mxu1 %vm288_vm1, %v1669_v1  ;;  %v1856_v1 = vmul.f32 %v3829_v59, %v3552_v19 }
 0x29f   : > { %v2128_v43 = vmul.f32 %v3988_v24, %v2078_v38  ;;  %3044 = vmatpush3.bf16.xpose.msra.mxu1 %v1782_v60  ;;  %3045 = vmatprep.mubr.msk.bf16.mxu1 %vm3232_vm0, %v3231_v5  ;;  %v2120_v4 = vmul.f32 %v3988_v24, %v2070_v23  ;;  %v1865_v38 = vmul.f32 %v3834_v21, %v3550_v52 }
 0x2a0   : > { %v1995_v42 = vpop.permute.xlu0 %1994  ;;  %v1979_v18 = vpop.permute.xlu1 %1978  ;;  %3055 = vmatprep.subr.bf16.mxu1 %v3231_v5  ;;  %v1876_v23 = vmul.f32 %v3885_v2, %v3544_v49 }
 0x2a1   : > { %2213 = vperm.xlu0 %3150, %v2128_v43   ;;  %2210 = vperm.xlu1 %3131, %v2127_v55   ;;  %v1868_v43 = vmul.f32 %v3877_v41, %v3544_v49 }
 0x2a2   : > { %3040 = vmatmul.mubr.msk.bf16.vlgmr.msra.gmra.mrb[20].mxu0 %vm288_vm1, %v1722_v12  ;;  %v1855_v12 = vmul.f32 %v3829_v59, %v3546_v50 }
 0x2a3   : > { %3051 = vmatprep.mubr.msk.bf16.mxu0 %vm3232_vm0, %v3231_v5 }
 0x2a4   : > { %v1997_v3 = vpop.permute.xlu0 %1996  ;;  %v1981_v6 = vpop.permute.xlu1 %1980  ;;  %v2071_v30 = vadd.f32 %v1979_v18, %v1855_v12 }
 0x2a5   : > { %v2072_v13 = vadd.f32 %v1981_v6, %v1856_v1  ;;  %3138 = vset.pattern.permute.xlu1 %v3241_v57  ;;  %v2080_v28 = vadd.f32 %v1997_v3, %v1864_v40  ;;  %v1866_v3 = vmul.f32 %v3834_v21, %v3556_v54  ;;  %v1872_v40 = vmul.f32 %v3877_v41, %v3552_v19 }
 0x2a6   : > { %3046 = vmatmul.mubr.msk.bf16.vlgmr.msra.gmra.mrb[20].mxu1 %vm288_vm1, %v3973_v58  ;;  %3140 = vperm.xlu1 %3138, %v3942_v39   ;;  %v1863_v39 = vmul.f32 %v3834_v21, %v3546_v50  ;;  %v2121_v17 = vmul.f32 %v3988_v24, %v2071_v30  ;;  %v1878_v30 = vmul.f32 %v3885_v2, %v3548_v51 }
 0x2a7   : > { %v2122_v16 = vmul.f32 %v3988_v24, %v2072_v13  ;;  %3057 = vmatprep.mubr.msk.bf16.mxu1 %vm3232_vm0, %v3231_v5  ;;  %v2130_v59 = vmul.f32 %v3988_v24, %v2080_v28  ;;  %v1873_v28 = vmul.f32 %v3877_v41, %v3550_v52 }
 0x2a8   : > { %v1999_v11 = vpop.permute.xlu0 %1998  ;;  %v1983_v61 = vpop.permute.xlu1 %1982  ;;  %v2079_v36 = vadd.f32 %v1995_v42, %v1863_v39 }
 0x2a9   : > { %v2073_v45 = vadd.f32 %v1983_v61, %v1857_v62  ;;  %2195 = vperm.xlu0 %3150, %v2122_v16   ;;  %v2081_v46 = vadd.f32 %v1999_v11, %v1865_v38  ;;  %v1867_v11 = vmul.f32 %v3834_v21, %v3554_v53 }
 0x2aa   : > { %3144 = vset.pattern.permute.xlu1 %v3240_v0  ;;  %v2129_v60 = vmul.f32 %v3988_v24, %v2079_v36 }
 0x2ab   : > { %v2123_v58 = vmul.f32 %v3988_v24, %v2073_v45  ;;  %2189 = vperm.xlu1 %3144, %v2120_v4   ;;  %v2131_v16 = vmul.f32 %v3988_v24, %v2081_v46 }
 0x2ac   : > { %v2001_v15 = vpop.permute.xlu0 %2000  ;;  %v1985_v35 = vpop.permute.xlu1 %1984 }
 0x2ad   : > { %v2074_v63 = vadd.f32 %v1985_v35, %v1858_v9  ;;  %2198 = vperm.xlu0 %3150, %v2123_v58   ;;  %v2082_v62 = vadd.f32 %v2001_v15, %v1866_v3  ;;  %v1869_v15 = vmul.f32 %v3877_v41, %v3542_v48 }
 0x2af   : > { %v2124_v44 = vmul.f32 %v3988_v24, %v2074_v63  ;;  %2192 = vperm.xlu1 %3144, %v2121_v17   ;;  %v2132_v49 = vmul.f32 %v3988_v24, %v2082_v62  ;;  %v1877_v63 = vmul.f32 %v3885_v2, %v3542_v48 }
 0x2b0   : > { %v2003_v31 = vpop.permute.xlu0 %2002  ;;  %v1987_v47 = vpop.permute.xlu1 %1986 }
 0x2b1   : > { %v2075_v32 = vadd.f32 %v1987_v47, %v1859_v25  ;;  %2201 = vperm.xlu0 %3150, %v2124_v44   ;;  %v2083_v58 = vadd.f32 %v2003_v31, %v1867_v11 }
 0x2b3   : > { %v2125_v55 = vmul.f32 %v3988_v24, %v2075_v32  ;;  %2216 = vperm.xlu1 %3144, %v2129_v60   ;;  %v2133_v36 = vmul.f32 %v3988_v24, %v2083_v58  ;;  %v1882_v58 = vmul.f32 %v3885_v2, %v3556_v54 }
 0x2b4   : > { %v2007_v42 = vpop.permute.xlu0 %2006  ;;  %v2005_v18 = vpop.permute.xlu1 %2004 }
 0x2b5   : > { %v2084_v1 = vadd.f32 %v2005_v18, %v1868_v43  ;;  %2204 = vperm.xlu0 %3150, %v2125_v55   ;;  %v2085_v17 = vadd.f32 %v2007_v42, %v1869_v15  ;;  %v1874_v43 = vmul.f32 %v3877_v41, %v3556_v54 }
 0x2b7   : > { %v2134_v6 = vmul.f32 %v3988_v24, %v2084_v1  ;;  %2219 = vperm.xlu1 %3144, %v2130_v59   ;;  %v2135_v25 = vmul.f32 %v3988_v24, %v2085_v17  ;;  %v1870_v59 = vmul.f32 %v3877_v41, %v3548_v51 }
 0x2b8   : > { %v2023_v13 = vpop.permute.xlu0 %2022  ;;  %v2021_v12 = vpop.permute.xlu1 %2020 }
 0x2b9   : > { %v2092_v61 = vadd.f32 %v2021_v12, %v1876_v23  ;;  %2231 = vperm.xlu0 %3150, %v2134_v6   ;;  %v2093_v31 = vadd.f32 %v2023_v13, %v1877_v63  ;;  %v1875_v6 = vmul.f32 %v3877_v41, %v3554_v53  ;;  %v1871_v13 = vmul.f32 %v3877_v41, %v3546_v50 }
 0x2ba   : > { %v1880_v41 = vmul.f32 %v3885_v2, %v3552_v19 }
 0x2bb   : > { %v2142_v4 = vmul.f32 %v3988_v24, %v2092_v61  ;;  %2222 = vperm.xlu1 %3144, %v2131_v16   ;;  %v2143_v38 = vmul.f32 %v3988_v24, %v2093_v31 }
 0x2bc   : > { %v2025_v45 = vpop.permute.xlu0 %2024  ;;  %v2009_v39 = vpop.permute.xlu1 %2008 }
 0x2bd   : > { %v2094_v9 = vadd.f32 %v2025_v45, %v1878_v30  ;;  %2255 = vperm.xlu0 %3150, %v2142_v4   ;;  %v2086_v1 = vadd.f32 %v2009_v39, %v1870_v59  ;;  %v1881_v39 = vmul.f32 %v3885_v2, %v3550_v52 }
 0x2bf   : > { %v2144_v35 = vmul.f32 %v3988_v24, %v2094_v9  ;;  %2225 = vperm.xlu1 %3144, %v2132_v49   ;;  %v2136_v51 = vmul.f32 %v3988_v24, %v2086_v1 }
 0x2c0   : > { %v2011_v21 = vpop.permute.xlu1 %2010  ;;  %v2027_v42 = vpop.permute.xlu0 %2026 }
 0x2c1   : > { %2261 = vperm.xlu0 %3150, %v2144_v35   ;;  %v2087_v62 = vadd.f32 %v2011_v21, %v1871_v13  ;;  %v1883_v35 = vmul.f32 %v3885_v2, %v3554_v53 }
 0x2c3   : > { %2228 = vperm.xlu1 %3144, %v2133_v36   ;;  %v2137_v11 = vmul.f32 %v3988_v24, %v2087_v62 }
 0x2c4   : > { %v2013_v44 = vpop.permute.xlu1 %2012  ;;  %v2029_v16 = vpop.permute.xlu0 %2028 }
 0x2c5   : > { %v2088_v47 = vadd.f32 %v2013_v44, %v1872_v40  ;;  %v2096_v45 = vadd.f32 %v2029_v16, %v1880_v41 }
 0x2c7   : > { %v2138_v60 = vmul.f32 %v3988_v24, %v2088_v47  ;;  %2234 = vperm.xlu1 %3144, %v2135_v25  }
 0x2c8   : > { %v2015_v32 = vpop.permute.xlu1 %2014  ;;  %v2031_v4 = vpop.permute.xlu0 %2030 }
 0x2c9   : > { %v2089_v55 = vadd.f32 %v2015_v32, %v1873_v28  ;;  %2243 = vperm.xlu0 %3150, %v2138_v60   ;;  %v2097_v49 = vadd.f32 %v2031_v4, %v1881_v39 }
 0x2cb   : > { %v2139_v48 = vmul.f32 %v3988_v24, %v2089_v55  ;;  %2258 = vperm.xlu1 %3144, %v2143_v38   ;;  %v2147_v9 = vmul.f32 %v3988_v24, %v2097_v49 }
 0x2cc   : > { %v2017_v18 = vpop.permute.xlu1 %2016 }
 0x2cd   : > { %v2090_v46 = vadd.f32 %v2017_v18, %v1874_v43  ;;  %2246 = vperm.xlu0 %3150, %v2139_v48  }
 0x2cf   : > { %v2140_v3 = vmul.f32 %v3988_v24, %v2090_v46  ;;  %3151 = vset.pattern.permute.xlu1 %v3241_v57  ;;  %v1879_v57 = vmul.f32 %v3885_v2, %v3546_v50  ;;  %v2146_v50 = vmul.f32 %v3988_v24, %v2096_v45 }
 0x2d0   : > { %3153 = vperm.xlu1 %3151, %v3947_v22   ;;  %v2019_v23 = vpop.permute.xlu1 %2018 }
 0x2d1   : > { %v2091_v12 = vadd.f32 %v2019_v23, %v1875_v6  ;;  %2249 = vperm.xlu0 %3150, %v2140_v3   ;;  %v2095_v22 = vadd.f32 %v2027_v42, %v1879_v57 }
 0x2d3   : > { %v2141_v61 = vmul.f32 %v3988_v24, %v2091_v12  ;;  %v2145_v30 = vmul.f32 %v3988_v24, %v2095_v22 }
 0x2d4   : > { %3157 = vset.pattern.permute.xlu1 %v3240_v0  ;;  %v2033_v0 = vpop.permute.xlu0 %2032 }
 0x2d5   : > { %2237 = vperm.xlu1 %3157, %v2136_v51   ;;  %2252 = vperm.xlu0 %3150, %v2141_v61   ;;  %v2098_v15 = vadd.f32 %v2033_v0, %v1882_v58 }
 0x2d7   : > { %v2148_v21 = vmul.f32 %v3988_v24, %v2098_v15 }
 0x2d8   : > { %v2035_v19 = vpop.permute.xlu0 %2034 }
 0x2d9   : > { %2240 = vperm.xlu1 %3157, %v2137_v11   ;;  %v2099_v52 = vadd.f32 %v2035_v19, %v1883_v35 }
 0x2db   : > { %v2149_v36 = vmul.f32 %v3988_v24, %v2099_v52  ;;  %v4169_v52 = vld [vmem:[%s4511_s1] sm:$0xff] }
 0x2dc   : > { %v3135_v2 = vpop.permute.xlu0 %3134 }
 0x2dd   : > { %2264 = vperm.xlu1 %3157, %v2145_v30   ;;  %v3136_v0 = vunpack.i.l.bf16 %v3135_v2  ;;  %v3137_v19 = vunpack.i.h.bf16 %v3135_v2 }
 0x2e0   : > { %v4119_v47 = vpop.permute.xlu0 %3146 }
 0x2e1   : > { %2267 = vperm.xlu1 %3157, %v2146_v50  }
 0x2e5   : > { %2270 = vperm.xlu1 %3157, %v2147_v9  }
 0x2e9   : > { %2273 = vperm.xlu1 %3157, %v2148_v21  }
 0x2ed   : > { %2276 = vperm.xlu1 %3157, %v2149_v36   ;;  %v1848_v36 = vmul.f32 %v4169_v52, %v3136_v0 }
 0x2f1   : > { %2492 = vrot.lane.b32.xlu1 %v3753_v26, %s3242_s10 }
 0x318   : > { %v2184_v54 = vpop.permute.xlu1 %2183  ;;  %v2187_v28 = vpop.permute.xlu0 %2186 }
 0x319   : > { %v2285_v45 = vrot.slane %v2187_v28, %v3316_v7  ;;  %v2281_v39 = vrot.slane %v2184_v54, %v3316_v7  ;;  %v4175_v54 = vld [vmem:[%s4511_s1 + $0x8] sm:$0xff] }
 0x31b   : > { %v2406_v21 = vsel %vm1202_vm3, %v2285_v45, %v2281_v39  ;;  %v4196_v39 = vstv %s4155_s11 }
 0x31c   : > { %v2208_v17 = vpop.permute.xlu1 %2207 }
 0x31d   : > { %v2313_v40 = vrot.slane %v2208_v17, %v3316_v7 }
 0x320   : > { %v2211_v63 = vpop.permute.xlu1 %2210  ;;  %v4127_v43 = vpop.permute.xlu0 %2213 }
 0x321   : > { %v2317_v44 = vrot.slane %v2211_v63, %v3316_v7 }
 0x323   : > { %v4117_v53 = vsel %vm1202_vm3, %v2317_v44, %v2313_v40  ;;  %v3148_v44 = vunpack.i.l.bf16 %v4119_v47 }
 0x325   : > { %v3141_v25 = vpop.permute.xlu1 %3140 }
 0x326   : > { %v3142_v50 = vunpack.i.l.bf16 %v3141_v25  ;;  %v3143_v35 = vunpack.i.h.bf16 %v3141_v25 }
 0x328   : > { %v2196_v1 = vpop.permute.xlu0 %2195  ;;  %v1900_v17 = vmul.f32 %v4175_v54, %v3142_v50 }
 0x329   : > { %v2297_v28 = vrot.slane %v2196_v1, %v3316_v7 }
 0x32a   : > { %v2190_v31 = vpop.permute.xlu1 %2189  ;;  %v1904_v0 = vadd.f32 %v1900_v17, %v1848_v36 }
 0x32b   : > { %v2289_v49 = vrot.slane %v2190_v31, %v3316_v7  ;;  %v1849_v31 = vmul.f32 %v4169_v52, %v3137_v19  ;;  %v1850_v19 = vmul.f32 %v4169_v52, %v3148_v44 }
 0x32c   : > { %v4135_v23 = vpop.permute.xlu0 %2198 }
 0x32d   : > { %v2407_v63 = vsel %vm1204_vm4, %v2289_v49, %v2406_v21  ;;  %v4210_v21 = vstv %s4163_s12 }
 0x32e   : > { %v2193_v24 = vpop.permute.xlu1 %2192 }
 0x32f   : > { %v2293_v9 = vrot.slane %v2193_v24, %v3316_v7  ;;  %v1901_v24 = vmul.f32 %v4175_v54, %v3143_v35 }
 0x330   : > { %v4121_v60 = vpop.f32.mrb[8].mxu1  ;;  %v4139_v12 = vpop.permute.xlu0 %2201 }
 0x331   : > { %v3011_v26 = vpop.f32.mrb[9].mxu1  ;;  %v2408_v2 = vsel %vm1206_vm5, %v2293_v9, %v2407_v63  ;;  %v1905_v36 = vadd.f32 %v1901_v24, %v1849_v31 }
 0x332   : > { %v1390_v32 = vpop.f32.mrb[10].mxu1  ;;  %v4123_v38 = vpop.permute.xlu1 %2216  ;;  %v2409_v50 = vsel %vm1208_vm6, %v2297_v28, %v2408_v2 }
 0x333   : > { %v3012_v55 = vpop.f32.mrb[11].mxu1 }
 0x334   : > { %v4125_v48 = vpop.f32.mrb[8].mxu0  ;;  %v4143_v62 = vpop.permute.xlu0 %2204  ;;  %v3149_v55 = vunpack.i.h.bf16 %v4119_v47 }
 0x335   : > { %v3005_v42 = vpop.f32.mrb[9].mxu0 }
 0x336   : > { %v1342_v18 = vpop.f32.mrb[10].mxu0  ;;  %v4129_v59 = vpop.permute.xlu1 %2219  ;;  %v2321_v42 = vrot.slane %v4127_v43, %v3316_v7  ;;  %v2301_v43 = vrot.slane %v4135_v23, %v3316_v7  ;;  %v2309_v23 = vrot.slane %v4143_v62, %v3316_v7 }
 0x337   : > { %v3006_v46 = vpop.f32.mrb[11].mxu0  ;;  %v2329_v2 = vrot.slane %v4129_v59, %v3316_v7 }
 0x338   : > { %v2232_v57 = vpop.permute.xlu0 %2231  ;;  %v2410_v44 = vsel %vm1210_vm7, %v2301_v43, %v2409_v50  ;;  %v2109_v43 = vmul.f32 %v4196_v39, %v1905_v36 }
 0x339   : > { %v2345_v1 = vrot.slane %v2232_v57, %v3316_v7  ;;  %v2305_v57 = vrot.slane %v4139_v12, %v3316_v7  ;;  %v2414_v12 = vsel %vm1204_vm4, %v2321_v42, %v4117_v53 }
 0x33a   : > { %v4131_v3 = vpop.permute.xlu1 %2222 }
 0x33b   : > { %v2333_v62 = vrot.slane %v4131_v3, %v3316_v7  ;;  %v2411_v42 = vsel %vm1212_vm8, %v2305_v57, %v2410_v44 }
 0x33c   : > { %v4147_v11 = vpop.permute.xlu0 %2255  ;;  %v2412_v3 = vsel %vm1214_vm9, %v2309_v23, %v2411_v42 }
 0x33e   : > { %v4133_v6 = vpop.permute.xlu1 %2225 }
 0x340   : > { %v4151_v30 = vpop.permute.xlu0 %2261 }
 0x342   : > { %v4137_v13 = vpop.permute.xlu1 %2228 }
 0x343   : > { %v2341_v57 = vrot.slane %v4137_v13, %v3316_v7 }
 0x346   : > { %v2235_v16 = vpop.permute.xlu1 %2234 }
 0x347   : > { %v2349_v26 = vrot.slane %v2235_v16, %v3316_v7 }
 0x348   : > { %v4161_v15 = vpop.permute.xlu0 %2243 }
 0x349   : > { %v2420_v17 = vsel %vm1202_vm3, %v2349_v26, %v2345_v1  ;;  %v2108_v26 = vmul.f32 %v4196_v39, %v1904_v0  ;;  %v2361_v59 = vrot.slane %v4161_v15, %v3316_v7 }
 0x34a   : > { %v4141_v51 = vpop.permute.xlu1 %2258 }
 0x34c   : > { %v2247_v18 = vpop.permute.xlu0 %2246 }
 0x34f   : > { %v4145_v61 = vpop.permute.xlu1 %3153 }
 0x354   : > { %v2238_v22 = vpop.permute.xlu1 %2237 }
 0x355   : > { %v2353_v46 = vrot.slane %v2238_v22, %v3316_v7  ;;  %v3155_v22 = vunpack.i.l.bf16 %v4145_v61 }
 0x357   : > { %v2421_v28 = vsel %vm1204_vm4, %v2353_v46, %v2420_v17  ;;  %v3156_v46 = vunpack.i.h.bf16 %v4145_v61  ;;  %v1902_v50 = vmul.f32 %v4175_v54, %v3155_v22  ;;  %v2337_v61 = vrot.slane %v4133_v6, %v3316_v7 }
 0x358   : > { %v2241_v4 = vpop.permute.xlu1 %2240 }
 0x359   : > { %v2357_v16 = vrot.slane %v2241_v4, %v3316_v7  ;;  %v2325_v4 = vrot.slane %v4123_v38, %v3316_v7 }
 0x35b   : > { %v2422_v24 = vsel %vm1206_vm5, %v2357_v16, %v2421_v28  ;;  %v2415_v1 = vsel %vm1206_vm5, %v2325_v4, %v2414_v12  ;;  %v2250_v16 = vpop.permute.xlu0 %2249  ;;  %v2381_v4 = vrot.slane %v4141_v51, %v3316_v7 }
 0x35c   : > { %v4149_v41 = vpop.permute.xlu1 %2264  ;;  %v2416_v17 = vsel %vm1208_vm6, %v2329_v2, %v2415_v1  ;;  %v2423_v15 = vsel %vm1208_vm6, %v2361_v59, %v2422_v24  ;;  %v1903_v2 = vmul.f32 %v4175_v54, %v3156_v46  ;;  %v2377_v24 = vrot.slane %v4147_v11, %v3316_v7 }
 0x35d   : > { %v2417_v23 = vsel %vm1210_vm7, %v2333_v62, %v2416_v17  ;;  %v2369_v62 = vrot.slane %v2250_v16, %v3316_v7 }
 0x35e   : > { %v2418_v54 = vsel %vm1212_vm8, %v2337_v61, %v2417_v23  ;;  %v2427_v46 = vsel %vm1202_vm3, %v2381_v4, %v2377_v24 }
 0x35f   : > { %v2419_v11 = vsel %vm1214_vm9, %v2341_v57, %v2418_v54 }
 0x360   : > { %v4158_v58 = vpop.permute.xlu1 %2267 }
 0x364   : > { %v4179_v40 = vpop.permute.xlu1 %2270 }
 0x365   : > { %v4185_v25 = vpop.f32.mrb[12].mxu0 }
 0x366   : > { %v3017_v32 = vpop.f32.mrb[13].mxu0 }
 0x367   : > { %v1438_v45 = vpop.f32.mrb[14].mxu0 }
 0x368   : > { %v3018_v49 = vpop.f32.mrb[15].mxu0  ;;  %v4201_v9 = vpop.permute.xlu1 %2273  ;;  %v4230_v45 = vstv %s4181_s17 }
 0x369   : > { %v4207_v35 = vpop.f32.mrb[12].mxu1  ;;  %v2401_v57 = vrot.slane %v4201_v9, %v3316_v7 }
 0x36a   : > { %v3023_v63 = vpop.f32.mrb[13].mxu1 }
 0x36b   : > { %v1486_v31 = vpop.f32.mrb[14].mxu1  ;;  %v2365_v63 = vrot.slane %v2247_v18, %v3316_v7 }
 0x36c   : > { %v3024_v38 = vpop.f32.mrb[15].mxu1  ;;  %v4226_v32 = vpop.permute.xlu1 %2276  ;;  %v1906_v31 = vadd.f32 %v1902_v50, %v1850_v19  ;;  %v2385_v19 = vrot.slane %v4151_v30, %v3316_v7 }
 0x36d   : > { %v1659_v53 = vpop.f32.mrb[16].mxu0  ;;  %v2424_v13 = vsel %vm1210_vm7, %v2365_v63, %v2423_v15  ;;  %v2253_v50 = vpop.permute.xlu0 %2252  ;;  %v2397_v15 = vrot.slane %v4179_v40, %v3316_v7 }
 0x36e   : > { %v2102_v0 = vmul.f32 %v4210_v21, %v1659_v53  ;;  %v3029_v49 = vpop.f32.mrb[17].mxu0  ;;  %v2110_v30 = vmul.f32 %v4196_v39, %v1906_v31  ;;  %v2425_v16 = vsel %vm1212_vm8, %v2369_v62, %v2424_v13  ;;  %v2373_v61 = vrot.slane %v2253_v50, %v3316_v7 }
 0x36f   : > { %v1662_v22 = vpop.f32.mrb[18].mxu0 }
 0x370   : > { %v2112_v44 = vadd.f32 %v2108_v26, %v2102_v0  ;;  %v3030_v36 = vpop.f32.mrb[19].mxu0  ;;  %v2493_v28 = vpop.permute.xlu1 %2492  ;;  %v1851_v26 = vmul.f32 %v4169_v52, %v3149_v55  ;;  %v2389_v55 = vrot.slane %v4149_v41, %v3316_v7  ;;  %v2393_v0 = vrot.slane %v4158_v58, %v3316_v7 }
 0x371   : > { %v1712_v6 = vpop.f32.mrb[16].mxu1  ;;  %v2498_v12 = vsel %vm1301_vm2, %v2493_v28, 0  ;;  %v2428_v22 = vsel %vm1204_vm4, %v2385_v19, %v2427_v46  ;;  %v2405_v36 = vrot.slane %v4226_v32, %v3316_v7  ;;  %v2426_v28 = vsel %vm1214_vm9, %v2373_v61, %v2425_v16  ;;  %v3200_v19 = vld [vmem:[%s4515_s5] sm:$0x7] }
 0x372   : > { %v2438_v38 = vadd.f32 %v2412_v3, %v2112_v44  ;;  %v2103_v51 = vmul.f32 %v4210_v21, %v1712_v6  ;;  %v3035_v18 = vpop.f32.mrb[17].mxu1  ;;  %3050 = vmatpush3.bf16.msra.mxu0 %v2498_v12  ;;  %v1907_v52 = vadd.f32 %v1903_v2, %v1851_v26  ;;  %v2429_v44 = vsel %vm1206_vm5, %v2389_v55, %v2428_v22 }
 0x373   : > { %v1715_v59 = vpop.f32.mrb[18].mxu1  ;;  %3061 = vmatprep.subr.bf16.mxu0 %v3231_v5  ;;  %v2430_v2 = vsel %vm1208_vm6, %v2393_v0, %v2429_v44  ;;  %v4308_v62 = vrot.slane %v3200_v19, %v3369_v20 }
 0x374   : > { %v2113_v53 = vadd.f32 %v2109_v43, %v2103_v51  ;;  %v3036_v42 = vpop.f32.mrb[19].mxu1  ;;  %v2444_v47 = vadd.f32 %v4230_v45, %v2438_v38  ;;  %v2111_v40 = vmul.f32 %v4196_v39, %v1907_v52  ;;  %v2431_v24 = vsel %vm1210_vm7, %v2397_v15, %v2430_v2 }
 0x375   : > { %v1765_v1 = vpop.f32.mrb[20].mxu0  ;;  %v2432_v38 = vsel %vm1212_vm8, %v2401_v57, %v2431_v24 }
 0x376   : > { %v2439_v49 = vadd.f32 %v2419_v11, %v2113_v53  ;;  %v2104_v3 = vmul.f32 %v4210_v21, %v1765_v1  ;;  %v3041_v17 = vpop.f32.mrb[21].mxu0  ;;  %v2448_v43 = vsel %vm1251_vm10, %v2444_v47, -inf  ;;  %v2433_v39 = vsel %vm1214_vm9, %v2405_v36, %v2432_v38 }
 0x377   : > { %v1768_v41 = vpop.f32.mrb[22].mxu0  ;;  %2449 = vmax.xlane.f32.xlu0 %v2448_v43  ;;  %v4321_v43 = vld [vmem:[%s4513_s3] sm:$0xff] }
 0x378   : > { %v2114_v4 = vadd.f32 %v2110_v30, %v2104_v3  ;;  %v3042_v58 = vpop.f32.mrb[23].mxu0  ;;  %v2445_v63 = vadd.f32 %v4230_v45, %v2439_v49 }
 0x379   : > { %v1818_v23 = vpop.f32.mrb[20].mxu1 }
 0x37a   : > { %v2440_v31 = vadd.f32 %v2426_v28, %v2114_v4  ;;  %v2105_v6 = vmul.f32 %v4210_v21, %v1818_v23  ;;  %v3047_v9 = vpop.f32.mrb[21].mxu1  ;;  %v2451_v12 = vsel %vm1251_vm10, %v2445_v63, -inf  ;;  %v4333_v4 = vld [vmem:[%s4513_s3 + $0x8] sm:$0xff] }
 0x37b   : > { %v1821_v13 = vpop.f32.mrb[22].mxu1  ;;  %2452 = vmax.xlane.f32.xlu1 %v2451_v12 }
 0x37c   : > { %v2115_v7 = vadd.f32 %v2111_v40, %v2105_v6  ;;  %v3048_v32 = vpop.f32.mrb[23].mxu1  ;;  %v2446_v51 = vadd.f32 %v4230_v45, %v2440_v31  ;;  %v4345_v40 = vld [vmem:[%s4513_s3 + $0x10] sm:$0xff] }
 0x37e   : > { %v2441_v18 = vadd.f32 %v2433_v39, %v2115_v7  ;;  %v2454_v26 = vsel %vm1251_vm10, %v2446_v51, -inf }
 0x37f   : > { %2455 = vmax.xlane.f32.xlu0 %v2454_v26 }
 0x380   : > { %v2447_v21 = vadd.f32 %v4230_v45, %v2441_v18 }
 0x382   : > { %v2457_v54 = vsel %vm1251_vm10, %v2447_v21, -inf }
 0x383   : > { %2458 = vmax.xlane.f32.xlu0 %v2457_v54 }
 0x38c   : > { %2588 = vrot.lane.b32.xlu1 %v3818_v33, %s3242_s10 }
 0x390   : > { %2636 = vrot.lane.b32.xlu1 %v3826_v34, %s3242_s10 }
 0x394   : > { %2761 = vrot.lane.b32.xlu1 %v4308_v62, %s3236_s19 }
 0x399   : > { %2540 = vrot.lane.b32.xlu0 %v3814_v56, %s3242_s10  ;;  %s4485_s10 = scalar_lea.vmem %s4516_s6, %s2901_s7 }
 0x404   : > { %v2450_v45 = vpop.xlane.xlu0 %2449 }
 0x405   : > { %v2460_v59 = vsub.f32 %v2444_v47, %v2450_v45 }
 0x407   : > { %v2464_v11 = vmul.f32 1.442695, %v2460_v59 }
 0x408   : > { %v2453_v33 = vpop.xlane.xlu1 %2452 }
 0x409   : > { %3174 = vpow2.f32 %v2464_v11  ;;  %v2461_v46 = vsub.f32 %v2445_v63, %v2453_v33 }
 0x40b   : > { %v2466_v34 = vmul.f32 1.442695, %v2461_v46 }
 0x40c   : > { %v2456_v50 = vpop.xlane.xlu0 %2455  ;;  %v2589_v42 = vpop.permute.xlu1 %2588 }
 0x40d   : > { %3176 = vpow2.f32 %v2466_v34  ;;  %v2462_v53 = vsub.f32 %v2446_v51, %v2456_v50  ;;  %v2594_v47 = vsel %vm1301_vm2, %v2589_v42, 0 }
 0x40f   : > { %v2468_v52 = vmul.f32 1.442695, %v2462_v53 }
 0x410   : > { %v2459_v20 = vpop.xlane.xlu0 %2458  ;;  %v2637_v49 = vpop.permute.xlu1 %2636 }
 0x411   : > { %3178 = vpow2.f32 %v2468_v52  ;;  %v2463_v55 = vsub.f32 %v2447_v21, %v2459_v20  ;;  %v2642_v61 = vsel %vm1301_vm2, %v2637_v49, 0  ;;  %v1492_v49 = vmul.f32 %v3979_v29, %v4321_v43 }
 0x413   : > { %v3175_v1 = vpop.eup %3174  ;;  %v2470_v30 = vmul.f32 1.442695, %v2463_v55 }
 0x414   : > { %v2541_v16 = vpop.permute.xlu0 %2540  ;;  %v2472_v56 = vsel %vm1251_vm10, %v3175_v1, 0.0  ;;  %v2488_v0 = vpack.c.bf16 %v3175_v1, %v3175_v1  ;;  %v2684_v57 = vmul.f32 %v3175_v1, %v4321_v43  ;;  %v2700_v23 = vmul.f32 %v3175_v1, %v4333_v4 }
 0x415   : > { %3180 = vpow2.f32 %v2470_v30  ;;  %v2546_v3 = vsel %vm1301_vm2, %v2541_v16, 0  ;;  %2473 = vadd.xlane.f32.xlu0 %v2472_v56  ;;  %v2716_v24 = vmul.f32 %v3175_v1, %v4345_v40  ;;  %v1276_v30 = vsel %vm1251_vm10, %v3956_v37, 0.0 }
 0x416   : > { %3052 = vmatmul.mubr.msk.bf16.vlgmr.msra.gmra.mrb[24].mxu0 %vm1251_vm10, %v2488_v0  ;;  %3056 = vmatpush3.bf16.msra.mxu1 %v2546_v3  ;;  %v2688_v36 = vsel %vm1251_vm10, %v2684_v57, 0.0  ;;  %v2704_v9 = vsel %vm1251_vm10, %v2700_v23, 0.0  ;;  %v1285_v16 = vsel %vm1251_vm10, %v3979_v29, 0.0  ;;  %v1490_v56 = vmul.f32 %v3949_v27, %v4321_v43 }
 0x417   : > { %v3177_v17 = vpop.eup %3176  ;;  %3062 = vmatpush3.bf16.msra.mxu0 %v2594_v47  ;;  %3063 = vmatprep.mubr.msk.bf16.mxu0 %vm3232_vm0, %v3231_v5  ;;  %v2720_v7 = vsel %vm1251_vm10, %v2716_v24, 0.0  ;;  %v1279_v0 = vsel %vm1251_vm10, %v3949_v27, 0.0  ;;  %v1282_v3 = vsel %vm1251_vm10, %v3971_v8, 0.0  ;;  %v1507_v23 = vmul.f32 %v3971_v8, %v4333_v4 }
 0x418   : > { %v2475_v15 = vsel %vm1251_vm10, %v3177_v17, 0.0  ;;  %v2489_v41 = vpack.c.bf16 %v3177_v17, %v3177_v17  ;;  %v2685_v22 = vmul.f32 %v3177_v17, %v4321_v43  ;;  %3067 = vmatprep.subr.bf16.mxu1 %v3231_v5  ;;  %v2701_v63 = vmul.f32 %v3177_v17, %v4333_v4 }
 0x419   : > { %2476 = vadd.xlane.f32.xlu1 %v2475_v15  ;;  %v2717_v31 = vmul.f32 %v3177_v17, %v4345_v40  ;;  %v1496_v47 = vsel %vm1251_vm10, %v1490_v56, 0.0  ;;  %v1506_v15 = vmul.f32 %v3949_v27, %v4333_v4 }
 0x41a   : > { %3058 = vmatmul.mubr.msk.bf16.vlgmr.msra.gmra.mrb[24].mxu1 %vm1251_vm10, %v2489_v41  ;;  %v2691_v58 = vsel %vm1251_vm10, %v2685_v22, 0.0  ;;  %v2707_v2 = vsel %vm1251_vm10, %v2701_v63, 0.0  ;;  %v1491_v22 = vmul.f32 %v3971_v8, %v4321_v43 }
 0x41b   : > { %v3179_v44 = vpop.eup %3178  ;;  %2692 = vadd.xlane.f32.xlu0 %v2691_v58  ;;  %3068 = vmatpush3.bf16.msra.mxu1 %v2642_v61  ;;  %v2723_v13 = vsel %vm1251_vm10, %v2717_v31, 0.0  ;;  %v1502_v61 = vsel %vm1251_vm10, %v1492_v49, 0.0  ;;  %v1512_v57 = vsel %vm1251_vm10, %v1506_v15, 0.0  ;;  %v1508_v58 = vmul.f32 %v3979_v29, %v4333_v4 }
 0x41c   : > { %v2490_v28 = vpack.c.bf16 %v3179_v44, %v3179_v44  ;;  %3069 = vmatprep.mubr.msk.bf16.mxu1 %vm3232_vm0, %v3231_v5  ;;  %v4355_v5 = vld [vmem:[%s4513_s3 + $0x18] sm:$0xff]  ;;  %v2686_v18 = vmul.f32 %v3179_v44, %v4321_v43  ;;  %v2478_v26 = vsel %vm1251_vm10, %v3179_v44, 0.0  ;;  %v2702_v54 = vmul.f32 %v3179_v44, %v4333_v4 }
 0x41d   : > { %2689 = vadd.xlane.f32.xlu1 %v2688_v36  ;;  %v2733_v38 = vmul.f32 %v3177_v17, %v4355_v5  ;;  %v2732_v32 = vmul.f32 %v3175_v1, %v4355_v5  ;;  %v2718_v11 = vmul.f32 %v3179_v44, %v4345_v40  ;;  %v2734_v50 = vmul.f32 %v3179_v44, %v4355_v5 }
 0x41e   : > { %3064 = vmatmul.mubr.msk.bf16.vlgmr.msra.gmra.mrb[28].mxu0 %vm1251_vm10, %v2490_v28  ;;  %v2694_v21 = vsel %vm1251_vm10, %v2686_v18, 0.0  ;;  %v2710_v59 = vsel %vm1251_vm10, %v2702_v54, 0.0  ;;  %v1489_v17 = vmul.f32 %v3956_v37, %v4321_v43  ;;  %v1499_v63 = vsel %vm1251_vm10, %v1491_v22, 0.0  ;;  %v4442_v54 = vpop.permute.xlu1 %2761 }
 0x41f   : > { %v3181_v6 = vpop.eup %3180  ;;  %2708 = vadd.xlane.f32.xlu0 %v2707_v2  ;;  %v2739_v51 = vsel %vm1251_vm10, %v2733_v38, 0.0  ;;  %v2736_v39 = vsel %vm1251_vm10, %v2732_v32, 0.0  ;;  %v2726_v34 = vsel %vm1251_vm10, %v2718_v11, 0.0  ;;  %v2742_v52 = vsel %vm1251_vm10, %v2734_v50, 0.0 }
 0x420   : > { %v2491_v12 = vpack.c.bf16 %v3181_v6, %v3181_v6  ;;  %v2481_v19 = vsel %vm1251_vm10, %v3181_v6, 0.0  ;;  %v2687_v45 = vmul.f32 %v3181_v6, %v4321_v43  ;;  %v2703_v46 = vmul.f32 %v3181_v6, %v4333_v4 }
 0x421   : > { %2705 = vadd.xlane.f32.xlu1 %v2704_v9  ;;  %v2719_v42 = vmul.f32 %v3181_v6, %v4345_v40  ;;  %v2735_v55 = vmul.f32 %v3181_v6, %v4355_v5  ;;  %v1493_v41 = vsel %vm1251_vm10, %v1489_v17, 0.0  ;;  %v1505_v44 = vmul.f32 %v3956_v37, %v4333_v4 }
 0x422   : > { %3070 = vmatmul.mubr.msk.bf16.vlgmr.msra.gmra.mrb[28].mxu1 %vm1251_vm10, %v2491_v12  ;;  %v2697_v33 = vsel %vm1251_vm10, %v2687_v45, 0.0  ;;  %v2713_v53 = vsel %vm1251_vm10, %v2703_v46, 0.0  ;;  %v1518_v36 = vsel %vm1251_vm10, %v1508_v58, 0.0  ;;  %v1522_v28 = vmul.f32 %v3949_v27, %v4345_v40 }
 0x423   : > { %2724 = vadd.xlane.f32.xlu0 %v2723_v13  ;;  %v2729_v20 = vsel %vm1251_vm10, %v2719_v42, 0.0  ;;  %v2745_v1 = vsel %vm1251_vm10, %v2735_v55, 0.0  ;;  %v1509_v43 = vsel %vm1251_vm10, %v1505_v44, 0.0  ;;  %v1524_v31 = vmul.f32 %v3979_v29, %v4345_v40 }
 0x424   : > { %v1528_v2 = vsel %vm1251_vm10, %v1522_v28, 0.0  ;;  %v1515_v6 = vsel %vm1251_vm10, %v1507_v23, 0.0  ;;  %v1521_v9 = vmul.f32 %v3956_v37, %v4345_v40  ;;  %v1538_v24 = vmul.f32 %v3949_v27, %v4355_v5 }
 0x425   : > { %2721 = vadd.xlane.f32.xlu1 %v2720_v7  ;;  %v1534_v12 = vsel %vm1251_vm10, %v1524_v31, 0.0  ;;  %v1523_v13 = vmul.f32 %v3971_v8, %v4345_v40  ;;  %v1540_v7 = vmul.f32 %v3979_v29, %v4355_v5  ;;  %v1539_v40 = vmul.f32 %v3971_v8, %v4355_v5 }
 0x426   : > { %v1525_v4 = vsel %vm1251_vm10, %v1521_v9, 0.0  ;;  %v1544_v38 = vsel %vm1251_vm10, %v1538_v24, 0.0 }
 0x427   : > { %2740 = vadd.xlane.f32.xlu0 %v2739_v51  ;;  %v1531_v32 = vsel %vm1251_vm10, %v1523_v13, 0.0  ;;  %v1537_v51 = vmul.f32 %v3956_v37, %v4355_v5  ;;  %v1550_v27 = vsel %vm1251_vm10, %v1540_v7, 0.0  ;;  %v1547_v18 = vsel %vm1251_vm10, %v1539_v40, 0.0 }
 0x429   : > { %2737 = vadd.xlane.f32.xlu1 %v2736_v39  ;;  %v1541_v39 = vsel %vm1251_vm10, %v1537_v51, 0.0 }
 0x42b   : > { %2479 = vadd.xlane.f32.xlu0 %v2478_v26 }
 0x42d   : > { %2695 = vadd.xlane.f32.xlu1 %v2694_v21 }
 0x42f   : > { %2482 = vadd.xlane.f32.xlu0 %v2481_v19 }
 0x431   : > { %2711 = vadd.xlane.f32.xlu1 %v2710_v59 }
 0x433   : > { %2698 = vadd.xlane.f32.xlu0 %v2697_v33 }
 0x435   : > { %2727 = vadd.xlane.f32.xlu1 %v2726_v34 }
 0x437   : > { %2714 = vadd.xlane.f32.xlu0 %v2713_v53 }
 0x439   : > { %2743 = vadd.xlane.f32.xlu1 %v2742_v52 }
 0x43b   : > { %2730 = vadd.xlane.f32.xlu0 %v2729_v20 }
 0x43f   : > { %2746 = vadd.xlane.f32.xlu0 %v2745_v1 }
 0x44a   : > { %2785 = vrot.lane.b32.xlu1 %v3345_v14, %s3236_s19 }
 0x455   : > { %2769 = vrot.lane.b32.xlu0 %v3334_v10, %s3236_s19  ;;  %s3243_s19 = smov 4  }
 0x46e   : > { %1277 = vadd.xlane.f32.xlu1 %v1276_v30 }
 0x472   : > { %1286 = vadd.xlane.f32.xlu1 %v1285_v16 }
 0x474   : > { %1280 = vadd.xlane.f32.xlu0 %v1279_v0 }
 0x476   : > { %1497 = vadd.xlane.f32.xlu1 %v1496_v47 }
 0x478   : > { %1283 = vadd.xlane.f32.xlu0 %v1282_v3 }
 0x47a   : > { %1503 = vadd.xlane.f32.xlu1 %v1502_v61 }
 0x47c   : > { %1494 = vadd.xlane.f32.xlu0 %v1493_v41 }
 0x47e   : > { %1513 = vadd.xlane.f32.xlu1 %v1512_v57 }
 0x480   : > { %1500 = vadd.xlane.f32.xlu0 %v1499_v63 }
 0x482   : > { %1519 = vadd.xlane.f32.xlu1 %v1518_v36 }
 0x484   : > { %1510 = vadd.xlane.f32.xlu0 %v1509_v43 }
 0x486   : > { %1529 = vadd.xlane.f32.xlu1 %v1528_v2 }
 0x488   : > { %1516 = vadd.xlane.f32.xlu0 %v1515_v6 }
 0x48a   : > { %1535 = vadd.xlane.f32.xlu1 %v1534_v12 }
 0x48c   : > { %1526 = vadd.xlane.f32.xlu0 %v1525_v4 }
 0x48e   : > { %1545 = vadd.xlane.f32.xlu1 %v1544_v38 }
 0x490   : > { %1532 = vadd.xlane.f32.xlu0 %v1531_v32 }
 0x492   : > { %1551 = vadd.xlane.f32.xlu1 %v1550_v27 }
 0x494   : > { %1542 = vadd.xlane.f32.xlu0 %v1541_v39 }
 0x498   : > { %1548 = vadd.xlane.f32.xlu0 %v1547_v18 }
 0x4a2   : > { %v2474_v29 = vpop.xlane.xlu0 %2473 }
 0x4a3   : > { %3182 = vrcp.f32 %v2474_v29 }
 0x4a6   : > { %v2477_v37 = vpop.xlane.xlu1 %2476 }
 0x4a7   : > { %3184 = vrcp.f32 %v2477_v37 }
 0x4a8   : > { %v2693_v26 = vpop.xlane.xlu0 %2692 }
 0x4aa   : > { %v2690_v59 = vpop.xlane.xlu1 %2689 }
 0x4ac   : > { %v2709_v21 = vpop.xlane.xlu0 %2708 }
 0x4ad   : > { %v2749_v61 = vsel %vm1553_vm11, %v2693_v26, %v2709_v21  ;;  %v3183_v58 = vpop.eup %3182 }
 0x4ae   : > { %v2706_v33 = vpop.xlane.xlu1 %2705 }
 0x4af   : > { %v2748_v1 = vsel %vm1553_vm11, %v2690_v59, %v2706_v33 }
 0x4b0   : > { %v2725_v19 = vpop.xlane.xlu0 %2724 }
 0x4b1   : > { %v2753_v41 = vsel %vm288_vm1, %v2749_v61, %v2725_v19  ;;  %v3185_v13 = vpop.eup %3184 }
 0x4b2   : > { %v2722_v34 = vpop.xlane.xlu1 %2721 }
 0x4b3   : > { %v2752_v16 = vsel %vm288_vm1, %v2748_v1, %v2722_v34 }
 0x4b4   : > { %v2741_v45 = vpop.xlane.xlu0 %2740 }
 0x4b5   : > { %v2757_v63 = vsel %vm1562_vm12, %v2753_v41, %v2741_v45 }
 0x4b6   : > { %v2738_v53 = vpop.xlane.xlu1 %2737 }
 0x4b7   : > { %v2756_v56 = vsel %vm1562_vm12, %v2752_v16, %v2738_v53 }
 0x4b8   : > { %v2480_v11 = vpop.xlane.xlu0 %2479 }
 0x4b9   : > { %3186 = vrcp.f32 %v2480_v11 }
 0x4ba   : > { %v2696_v5 = vpop.xlane.xlu1 %2695 }
 0x4bc   : > { %v2483_v46 = vpop.xlane.xlu0 %2482 }
 0x4bd   : > { %3188 = vrcp.f32 %v2483_v46 }
 0x4be   : > { %v2712_v52 = vpop.xlane.xlu1 %2711 }
 0x4bf   : > { %v2750_v31 = vsel %vm1553_vm11, %v2696_v5, %v2712_v52 }
 0x4c0   : > { %v2699_v50 = vpop.xlane.xlu0 %2698 }
 0x4c2   : > { %v2728_v55 = vpop.xlane.xlu1 %2727 }
 0x4c3   : > { %v2754_v9 = vsel %vm288_vm1, %v2750_v31, %v2728_v55  ;;  %v3187_v45 = vpop.eup %3186 }
 0x4c4   : > { %v2715_v8 = vpop.xlane.xlu0 %2714 }
 0x4c5   : > { %v2751_v18 = vsel %vm1553_vm11, %v2699_v50, %v2715_v8 }
 0x4c6   : > { %v2744_v0 = vpop.xlane.xlu1 %2743 }
 0x4c7   : > { %v2758_v38 = vsel %vm1562_vm12, %v2754_v9, %v2744_v0 }
 0x4c8   : > { %v2731_v42 = vpop.xlane.xlu0 %2730 }
 0x4c9   : > { %v2755_v26 = vsel %vm288_vm1, %v2751_v18, %v2731_v42  ;;  %v3189_v42 = vpop.eup %3188  ;;  %v1571_v18 = vmul.f32 %v4308_v62, %v4125_v48 }
 0x4ca   : > { %v2786_v36 = vpop.permute.xlu1 %2785 }
 0x4cc   : > { %v2747_v20 = vpop.xlane.xlu0 %2746 }
 0x4cd   : > { %v2759_v59 = vsel %vm1562_vm12, %v2755_v26, %v2747_v20 }
 0x4d0   : > { %v2770_v30 = vpop.permute.xlu0 %2769 }
 0x4d1   : > { %v2772_v3 = vmul.f32 %v2770_v30, %v2756_v56  ;;  %v2773_v23 = vmul.f32 %v2770_v30, %v2757_v63  ;;  %v2774_v39 = vmul.f32 %v2770_v30, %v2758_v38  ;;  %v2775_v53 = vmul.f32 %v2770_v30, %v2759_v59 }
 0x4e9   : > { %v2534_v47 = vpop.f32.mrb[24].mxu0 }
 0x4ea   : > { %v2764_v49 = vmul.f32 %v4442_v54, %v2534_v47  ;;  %v3053_v17 = vpop.f32.mrb[25].mxu0 }
 0x4eb   : > { %v2537_v15 = vpop.f32.mrb[26].mxu0 }
 0x4ec   : > { %v2776_v22 = vadd.f32 %v2772_v3, %v2764_v49  ;;  %v3054_v57 = vpop.f32.mrb[27].mxu0 }
 0x4ed   : > { %v2582_v44 = vpop.f32.mrb[24].mxu1 }
 0x4ee   : > { %v2780_v28 = vmul.f32 %v3183_v58, %v2776_v22  ;;  %v2765_v43 = vmul.f32 %v4442_v54, %v2582_v44  ;;  %v3059_v2 = vpop.f32.mrb[25].mxu1 }
 0x4ef   : > { %v2585_v6 = vpop.f32.mrb[26].mxu1  ;;  %v1572_v2 = vmul.f32 %v4308_v62, %v4121_v60 }
 0x4f0   : > { %v2777_v12 = vadd.f32 %v2773_v23, %v2765_v43  ;;  %v2788_v24 = vadd.f32 %v2786_v36, %v2780_v28  ;;  %v3060_v4 = vpop.f32.mrb[27].mxu1 }
 0x4f1   : > { %v2630_v7 = vpop.f32.mrb[28].mxu0 }
 0x4f2   : > { %v2781_v32 = vmul.f32 %v3185_v13, %v2777_v12  ;;  %v2941_v51 = vpack.c.bf16 %v2788_v24, %v2788_v24  ;;  %v2766_v27 = vmul.f32 %v4442_v54, %v2630_v7  ;;  %v3065_v40 = vpop.f32.mrb[29].mxu0 }
 0x4f3   : > { %v2633_v29 = vpop.f32.mrb[30].mxu0 }
 0x4f4   : > { %v2789_v21 = vadd.f32 %v2786_v36, %v2781_v32  ;;  %v2778_v19 = vadd.f32 %v2774_v39, %v2766_v27  ;;  %v3066_v37 = vpop.f32.mrb[31].mxu0  ;;  %2808 = vrot.lane.b32.xlu0 %v2941_v51, %s3243_s19  ;;  %v1574_v32 = vmul.f32 %v4308_v62, %v4207_v35 }
 0x4f5   : > { %v2678_v11 = vpop.f32.mrb[28].mxu1 }
 0x4f6   : > { %v2942_v33 = vpack.c.bf16 %v2789_v21, %v2789_v21  ;;  %v2782_v46 = vmul.f32 %v3187_v45, %v2778_v19  ;;  %v2767_v34 = vmul.f32 %v4442_v54, %v2678_v11  ;;  %v3071_v5 = vpop.f32.mrb[29].mxu1 }
 0x4f7   : > { %v2681_v52 = vpop.f32.mrb[30].mxu1 }
 0x4f8   : > { %v2790_v50 = vadd.f32 %v2786_v36, %v2782_v46  ;;  %v2779_v8 = vadd.f32 %v2775_v53, %v2767_v34  ;;  %v3072_v55 = vpop.f32.mrb[31].mxu1  ;;  %2810 = vrot.lane.b32.xlu1 %v2942_v33, %s3243_s19  ;;  %v1573_v34 = vmul.f32 %v4308_v62, %v4185_v25 }
 0x4fa   : > { %v2943_v1 = vpack.c.bf16 %v2790_v50, %v2790_v50  ;;  %v2783_v16 = vmul.f32 %v3189_v42, %v2779_v8 }
 0x4fb   : > { %v1278_v56 = vpop.xlane.xlu1 %1277 }
 0x4fc   : > { %v2791_v0 = vadd.f32 %v2786_v36, %v2783_v16  ;;  %2812 = vrot.lane.b32.xlu1 %v2943_v1, %s3243_s19 }
 0x4fe   : > { %v2944_v47 = vpack.c.bf16 %v2791_v0, %v2791_v0 }
 0x4ff   : > { %v1287_v20 = vpop.xlane.xlu1 %1286 }
 0x500   : > { %2814 = vrot.lane.b32.xlu0 %v2944_v47, %s3243_s19 }
 0x501   : > { %v1281_v49 = vpop.xlane.xlu0 %1280 }
 0x502   : > { %3190 = vrcp.f32 %v1281_v49 }
 0x503   : > { %v1498_v3 = vpop.xlane.xlu1 %1497  ;;  %3192 = vrcp.f32 %v1287_v20 }
 0x504   : > { %3194 = vrcp.f32 %v1278_v56 }
 0x505   : > { %v1284_v17 = vpop.xlane.xlu0 %1283 }
 0x506   : > { %3196 = vrcp.f32 %v1284_v17 }
 0x507   : > { %v1504_v54 = vpop.xlane.xlu1 %1503 }
 0x509   : > { %v1495_v30 = vpop.xlane.xlu0 %1494 }
 0x50b   : > { %v1514_v61 = vpop.xlane.xlu1 %1513 }
 0x50c   : > { %v1555_v36 = vsel %vm1553_vm11, %v1498_v3, %v1514_v61  ;;  %v3191_v13 = vpop.eup %3190 }
 0x50d   : > { %v1501_v15 = vpop.xlane.xlu0 %1500  ;;  %v3193_v19 = vpop.eup %3192 }
 0x50e   : > { %v3195_v33 = vpop.eup %3194 }
 0x50f   : > { %v1520_v41 = vpop.xlane.xlu1 %1519 }
 0x510   : > { %v1557_v9 = vsel %vm1553_vm11, %v1504_v54, %v1520_v41  ;;  %v3197_v42 = vpop.eup %3196 }
 0x511   : > { %v1511_v22 = vpop.xlane.xlu0 %1510 }
 0x512   : > { %v1554_v38 = vsel %vm1553_vm11, %v1495_v30, %v1511_v22 }
 0x513   : > { %v1530_v57 = vpop.xlane.xlu1 %1529 }
 0x514   : > { %v1559_v28 = vsel %vm288_vm1, %v1555_v36, %v1530_v57 }
 0x515   : > { %v1517_v58 = vpop.xlane.xlu0 %1516 }
 0x516   : > { %v1556_v37 = vsel %vm1553_vm11, %v1501_v15, %v1517_v58 }
 0x517   : > { %v1536_v63 = vpop.xlane.xlu1 %1535 }
 0x518   : > { %v1561_v12 = vsel %vm288_vm1, %v1557_v9, %v1536_v63 }
 0x519   : > { %v1527_v44 = vpop.xlane.xlu0 %1526 }
 0x51a   : > { %v1558_v60 = vsel %vm288_vm1, %v1554_v38, %v1527_v44 }
 0x51b   : > { %v1546_v43 = vpop.xlane.xlu1 %1545 }
 0x51c   : > { %v1564_v23 = vsel %vm1562_vm12, %v1559_v28, %v1546_v43 }
 0x51d   : > { %v1580_v31 = vmul.f32 %v3334_v10, %v1564_v23  ;;  %v1533_v6 = vpop.xlane.xlu0 %1532 }
 0x51e   : > { %v1560_v45 = vsel %vm288_vm1, %v1556_v37, %v1533_v6 }
 0x51f   : > { %v1584_v24 = vadd.f32 %v1580_v31, %v1572_v2  ;;  %v1552_v4 = vpop.xlane.xlu1 %1551 }
 0x520   : > { %v1566_v7 = vsel %vm1562_vm12, %v1561_v12, %v1552_v4 }
 0x521   : > { %v1588_v51 = vmul.f32 %v3191_v13, %v1584_v24  ;;  %v1582_v27 = vmul.f32 %v3334_v10, %v1566_v7  ;;  %v1543_v39 = vpop.xlane.xlu0 %1542 }
 0x522   : > { %v1563_v40 = vsel %vm1562_vm12, %v1558_v60, %v1543_v39 }
 0x523   : > { %v1596_v29 = vadd.f32 %v3345_v14, %v1588_v51  ;;  %v1586_v26 = vadd.f32 %v1582_v27, %v1574_v32  ;;  %v1579_v21 = vmul.f32 %v3334_v10, %v1563_v40 }
 0x525   : > { %v1600_v35 = vpack.c.bf16 %v1596_v29, %v1596_v29  ;;  %v1590_v48 = vmul.f32 %v3193_v19, %v1586_v26  ;;  %v1583_v59 = vadd.f32 %v1579_v21, %v1571_v18  ;;  %v1549_v11 = vpop.xlane.xlu0 %1548 }
 0x526   : > { %v1565_v46 = vsel %vm1562_vm12, %v1560_v45, %v1549_v11 }
 0x527   : > { %v1598_v53 = vadd.f32 %v3345_v14, %v1590_v48  ;;  %v1587_v5 = vmul.f32 %v3195_v33, %v1583_v59  ;;  %v1581_v52 = vmul.f32 %v3334_v10, %v1565_v46  ;;  %1605 = vst.msk [vmem:[%s4485_s10 + $0x4] sm:$0xf] %vm1603_vm13, %v1600_v35 }
 0x529   : > { %v1602_v50 = vpack.c.bf16 %v1598_v53, %v1598_v53  ;;  %v1595_v8 = vadd.f32 %v3345_v14, %v1587_v5  ;;  %v1585_v55 = vadd.f32 %v1581_v52, %v1573_v34 }
 0x52b   : > { %v1599_v1 = vpack.c.bf16 %v1595_v8, %v1595_v8  ;;  %v1589_v16 = vmul.f32 %v3197_v42, %v1585_v55  ;;  %1607 = vst.msk [vmem:[%s4485_s10 + $0xc] sm:$0xf] %vm1603_vm13, %v1602_v50 }
 0x52d   : > { %v1597_v25 = vadd.f32 %v3345_v14, %v1589_v16  ;;  %1604 = vst.msk [vmem:[%s4485_s10] sm:$0xf] %vm1603_vm13, %v1599_v1 }
 0x52f   : > { %v1601_v62 = vpack.c.bf16 %v1597_v25, %v1597_v25 }
 0x531   : > { %1606 = vst.msk [vmem:[%s4485_s10 + $0x8] sm:$0xf] %vm1603_vm13, %v1601_v62 }
 0x566   : > { %v2809_v10 = vpop.permute.xlu0 %2808 }
 0x567   : > { %2821 = vst.msk [vmem:[%s4485_s10] sm:$0xf] %vm2820_vm14, %v2809_v10 }
 0x56a   : > { %v2811_v56 = vpop.permute.xlu1 %2810 }
 0x56b   : > { %2822 = vst.msk [vmem:[%s4485_s10 + $0x4] sm:$0xf] %vm2820_vm14, %v2811_v56 }
 0x56e   : > { %v2813_v0 = vpop.permute.xlu1 %2812 }
 0x56f   : > { %2823 = vst.msk [vmem:[%s4485_s10 + $0x8] sm:$0xf] %vm2820_vm14, %v2813_v0 }
 0x572   : > { %v2815_v47 = vpop.permute.xlu0 %2814 }
 0x573   : > { %2824 = vst.msk [vmem:[%s4485_s10 + $0xc] sm:$0xf] %vm2820_vm14, %v2815_v47 }
 0x574 PF: > { %s17_s21 = sadd.s32 1, %s3226_s21  }
 0x575   : > { %p14_p1 = scmp.ge.s32.totalorder %s17_s21, 6  }
 0x577   :  { %16 = sbr.rel (!%p14_p1) target bundleno = 1 (0x1), region = 79 }
 0x57e   :  { %2847 = vsyncpa [#allocation3], 1 }
 0x57f   :  { %2849 = vsyncpa [#allocation3 + $0x1], 1 }

</bundles_post_ra>
